<compile_context>
chip_gen: v7x
topology: tpu7x:2x2x1
jax: 0.10.0
libtpu: 0.0.40
codegen_flags: <defaults>
</compile_context>

<pallas_src>
import functools

import numpy as np
import jax
import jax.numpy as jnp
from jax import lax
from jax.experimental import pallas as pl
from jax.experimental.pallas import tpu as pltpu

LANE = 128


def _round_up(x, m):
    return (x + m - 1) // m * m


def _largest_divisor_leq(n, k):
    k = max(1, min(n, k))
    for d in range(k, 0, -1):
        if n % d == 0:
            return d
    return 1


def _vmem_limit(need_bytes):
    # Size the scoped-VMEM limit from the actual block footprint (+ headroom),
    # bounded by the device's physical VMEM (64 MiB on v7x, 128 on v5e/v6e).
    cap = 64 << 20
    try:
        cap = int(getattr(pltpu.get_tpu_info(), "vmem_capacity_bytes", cap))
    except Exception:
        pass
    return int(min(max(2 * int(need_bytes) + (8 << 20), 32 << 20),
                   (cap * 3) // 4))


# ----------------------------------------------------------------------------
# Kernel 1: fused BN1 (folded scale/bias) + ReLU + 1x1 conv  ==  row matmul,
# plus per-tile [sum, centered M2] of the stored output (for BN2 stats).
#   x2d    : (Mp, Cin)         flattened NHWC pixels (zero padded rows >= M)
#   scale1 : (1, Cin), bias1 : (1, Cin)
#   w1     : (Cin, Cmid_pad)   1x1 conv weight, lane-padded output channels
#   y      : (Mp, Cmid_pad)    stored in the matmul dtype (bf16 fast path)
#   stats  : (num_tiles, 2, Cmid_pad)  [sum, M2] per tile (tail rows masked,
#            and only on the last tile when M was padded)
# NOTE: padded tail rows of x2d produce nonzero y rows (relu(bias1) @ w1);
# they are masked from the stats and never read by kernel 2 — wasted bandwidth
# only, any future consumer of the padded region must not assume zeros.
# ----------------------------------------------------------------------------
def _bn_relu_conv1x1_kernel(x_ref, s_ref, b_ref, w_ref, y_ref, stats_ref, *,
                            tm, m_valid, nt):
    has_tail = (nt * tm) != m_valid

    x = x_ref[...].astype(jnp.float32)
    a = jnp.maximum(x * s_ref[...] + b_ref[...], 0.0)            # f32 VPU
    y = jnp.dot(a.astype(w_ref.dtype), w_ref[...],               # MXU
                preferred_element_type=jnp.float32)
    y_st = y.astype(y_ref.dtype)
    y_ref[...] = y_st
    # BN2 partials computed on the value *as stored* (post bf16 rounding on the
    # fast path), so the applied normalization matches the stored tensor.
    ys = y_st.astype(jnp.float32)

    def full_tile_stats():
        s = jnp.sum(ys, axis=0, keepdims=True)                   # (1, cmid_p)
        d = ys - s * (1.0 / tm)
        stats_ref[0, 0:1, :] = s
        stats_ref[0, 1:2, :] = jnp.sum(d * d, axis=0, keepdims=True)

    if not has_tail:
        full_tile_stats()
    else:
        i = pl.program_id(0)

        @pl.when(i < nt - 1)
        def _():
            full_tile_stats()

        @pl.when(i == nt - 1)
        def _():
            cnt = float(m_valid - (nt - 1) * tm)
            row = (nt - 1) * tm + lax.broadcasted_iota(jnp.int32, (tm, 1), 0)
            valid = row < m_valid
            yv = jnp.where(valid, ys, 0.0)
            s = jnp.sum(yv, axis=0, keepdims=True)
            d = jnp.where(valid, ys - s * (1.0 / cnt), 0.0)
            stats_ref[0, 0:1, :] = s
            stats_ref[0, 1:2, :] = jnp.sum(d * d, axis=0, keepdims=True)


def bn_relu_conv1x1(x2d, scale1, bias1, w1m, *, tm_target=1024):
    m, cin = x2d.shape
    cmid_p = w1m.shape[1]

    # Prefer a row tile that divides M exactly (no padded tail / masking, and
    # the reshape to (N,H,W,Cmid_pad) handed to kernel 2 stays copy-free).
    cap = min(tm_target, _round_up(m, 8))
    tm = _round_up(cap, 8)                         # fallback: pad + mask
    for cand in range(cap - cap % 8, 7, -8):
        if m % cand == 0:
            tm = cand
            break
    mp = _round_up(m, tm)
    if mp != m:
        x2d = jnp.pad(x2d, ((0, mp - m), (0, 0)))
    nt = mp // tm

    counts = [float(tm)] * nt
    if mp != m:
        counts[-1] = float(m - (nt - 1) * tm)
    counts = jnp.asarray(counts, jnp.float32)

    itm_w = jnp.dtype(w1m.dtype).itemsize
    need = (2 * (tm * cin * 4 + tm * cmid_p * itm_w + 2 * cmid_p * 4)
            + cin * cmid_p * itm_w + 2 * cin * 4)

    kernel = functools.partial(_bn_relu_conv1x1_kernel, tm=tm, m_valid=m,
                               nt=nt)
    y2d, stats = pl.pallas_call(
        kernel,
        out_shape=(jax.ShapeDtypeStruct((mp, cmid_p), w1m.dtype),
                   jax.ShapeDtypeStruct((nt, 2, cmid_p), jnp.float32)),
        grid_spec=pltpu.PrefetchScalarGridSpec(
            num_scalar_prefetch=0,
            grid=(nt,),
            in_specs=[
                pl.BlockSpec((tm, cin), lambda i: (i, 0)),
                pl.BlockSpec((1, cin), lambda i: (0, 0)),
                pl.BlockSpec((1, cin), lambda i: (0, 0)),
                pl.BlockSpec((cin, cmid_p), lambda i: (0, 0)),
            ],
            out_specs=(
                pl.BlockSpec((tm, cmid_p), lambda i: (i, 0)),
                pl.BlockSpec((1, 2, cmid_p), lambda i: (i, 0, 0)),
            ),
        ),
        compiler_params=pltpu.CompilerParams(
            dimension_semantics=("parallel",),
            vmem_limit_bytes=_vmem_limit(need)),
    )(x2d, scale1, bias1, w1m)
    return y2d, stats, counts


# ----------------------------------------------------------------------------
# Kernel 2: fused BN2 (folded) + ReLU + 3x3 conv (padding=1), nb images per
# grid step ("parallel" over the batch grid axis).
#   y      : (nb, H, W, Cmid_pad)       (mxu dtype)
#   scale2 : (1, Cmid_pad), bias2 : (1, Cmid_pad)   (zero on padded channels)
#   w_t    : (3, cout, 3*Cmid_pad)      w_t[kh][co, kw*Cmid_pad + ci]
#   out    : (nb, cout, H*W)            channel-major (NCHW-ready), mxu dtype
# kw shifts are pltpu.roll along W with the wrap column zeroed in-register;
# the three taps are stacked on the lane axis of an H-halo scratch so each kh
# tap is one fat matmul with a 3*Cmid contraction.  The result is produced
# channel-major so the store lane axis is H*W (dense, no padded channels).
# ----------------------------------------------------------------------------
def _bn_relu_conv3x3_kernel(y_ref, s_ref, b_ref, w_ref, o_ref, pad_ref, *,
                            H, W, cp, cout, nb, ch, chs):
    dt = pad_ref.dtype
    s = s_ref[...].reshape(1, 1, cp)
    b = b_ref[...].reshape(1, 1, cp)
    # Hoisted constants (re-used across all loops below).
    col = lax.broadcasted_iota(jnp.int32, (W, cp), 0)
    mask_lo = col >= 1                       # valid lanes for the kw=0 tap
    mask_hi = col <= (W - 2)                 # valid lanes for the kw=2 tap
    w_taps = [w_ref[0], w_ref[1], w_ref[2]]  # (cout, 3*cp) each, tiny
    chw = ch * W
    nh = H // ch
    nhs = H // chs

    # Zero the two halo rows (h = -1 and h = H).  Two tiny stores per grid
    # step: kept per-step (not step-0-only) so a megacore split of the
    # "parallel" grid axis stays correct (each core has its own scratch).
    zrow = jnp.zeros((1, W, 3 * cp), dt)
    pad_ref[0:1] = zrow
    pad_ref[H + 1:H + 2] = zrow

    def conv_rows(bidx, c):
        # One output row-band: 3 fat matmuls (contraction 3*cp), channel-major
        # result stored with lane axis = flat H*W offset.
        h0 = c * ch
        acc = jnp.zeros((cout, chw), jnp.float32)
        for kh in range(3):
            patch = pad_ref[pl.ds(h0 + kh, ch)]                 # (ch, W, 3*cp)
            acc = acc + lax.dot_general(
                w_taps[kh], patch.reshape(chw, 3 * cp),
                dimension_numbers=(((1,), (1,)), ((), ())),
                preferred_element_type=jnp.float32)
        if isinstance(c, int):
            off = c * chw
        else:
            off = c * chw
            if chw % LANE == 0:
                off = pl.multiple_of(off, chw)
        o_ref[pl.ds(bidx, 1), :, pl.ds(off, chw)] = \
            acc.reshape(1, cout, chw).astype(o_ref.dtype)

    for bidx in range(nb):                    # nb <= 8 by construction
        # --- stage relu(bn2(y)) + kw shifts, a few rows at a time so the live
        #     f32 activation stays within the vreg file (no spills).
        def stage(c, cy):
            h0 = c * chs
            yb = y_ref[pl.ds(bidx, 1), pl.ds(h0, chs)][0].astype(jnp.float32)
            a = jnp.maximum(yb * s + b, 0.0)                    # (chs, W, cp)
            a0 = jnp.where(mask_lo, pltpu.roll(a, 1, axis=1), 0.0)        # kw=0
            a2 = jnp.where(mask_hi, pltpu.roll(a, W - 1, axis=1), 0.0)    # kw=2
            pad_ref[pl.ds(h0 + 1, chs), :, cp:2 * cp] = a.astype(dt)      # kw=1
            pad_ref[pl.ds(h0 + 1, chs), :, 0:cp] = a0.astype(dt)
            pad_ref[pl.ds(h0 + 1, chs), :, 2 * cp:3 * cp] = a2.astype(dt)
            return cy

        lax.fori_loop(0, nhs, stage, 0, unroll=min(nhs, 8))

        # --- compute.  Small trip counts use a static Python loop (static
        #     lane offsets); larger maps fall back to a capped-unroll loop.
        if nh <= 8:
            for c in range(nh):
                conv_rows(bidx, c)
        else:
            lax.fori_loop(0, nh,
                          lambda c, cy: (conv_rows(bidx, c), cy)[1], 0,
                          unroll=4)


def bn_relu_conv3x3(y_nhwc, scale2, bias2, w_t, out_dtype):
    n, H, W, cp = y_nhwc.shape
    cout = w_t.shape[1]
    itm_y = jnp.dtype(y_nhwc.dtype).itemsize
    itm_o = jnp.dtype(out_dtype).itemsize

    # Rows per compute chunk (~256 output pixels) / per staging band (~8K f32).
    ch = _largest_divisor_leq(H, max(1, 256 // W))
    chs = _largest_divisor_leq(H, max(1, 8192 // (W * cp)))

    # Images per grid step: amortize per-step overhead, bounded by VMEM.
    # TODO(synk): for ImageNet-scale H*W on v7x (64 MiB VMEM) add an H-band
    # grid axis instead of whole-image blocks.
    per_img = H * W * cp * itm_y + cout * H * W * itm_o
    nb = 1
    for d in range(1, min(n, 8) + 1):
        if n % d == 0 and d * per_img <= (8 << 20):
            nb = d

    pad_bytes = (H + 2) * W * 3 * cp * itm_y
    w_bytes = 3 * cout * 3 * cp * jnp.dtype(w_t.dtype).itemsize
    need = 2 * nb * per_img + pad_bytes + w_bytes + 2 * (2 * cp * 4)

    kernel = functools.partial(_bn_relu_conv3x3_kernel, H=H, W=W, cp=cp,
                               cout=cout, nb=nb, ch=ch, chs=chs)
    return pl.pallas_call(
        kernel,
        out_shape=jax.ShapeDtypeStruct((n, cout, H * W), out_dtype),
        grid_spec=pltpu.PrefetchScalarGridSpec(
            num_scalar_prefetch=0,
            grid=(n // nb,),
            in_specs=[
                pl.BlockSpec((nb, H, W, cp), lambda i: (i, 0, 0, 0)),
                pl.BlockSpec((1, cp), lambda i: (0, 0)),
                pl.BlockSpec((1, cp), lambda i: (0, 0)),
                pl.BlockSpec((3, cout, 3 * cp), lambda i: (0, 0, 0)),
            ],
            out_specs=pl.BlockSpec((nb, cout, H * W), lambda i: (i, 0, 0)),
            scratch_shapes=[pltpu.VMEM((H + 2, W, 3 * cp), y_nhwc.dtype)],
        ),
        compiler_params=pltpu.CompilerParams(
            dimension_semantics=("parallel",),
            vmem_limit_bytes=_vmem_limit(need)),
    )(y_nhwc, scale2, bias2, w_t)


# ----------------------------------------------------------------------------
# Full DenseNetBottleneck forward (NCHW in / NCHW out, like PyTorch).
# mxu_dtype=jnp.bfloat16 is the fast path (f32 accumulate); jnp.float32 gives
# exact f32 semantics for verification.
# ----------------------------------------------------------------------------
def densenet_bottleneck_forward(x_nchw, params, eps=1e-5,
                                mxu_dtype=jnp.bfloat16):
    gamma1, beta1, w1, gamma2, beta2, w2 = params
    n, c, H, W = x_nchw.shape
    cmid = w1.shape[0]                      # interChannels
    cout = w2.shape[0]                      # growthRate
    cmid_p = _round_up(cmid, LANE)          # lane-dense intermediate channels
    # TODO(synk): when cmid_p/cmid >= ~2.5x (small growthRate) benchmark a
    # masked-store y at true cmid (or pixel-packed lanes) against this padded
    # lane-dense layout; y is the dominant HBM tensor between the two kernels.
    m = n * H * W

    # NCHW -> NHWC -> (M, C); BN1 batch stats computed from the same layout so
    # XLA fuses the transpose with the reductions (one pass over x, not two).
    x2d = jnp.transpose(x_nchw, (0, 2, 3, 1)).reshape(m, c)
    mean1 = jnp.mean(x2d, axis=0)
    var1 = jnp.var(x2d, axis=0)
    inv1 = gamma1 / jnp.sqrt(var1 + eps)
    scale1 = inv1.reshape(1, c)
    bias1 = (beta1 - mean1 * inv1).reshape(1, c)

    # 1x1 conv weight (interC, C, 1, 1) -> (C, interC_pad), lane-dense output.
    w1m = jnp.transpose(w1.reshape(cmid, c), (1, 0))
    w1m = jnp.pad(w1m, ((0, 0), (0, cmid_p - cmid))).astype(mxu_dtype)

    y2d, stats, counts = bn_relu_conv1x1(x2d, scale1, bias1, w1m)
    if y2d.shape[0] != m:                   # rare: only when no tile divides M
        y2d = y2d[:m]
    y_nhwc = y2d.reshape(n, H, W, cmid_p)

    # BN2 stats: parallel (Welford-style) combine of per-tile [sum, M2].
    sums = stats[:, 0, :cmid]               # (nt, cmid)
    m2s = stats[:, 1, :cmid]
    mean2 = jnp.sum(sums, axis=0) / m
    mu_t = sums / counts[:, None]
    var2 = (jnp.sum(m2s, axis=0)
            + jnp.sum(counts[:, None] * jnp.square(mu_t - mean2[None, :]),
                      axis=0)) / m
    var2 = jnp.maximum(var2, 0.0)
    inv2 = gamma2 / jnp.sqrt(var2 + eps)
    scale2 = jnp.pad(inv2, (0, cmid_p - cmid)).reshape(1, cmid_p)
    bias2 = jnp.pad(beta2 - mean2 * inv2, (0, cmid_p - cmid)).reshape(1, cmid_p)

    # 3x3 conv weight (growth, interC, 3, 3) -> (kh, cout, kw*interC_pad + ci),
    # channel-major so kernel 2 emits z directly as (N, cout, H*W): no padded
    # channel writeback and no glue-side transpose.
    w2t = jnp.transpose(w2, (2, 0, 3, 1))             # (kh, cout, kw, cmid)
    w2t = jnp.pad(w2t, ((0, 0), (0, 0), (0, 0), (0, cmid_p - cmid)))
    w2t = w2t.reshape(3, cout, 3 * cmid_p).astype(mxu_dtype)

    z = bn_relu_conv3x3(y_nhwc, scale2, bias2, w2t, out_dtype=mxu_dtype)
    z_nchw = z.reshape(n, cout, H, W).astype(x_nchw.dtype)

    # TODO(synk): keeping the whole DenseNet stack in NHWC (and writing x / z
    # straight into a preallocated concat buffer) would remove the remaining
    # per-block transpose + concat passes over x.
    return jnp.concatenate([x_nchw, z_nchw], axis=1)


# ----------------------------------------------------------------------------
# Plain-JAX reference (correctness check for the Pallas path).
# ----------------------------------------------------------------------------
def ref_forward(x, params, eps=1e-5):
    gamma1, beta1, w1, gamma2, beta2, w2 = params

    def bn_train(v, g, b):
        mu = v.mean(axis=(0, 2, 3), keepdims=True)
        sg = v.var(axis=(0, 2, 3), keepdims=True)
        return ((v - mu) / jnp.sqrt(sg + eps)) * g.reshape(1, -1, 1, 1) \
            + b.reshape(1, -1, 1, 1)

    a = jnp.maximum(bn_train(x, gamma1, beta1), 0.0)
    y = lax.conv_general_dilated(a, w1, (1, 1), "VALID",
                                 dimension_numbers=("NCHW", "OIHW", "NCHW"))
    b = jnp.maximum(bn_train(y, gamma2, beta2), 0.0)
    z = lax.conv_general_dilated(b, w2, (1, 1), "SAME",
                                 dimension_numbers=("NCHW", "OIHW", "NCHW"))
    return jnp.concatenate([x, z], axis=1)


if __name__ == "__main__":
    # Small deterministic configuration (matches the nn.Module __init__).
    N, nChannels, Hs, Ws = 2, 4, 16, 16
    growthRate = 8
    interChannels = 4 * growthRate

    key = jax.random.PRNGKey(0)
    k_x, k_w1, k_w2, k_g1, k_b1, k_g2, k_b2 = jax.random.split(key, 7)

    x = jax.random.normal(k_x, (N, nChannels, Hs, Ws), dtype=jnp.float32)
    w1 = jax.random.normal(k_w1, (interChannels, nChannels, 1, 1),
                           jnp.float32) * 0.2
    w2 = jax.random.normal(k_w2, (growthRate, interChannels, 3, 3),
                           jnp.float32) * 0.1
    gamma1 = 1.0 + 0.1 * jax.random.normal(k_g1, (nChannels,), jnp.float32)
    beta1 = 0.1 * jax.random.normal(k_b1, (nChannels,), jnp.float32)
    gamma2 = 1.0 + 0.1 * jax.random.normal(k_g2, (interChannels,), jnp.float32)
    beta2 = 0.1 * jax.random.normal(k_b2, (interChannels,), jnp.float32)
    params = (gamma1, beta1, w1, gamma2, beta2, w2)

    ref = jax.block_until_ready(ref_forward(x, params))

    # Exact-precision path (f32 MXU): must match the XLA reference tightly.
    fwd_f32 = jax.jit(
        lambda xx, pp: densenet_bottleneck_forward(xx, pp,
                                                   mxu_dtype=jnp.float32))
    out_f32 = jax.block_until_ready(fwd_f32(x, params))
    assert out_f32.shape == (N, nChannels + growthRate, Hs, Ws), out_f32.shape
    np.testing.assert_allclose(np.asarray(out_f32), np.asarray(ref),
                               rtol=1e-4, atol=2e-4)

    # Fast path (bf16 MXU inputs / bf16 intermediate & z, f32 accumulation).
    fwd_bf16 = jax.jit(
        lambda xx, pp: densenet_bottleneck_forward(xx, pp,
                                                   mxu_dtype=jnp.bfloat16))
    out_bf16 = jax.block_until_ready(fwd_bf16(x, params))
    np.testing.assert_allclose(np.asarray(out_bf16), np.asarray(ref),
                               rtol=1e-1, atol=1e-1)

    print("KERNEL_OK")
</pallas_src>

<mosaic_0001>
module attributes {stable_mosaic.version = 11 : i64} {
  func.func @_bn_relu_conv1x1_kernel(%arg0: i32, %arg1: memref<512x4xf32, #tpu.memory_space<vmem>>, %arg2: memref<1x4xf32, #tpu.memory_space<vmem>>, %arg3: memref<1x4xf32, #tpu.memory_space<vmem>>, %arg4: memref<4x128xf32, #tpu.memory_space<vmem>>, %arg5: memref<512x128xf32, #tpu.memory_space<vmem>>, %arg6: memref<1x2x128xf32, #tpu.memory_space<vmem>>) attributes {dimension_semantics = [#tpu.dimension_semantics<parallel>], iteration_bounds = array<i64: 1>, scalar_prefetch = 0 : i64, scratch_operands = 0 : i64, tpu.core_type = #tpu.core_type<tc>, window_params = [{transform_indices = @transform_0, window_bounds = array<i64: 512, 4>}, {pipeline_mode = #tpu.pipeline_mode<synchronous>, transform_indices = @transform_1, window_bounds = array<i64: 1, 4>}, {pipeline_mode = #tpu.pipeline_mode<synchronous>, transform_indices = @transform_2, window_bounds = array<i64: 1, 4>}, {pipeline_mode = #tpu.pipeline_mode<synchronous>, transform_indices = @transform_3, window_bounds = array<i64: 4, 128>}, {transform_indices = @transform_4, window_bounds = array<i64: 512, 128>}, {transform_indices = @transform_5, window_bounds = array<i64: 1, 2, 128>}]} {
    %c0 = arith.constant 0 : index
    %c0_0 = arith.constant 0 : index
    %0 = vector.load %arg1[%c0, %c0_0] : memref<512x4xf32, #tpu.memory_space<vmem>>, vector<512x4xf32>
    %c0_1 = arith.constant 0 : index
    %c0_2 = arith.constant 0 : index
    %1 = vector.load %arg2[%c0_1, %c0_2] : memref<1x4xf32, #tpu.memory_space<vmem>>, vector<1x4xf32>
    %2 = vector.broadcast %1 : vector<1x4xf32> to vector<512x4xf32>
    %3 = arith.mulf %0, %2 : vector<512x4xf32>
    %c0_3 = arith.constant 0 : index
    %c0_4 = arith.constant 0 : index
    %4 = vector.load %arg3[%c0_3, %c0_4] : memref<1x4xf32, #tpu.memory_space<vmem>>, vector<1x4xf32>
    %5 = vector.broadcast %4 : vector<1x4xf32> to vector<512x4xf32>
    %6 = arith.addf %3, %5 : vector<512x4xf32>
    %cst = arith.constant 0.000000e+00 : f32
    %7 = vector.broadcast %cst : f32 to vector<512x4xf32>
    %8 = arith.maximumf %6, %7 : vector<512x4xf32>
    %c0_5 = arith.constant 0 : index
    %c0_6 = arith.constant 0 : index
    %9 = vector.load %arg4[%c0_5, %c0_6] : memref<4x128xf32, #tpu.memory_space<vmem>>, vector<4x128xf32>
    %cst_7 = arith.constant dense<0.000000e+00> : vector<512x128xf32>
    %10 = tpu.matmul %8, %9, %cst_7 {dimension_numbers = #tpu.dot_dimension_numbers<[1], [0], [0], [1], [0, 0, 1, 1], [], []>} : vector<512x4xf32>, vector<4x128xf32>, vector<512x128xf32> -> vector<512x128xf32>
    %c0_8 = arith.constant 0 : index
    %c0_9 = arith.constant 0 : index
    %11 = vector.load %arg5[%c0_8, %c0_9] : memref<512x128xf32, #tpu.memory_space<vmem>>, vector<512x128xf32>
    tpu.vector_store %arg5[%c0_8, %c0_9], %10 {strides = array<i32>} : memref<512x128xf32, #tpu.memory_space<vmem>>, vector<512x128xf32>,
    %cst_10 = arith.constant dense<0.000000e+00> : vector<128xf32>
    %12 = vector.multi_reduction <add>, %10, %cst_10 [0] : vector<512x128xf32> to vector<128xf32>
    %13 = vector.shape_cast %12 : vector<128xf32> to vector<1x128xf32>
    %cst_11 = arith.constant 0.001953125 : f32
    %14 = vector.broadcast %cst_11 : f32 to vector<1x128xf32>
    %15 = arith.mulf %13, %14 : vector<1x128xf32>
    %16 = vector.broadcast %15 : vector<1x128xf32> to vector<512x128xf32>
    %17 = arith.subf %10, %16 : vector<512x128xf32>
    %c0_12 = arith.constant 0 : index
    %c0_13 = arith.constant 0 : index
    %c0_14 = arith.constant 0 : index
    %18 = vector.load %arg6[%c0_12, %c0_13, %c0_14] : memref<1x2x128xf32, #tpu.memory_space<vmem>>, vector<1x1x128xf32>
    %19 = vector.shape_cast %18 : vector<1x1x128xf32> to vector<1x128xf32>
    %20 = vector.shape_cast %13 : vector<1x128xf32> to vector<1x1x128xf32>
    tpu.vector_store %arg6[%c0_12, %c0_13, %c0_14], %20 {strides = array<i32>} : memref<1x2x128xf32, #tpu.memory_space<vmem>>, vector<1x1x128xf32>,
    %21 = arith.mulf %17, %17 : vector<512x128xf32>
    %cst_15 = arith.constant dense<0.000000e+00> : vector<128xf32>
    %22 = vector.multi_reduction <add>, %21, %cst_15 [0] : vector<512x128xf32> to vector<128xf32>
    %23 = vector.shape_cast %22 : vector<128xf32> to vector<1x128xf32>
    %c0_16 = arith.constant 0 : index
    %c1 = arith.constant 1 : index
    %c0_17 = arith.constant 0 : index
    %24 = vector.load %arg6[%c0_16, %c1, %c0_17] : memref<1x2x128xf32, #tpu.memory_space<vmem>>, vector<1x1x128xf32>
    %25 = vector.shape_cast %24 : vector<1x1x128xf32> to vector<1x128xf32>
    %26 = vector.shape_cast %23 : vector<1x128xf32> to vector<1x1x128xf32>
    tpu.vector_store %arg6[%c0_16, %c1, %c0_17], %26 {strides = array<i32>} : memref<1x2x128xf32, #tpu.memory_space<vmem>>, vector<1x1x128xf32>,
    return
  }
  func.func @transform_0(%arg0: i32) -> (i32, i32) {
    %c0_i32 = arith.constant 0 : i32
    %c0_i32_0 = arith.constant 0 : i32
    return %arg0, %c0_i32 : i32, i32
  }
  func.func @transform_1(%arg0: i32) -> (i32, i32) {
    %c0_i32 = arith.constant 0 : i32
    %c0_i32_0 = arith.constant 0 : i32
    %c0_i32_1 = arith.constant 0 : i32
    return %c0_i32, %c0_i32_0 : i32, i32
  }
  func.func @transform_2(%arg0: i32) -> (i32, i32) {
    %c0_i32 = arith.constant 0 : i32
    %c0_i32_0 = arith.constant 0 : i32
    %c0_i32_1 = arith.constant 0 : i32
    return %c0_i32, %c0_i32_0 : i32, i32
  }
  func.func @transform_3(%arg0: i32) -> (i32, i32) {
    %c0_i32 = arith.constant 0 : i32
    %c0_i32_0 = arith.constant 0 : i32
    %c0_i32_1 = arith.constant 0 : i32
    return %c0_i32, %c0_i32_0 : i32, i32
  }
  func.func @transform_4(%arg0: i32) -> (i32, i32) {
    %c0_i32 = arith.constant 0 : i32
    %c0_i32_0 = arith.constant 0 : i32
    return %arg0, %c0_i32 : i32, i32
  }
  func.func @transform_5(%arg0: i32) -> (i32, i32, i32) {
    %c0_i32 = arith.constant 0 : i32
    %c0_i32_0 = arith.constant 0 : i32
    %c0_i32_1 = arith.constant 0 : i32
    return %arg0, %c0_i32, %c0_i32_0 : i32, i32, i32
  }
}

module attributes {stable_mosaic.version = 11 : i64} {
  func.func @_bn_relu_conv3x3_kernel(%arg0: i32, %arg1: memref<2x16x16x128xf32, #tpu.memory_space<vmem>>, %arg2: memref<1x128xf32, #tpu.memory_space<vmem>>, %arg3: memref<1x128xf32, #tpu.memory_space<vmem>>, %arg4: memref<3x8x384xf32, #tpu.memory_space<vmem>>, %arg5: memref<2x8x256xf32, #tpu.memory_space<vmem>>, %arg6: memref<18x16x384xf32, #tpu.memory_space<vmem>>) attributes {dimension_semantics = [#tpu.dimension_semantics<parallel>], iteration_bounds = array<i64: 1>, scalar_prefetch = 0 : i64, scratch_operands = 1 : i64, tpu.core_type = #tpu.core_type<tc>, window_params = [{transform_indices = @transform_0, window_bounds = array<i64: 2, 16, 16, 128>}, {pipeline_mode = #tpu.pipeline_mode<synchronous>, transform_indices = @transform_1, window_bounds = array<i64: 1, 128>}, {pipeline_mode = #tpu.pipeline_mode<synchronous>, transform_indices = @transform_2, window_bounds = array<i64: 1, 128>}, {pipeline_mode = #tpu.pipeline_mode<synchronous>, transform_indices = @transform_3, window_bounds = array<i64: 3, 8, 384>}, {transform_indices = @transform_4, window_bounds = array<i64: 2, 8, 256>}]} {
    %c0 = arith.constant 0 : index
    %c0_0 = arith.constant 0 : index
    %0 = vector.load %arg2[%c0, %c0_0] : memref<1x128xf32, #tpu.memory_space<vmem>>, vector<1x128xf32>
    %1 = vector.shape_cast %0 : vector<1x128xf32> to vector<1x1x128xf32>
    %c0_1 = arith.constant 0 : index
    %c0_2 = arith.constant 0 : index
    %2 = vector.load %arg3[%c0_1, %c0_2] : memref<1x128xf32, #tpu.memory_space<vmem>>, vector<1x128xf32>
    %3 = vector.shape_cast %2 : vector<1x128xf32> to vector<1x1x128xf32>
    %4 = tpu.iota {dimensions = array<i32: 0>} : vector<16x128xi32>
    %c1_i32 = arith.constant 1 : i32
    %5 = vector.broadcast %c1_i32 : i32 to vector<16x128xi32>
    %6 = arith.cmpi sge, %4, %5 : vector<16x128xi32>
    %c14_i32 = arith.constant 14 : i32
    %7 = vector.broadcast %c14_i32 : i32 to vector<16x128xi32>
    %8 = arith.cmpi sle, %4, %7 : vector<16x128xi32>
    %c0_3 = arith.constant 0 : index
    %c0_4 = arith.constant 0 : index
    %c0_5 = arith.constant 0 : index
    %9 = vector.load %arg4[%c0_3, %c0_4, %c0_5] : memref<3x8x384xf32, #tpu.memory_space<vmem>>, vector<1x8x384xf32>
    %10 = vector.shape_cast %9 : vector<1x8x384xf32> to vector<8x384xf32>
    %c1 = arith.constant 1 : index
    %c0_6 = arith.constant 0 : index
    %c0_7 = arith.constant 0 : index
    %11 = vector.load %arg4[%c1, %c0_6, %c0_7] : memref<3x8x384xf32, #tpu.memory_space<vmem>>, vector<1x8x384xf32>
    %12 = vector.shape_cast %11 : vector<1x8x384xf32> to vector<8x384xf32>
    %c2 = arith.constant 2 : index
    %c0_8 = arith.constant 0 : index
    %c0_9 = arith.constant 0 : index
    %13 = vector.load %arg4[%c2, %c0_8, %c0_9] : memref<3x8x384xf32, #tpu.memory_space<vmem>>, vector<1x8x384xf32>
    %14 = vector.shape_cast %13 : vector<1x8x384xf32> to vector<8x384xf32>
    %cst = arith.constant 0.000000e+00 : f32
    %15 = vector.broadcast %cst : f32 to vector<1x16x384xf32>
    %c0_10 = arith.constant 0 : index
    %c0_11 = arith.constant 0 : index
    %c0_12 = arith.constant 0 : index
    %16 = vector.load %arg6[%c0_10, %c0_11, %c0_12] : memref<18x16x384xf32, #tpu.memory_space<vmem>>, vector<1x16x384xf32>
    tpu.vector_store %arg6[%c0_10, %c0_11, %c0_12], %15 {strides = array<i32>} : memref<18x16x384xf32, #tpu.memory_space<vmem>>, vector<1x16x384xf32>,
    %c17 = arith.constant 17 : index
    %c0_13 = arith.constant 0 : index
    %c0_14 = arith.constant 0 : index
    %17 = vector.load %arg6[%c17, %c0_13, %c0_14] : memref<18x16x384xf32, #tpu.memory_space<vmem>>, vector<1x16x384xf32>
    tpu.vector_store %arg6[%c17, %c0_13, %c0_14], %15 {strides = array<i32>} : memref<18x16x384xf32, #tpu.memory_space<vmem>>, vector<1x16x384xf32>,
    %c0_i32 = arith.constant 0 : i32
    %c4_i32 = arith.constant 4 : i32
    %18 = arith.muli %c0_i32, %c4_i32 : i32
    %c0_15 = arith.constant 0 : index
    %19 = arith.index_cast %18 : i32 to index
    %c0_16 = arith.constant 0 : index
    %c0_17 = arith.constant 0 : index
    %20 = vector.load %arg1[%c0_15, %19, %c0_16, %c0_17] : memref<2x16x16x128xf32, #tpu.memory_space<vmem>>, vector<1x4x16x128xf32>
    %21 = vector.shape_cast %20 : vector<1x4x16x128xf32> to vector<4x16x128xf32>
    %22 = vector.broadcast %1 : vector<1x1x128xf32> to vector<4x16x128xf32>
    %23 = arith.mulf %21, %22 : vector<4x16x128xf32>
    %24 = vector.broadcast %3 : vector<1x1x128xf32> to vector<4x16x128xf32>
    %25 = arith.addf %23, %24 : vector<4x16x128xf32>
    %cst_18 = arith.constant 0.000000e+00 : f32
    %26 = vector.broadcast %cst_18 : f32 to vector<4x16x128xf32>
    %27 = arith.maximumf %25, %26 : vector<4x16x128xf32>
    %c1_i32_19 = arith.constant 1 : i32
    %28 = tpu.dynamic_rotate %27 by %c1_i32_19 dim 1 : vector<4x16x128xf32>, i32 -> vector<4x16x128xf32>
    %cst_20 = arith.constant 0.000000e+00 : f32
    %29 = vector.shape_cast %6 : vector<16x128xi1> to vector<1x16x128xi1>
    %30 = vector.broadcast %29 : vector<1x16x128xi1> to vector<4x16x128xi1>
    %31 = vector.broadcast %cst_20 : f32 to vector<4x16x128xf32>
    %32 = arith.select %30, %28, %31 : vector<4x16x128xi1>, vector<4x16x128xf32>
    %c15_i32 = arith.constant 15 : i32
    %33 = tpu.dynamic_rotate %27 by %c15_i32 dim 1 : vector<4x16x128xf32>, i32 -> vector<4x16x128xf32>
    %cst_21 = arith.constant 0.000000e+00 : f32
    %34 = vector.shape_cast %8 : vector<16x128xi1> to vector<1x16x128xi1>
    %35 = vector.broadcast %34 : vector<1x16x128xi1> to vector<4x16x128xi1>
    %36 = vector.broadcast %cst_21 : f32 to vector<4x16x128xf32>
    %37 = arith.select %35, %33, %36 : vector<4x16x128xi1>, vector<4x16x128xf32>
    %c1_i32_22 = arith.constant 1 : i32
    %38 = arith.addi %18, %c1_i32_22 : i32
    %39 = arith.index_cast %38 : i32 to index
    %c0_23 = arith.constant 0 : index
    %c128 = arith.constant 128 : index
    %40 = vector.load %arg6[%39, %c0_23, %c128] : memref<18x16x384xf32, #tpu.memory_space<vmem>>, vector<4x16x128xf32>
    tpu.vector_store %arg6[%39, %c0_23, %c128], %27 {strides = array<i32>} : memref<18x16x384xf32, #tpu.memory_space<vmem>>, vector<4x16x128xf32>,
    %c1_i32_24 = arith.constant 1 : i32
    %41 = arith.addi %18, %c1_i32_24 : i32
    %42 = arith.index_cast %41 : i32 to index
    %c0_25 = arith.constant 0 : index
    %c0_26 = arith.constant 0 : index
    %43 = vector.load %arg6[%42, %c0_25, %c0_26] : memref<18x16x384xf32, #tpu.memory_space<vmem>>, vector<4x16x128xf32>
    tpu.vector_store %arg6[%42, %c0_25, %c0_26], %32 {strides = array<i32>} : memref<18x16x384xf32, #tpu.memory_space<vmem>>, vector<4x16x128xf32>,
    %c1_i32_27 = arith.constant 1 : i32
    %44 = arith.addi %18, %c1_i32_27 : i32
    %45 = arith.index_cast %44 : i32 to index
    %c0_28 = arith.constant 0 : index
    %c256 = arith.constant 256 : index
    %46 = vector.load %arg6[%45, %c0_28, %c256] : memref<18x16x384xf32, #tpu.memory_space<vmem>>, vector<4x16x128xf32>
    tpu.vector_store %arg6[%45, %c0_28, %c256], %37 {strides = array<i32>} : memref<18x16x384xf32, #tpu.memory_space<vmem>>, vector<4x16x128xf32>,
    %c1_i32_29 = arith.constant 1 : i32
    %c4_i32_30 = arith.constant 4 : i32
    %47 = arith.muli %c1_i32_29, %c4_i32_30 : i32
    %c0_31 = arith.constant 0 : index
    %48 = arith.index_cast %47 : i32 to index
    %c0_32 = arith.constant 0 : index
    %c0_33 = arith.constant 0 : index
    %49 = vector.load %arg1[%c0_31, %48, %c0_32, %c0_33] : memref<2x16x16x128xf32, #tpu.memory_space<vmem>>, vector<1x4x16x128xf32>
    %50 = vector.shape_cast %49 : vector<1x4x16x128xf32> to vector<4x16x128xf32>
    %51 = vector.broadcast %1 : vector<1x1x128xf32> to vector<4x16x128xf32>
    %52 = arith.mulf %50, %51 : vector<4x16x128xf32>
    %53 = vector.broadcast %3 : vector<1x1x128xf32> to vector<4x16x128xf32>
    %54 = arith.addf %52, %53 : vector<4x16x128xf32>
    %cst_34 = arith.constant 0.000000e+00 : f32
    %55 = vector.broadcast %cst_34 : f32 to vector<4x16x128xf32>
    %56 = arith.maximumf %54, %55 : vector<4x16x128xf32>
    %c1_i32_35 = arith.constant 1 : i32
    %57 = tpu.dynamic_rotate %56 by %c1_i32_35 dim 1 : vector<4x16x128xf32>, i32 -> vector<4x16x128xf32>
    %cst_36 = arith.constant 0.000000e+00 : f32
    %58 = vector.shape_cast %6 : vector<16x128xi1> to vector<1x16x128xi1>
    %59 = vector.broadcast %58 : vector<1x16x128xi1> to vector<4x16x128xi1>
    %60 = vector.broadcast %cst_36 : f32 to vector<4x16x128xf32>
    %61 = arith.select %59, %57, %60 : vector<4x16x128xi1>, vector<4x16x128xf32>
    %c15_i32_37 = arith.constant 15 : i32
    %62 = tpu.dynamic_rotate %56 by %c15_i32_37 dim 1 : vector<4x16x128xf32>, i32 -> vector<4x16x128xf32>
    %cst_38 = arith.constant 0.000000e+00 : f32
    %63 = vector.shape_cast %8 : vector<16x128xi1> to vector<1x16x128xi1>
    %64 = vector.broadcast %63 : vector<1x16x128xi1> to vector<4x16x128xi1>
    %65 = vector.broadcast %cst_38 : f32 to vector<4x16x128xf32>
    %66 = arith.select %64, %62, %65 : vector<4x16x128xi1>, vector<4x16x128xf32>
    %c1_i32_39 = arith.constant 1 : i32
    %67 = arith.addi %47, %c1_i32_39 : i32
    %68 = arith.index_cast %67 : i32 to index
    %c0_40 = arith.constant 0 : index
    %c128_41 = arith.constant 128 : index
    %69 = vector.load %arg6[%68, %c0_40, %c128_41] : memref<18x16x384xf32, #tpu.memory_space<vmem>>, vector<4x16x128xf32>
    tpu.vector_store %arg6[%68, %c0_40, %c128_41], %56 {strides = array<i32>} : memref<18x16x384xf32, #tpu.memory_space<vmem>>, vector<4x16x128xf32>,
    %c1_i32_42 = arith.constant 1 : i32
    %70 = arith.addi %47, %c1_i32_42 : i32
    %71 = arith.index_cast %70 : i32 to index
    %c0_43 = arith.constant 0 : index
    %c0_44 = arith.constant 0 : index
    %72 = vector.load %arg6[%71, %c0_43, %c0_44] : memref<18x16x384xf32, #tpu.memory_space<vmem>>, vector<4x16x128xf32>
    tpu.vector_store %arg6[%71, %c0_43, %c0_44], %61 {strides = array<i32>} : memref<18x16x384xf32, #tpu.memory_space<vmem>>, vector<4x16x128xf32>,
    %c1_i32_45 = arith.constant 1 : i32
    %73 = arith.addi %47, %c1_i32_45 : i32
    %74 = arith.index_cast %73 : i32 to index
    %c0_46 = arith.constant 0 : index
    %c256_47 = arith.constant 256 : index
    %75 = vector.load %arg6[%74, %c0_46, %c256_47] : memref<18x16x384xf32, #tpu.memory_space<vmem>>, vector<4x16x128xf32>
    tpu.vector_store %arg6[%74, %c0_46, %c256_47], %66 {strides = array<i32>} : memref<18x16x384xf32, #tpu.memory_space<vmem>>, vector<4x16x128xf32>,
    %c2_i32 = arith.constant 2 : i32
    %c4_i32_48 = arith.constant 4 : i32
    %76 = arith.muli %c2_i32, %c4_i32_48 : i32
    %c0_49 = arith.constant 0 : index
    %77 = arith.index_cast %76 : i32 to index
    %c0_50 = arith.constant 0 : index
    %c0_51 = arith.constant 0 : index
    %78 = vector.load %arg1[%c0_49, %77, %c0_50, %c0_51] : memref<2x16x16x128xf32, #tpu.memory_space<vmem>>, vector<1x4x16x128xf32>
    %79 = vector.shape_cast %78 : vector<1x4x16x128xf32> to vector<4x16x128xf32>
    %80 = vector.broadcast %1 : vector<1x1x128xf32> to vector<4x16x128xf32>
    %81 = arith.mulf %79, %80 : vector<4x16x128xf32>
    %82 = vector.broadcast %3 : vector<1x1x128xf32> to vector<4x16x128xf32>
    %83 = arith.addf %81, %82 : vector<4x16x128xf32>
    %cst_52 = arith.constant 0.000000e+00 : f32
    %84 = vector.broadcast %cst_52 : f32 to vector<4x16x128xf32>
    %85 = arith.maximumf %83, %84 : vector<4x16x128xf32>
    %c1_i32_53 = arith.constant 1 : i32
    %86 = tpu.dynamic_rotate %85 by %c1_i32_53 dim 1 : vector<4x16x128xf32>, i32 -> vector<4x16x128xf32>
    %cst_54 = arith.constant 0.000000e+00 : f32
    %87 = vector.shape_cast %6 : vector<16x128xi1> to vector<1x16x128xi1>
    %88 = vector.broadcast %87 : vector<1x16x128xi1> to vector<4x16x128xi1>
    %89 = vector.broadcast %cst_54 : f32 to vector<4x16x128xf32>
    %90 = arith.select %88, %86, %89 : vector<4x16x128xi1>, vector<4x16x128xf32>
    %c15_i32_55 = arith.constant 15 : i32
    %91 = tpu.dynamic_rotate %85 by %c15_i32_55 dim 1 : vector<4x16x128xf32>, i32 -> vector<4x16x128xf32>
    %cst_56 = arith.constant 0.000000e+00 : f32
    %92 = vector.shape_cast %8 : vector<16x128xi1> to vector<1x16x128xi1>
    %93 = vector.broadcast %92 : vector<1x16x128xi1> to vector<4x16x128xi1>
    %94 = vector.broadcast %cst_56 : f32 to vector<4x16x128xf32>
    %95 = arith.select %93, %91, %94 : vector<4x16x128xi1>, vector<4x16x128xf32>
    %c1_i32_57 = arith.constant 1 : i32
    %96 = arith.addi %76, %c1_i32_57 : i32
    %97 = arith.index_cast %96 : i32 to index
    %c0_58 = arith.constant 0 : index
    %c128_59 = arith.constant 128 : index
    %98 = vector.load %arg6[%97, %c0_58, %c128_59] : memref<18x16x384xf32, #tpu.memory_space<vmem>>, vector<4x16x128xf32>
    tpu.vector_store %arg6[%97, %c0_58, %c128_59], %85 {strides = array<i32>} : memref<18x16x384xf32, #tpu.memory_space<vmem>>, vector<4x16x128xf32>,
    %c1_i32_60 = arith.constant 1 : i32
    %99 = arith.addi %76, %c1_i32_60 : i32
    %100 = arith.index_cast %99 : i32 to index
    %c0_61 = arith.constant 0 : index
    %c0_62 = arith.constant 0 : index
    %101 = vector.load %arg6[%100, %c0_61, %c0_62] : memref<18x16x384xf32, #tpu.memory_space<vmem>>, vector<4x16x128xf32>
    tpu.vector_store %arg6[%100, %c0_61, %c0_62], %90 {strides = array<i32>} : memref<18x16x384xf32, #tpu.memory_space<vmem>>, vector<4x16x128xf32>,
    %c1_i32_63 = arith.constant 1 : i32
    %102 = arith.addi %76, %c1_i32_63 : i32
    %103 = arith.index_cast %102 : i32 to index
    %c0_64 = arith.constant 0 : index
    %c256_65 = arith.constant 256 : index
    %104 = vector.load %arg6[%103, %c0_64, %c256_65] : memref<18x16x384xf32, #tpu.memory_space<vmem>>, vector<4x16x128xf32>
    tpu.vector_store %arg6[%103, %c0_64, %c256_65], %95 {strides = array<i32>} : memref<18x16x384xf32, #tpu.memory_space<vmem>>, vector<4x16x128xf32>,
    %c3_i32 = arith.constant 3 : i32
    %c4_i32_66 = arith.constant 4 : i32
    %105 = arith.muli %c3_i32, %c4_i32_66 : i32
    %c0_67 = arith.constant 0 : index
    %106 = arith.index_cast %105 : i32 to index
    %c0_68 = arith.constant 0 : index
    %c0_69 = arith.constant 0 : index
    %107 = vector.load %arg1[%c0_67, %106, %c0_68, %c0_69] : memref<2x16x16x128xf32, #tpu.memory_space<vmem>>, vector<1x4x16x128xf32>
    %108 = vector.shape_cast %107 : vector<1x4x16x128xf32> to vector<4x16x128xf32>
    %109 = vector.broadcast %1 : vector<1x1x128xf32> to vector<4x16x128xf32>
    %110 = arith.mulf %108, %109 : vector<4x16x128xf32>
    %111 = vector.broadcast %3 : vector<1x1x128xf32> to vector<4x16x128xf32>
    %112 = arith.addf %110, %111 : vector<4x16x128xf32>
    %cst_70 = arith.constant 0.000000e+00 : f32
    %113 = vector.broadcast %cst_70 : f32 to vector<4x16x128xf32>
    %114 = arith.maximumf %112, %113 : vector<4x16x128xf32>
    %c1_i32_71 = arith.constant 1 : i32
    %115 = tpu.dynamic_rotate %114 by %c1_i32_71 dim 1 : vector<4x16x128xf32>, i32 -> vector<4x16x128xf32>
    %cst_72 = arith.constant 0.000000e+00 : f32
    %116 = vector.shape_cast %6 : vector<16x128xi1> to vector<1x16x128xi1>
    %117 = vector.broadcast %116 : vector<1x16x128xi1> to vector<4x16x128xi1>
    %118 = vector.broadcast %cst_72 : f32 to vector<4x16x128xf32>
    %119 = arith.select %117, %115, %118 : vector<4x16x128xi1>, vector<4x16x128xf32>
    %c15_i32_73 = arith.constant 15 : i32
    %120 = tpu.dynamic_rotate %114 by %c15_i32_73 dim 1 : vector<4x16x128xf32>, i32 -> vector<4x16x128xf32>
    %cst_74 = arith.constant 0.000000e+00 : f32
    %121 = vector.shape_cast %8 : vector<16x128xi1> to vector<1x16x128xi1>
    %122 = vector.broadcast %121 : vector<1x16x128xi1> to vector<4x16x128xi1>
    %123 = vector.broadcast %cst_74 : f32 to vector<4x16x128xf32>
    %124 = arith.select %122, %120, %123 : vector<4x16x128xi1>, vector<4x16x128xf32>
    %c1_i32_75 = arith.constant 1 : i32
    %125 = arith.addi %105, %c1_i32_75 : i32
    %126 = arith.index_cast %125 : i32 to index
    %c0_76 = arith.constant 0 : index
    %c128_77 = arith.constant 128 : index
    %127 = vector.load %arg6[%126, %c0_76, %c128_77] : memref<18x16x384xf32, #tpu.memory_space<vmem>>, vector<4x16x128xf32>
    tpu.vector_store %arg6[%126, %c0_76, %c128_77], %114 {strides = array<i32>} : memref<18x16x384xf32, #tpu.memory_space<vmem>>, vector<4x16x128xf32>,
    %c1_i32_78 = arith.constant 1 : i32
    %128 = arith.addi %105, %c1_i32_78 : i32
    %129 = arith.index_cast %128 : i32 to index
    %c0_79 = arith.constant 0 : index
    %c0_80 = arith.constant 0 : index
    %130 = vector.load %arg6[%129, %c0_79, %c0_80] : memref<18x16x384xf32, #tpu.memory_space<vmem>>, vector<4x16x128xf32>
    tpu.vector_store %arg6[%129, %c0_79, %c0_80], %119 {strides = array<i32>} : memref<18x16x384xf32, #tpu.memory_space<vmem>>, vector<4x16x128xf32>,
    %c1_i32_81 = arith.constant 1 : i32
    %131 = arith.addi %105, %c1_i32_81 : i32
    %132 = arith.index_cast %131 : i32 to index
    %c0_82 = arith.constant 0 : index
    %c256_83 = arith.constant 256 : index
    %133 = vector.load %arg6[%132, %c0_82, %c256_83] : memref<18x16x384xf32, #tpu.memory_space<vmem>>, vector<4x16x128xf32>
    tpu.vector_store %arg6[%132, %c0_82, %c256_83], %124 {strides = array<i32>} : memref<18x16x384xf32, #tpu.memory_space<vmem>>, vector<4x16x128xf32>,
    %c4_i32_84 = arith.constant 4 : i32
    %cst_85 = arith.constant 0.000000e+00 : f32
    %134 = vector.broadcast %cst_85 : f32 to vector<8x256xf32>
    %c0_86 = arith.constant 0 : index
    %c0_87 = arith.constant 0 : index
    %c0_88 = arith.constant 0 : index
    %135 = vector.load %arg6[%c0_86, %c0_87, %c0_88] : memref<18x16x384xf32, #tpu.memory_space<vmem>>, vector<16x16x384xf32>
    %136 = vector.shape_cast %135 : vector<16x16x384xf32> to vector<256x384xf32>
    %cst_89 = arith.constant dense<0.000000e+00> : vector<8x256xf32>
    %137 = tpu.matmul %10, %136, %cst_89 {dimension_numbers = #tpu.dot_dimension_numbers<[1], [1], [0], [0], [0, 0, 1, 0], [], []>} : vector<8x384xf32>, vector<256x384xf32>, vector<8x256xf32> -> vector<8x256xf32>
    %138 = arith.addf %134, %137 : vector<8x256xf32>
    %c1_90 = arith.constant 1 : index
    %c0_91 = arith.constant 0 : index
    %c0_92 = arith.constant 0 : index
    %139 = vector.load %arg6[%c1_90, %c0_91, %c0_92] : memref<18x16x384xf32, #tpu.memory_space<vmem>>, vector<16x16x384xf32>
    %140 = vector.shape_cast %139 : vector<16x16x384xf32> to vector<256x384xf32>
    %cst_93 = arith.constant dense<0.000000e+00> : vector<8x256xf32>
    %141 = tpu.matmul %12, %140, %cst_93 {dimension_numbers = #tpu.dot_dimension_numbers<[1], [1], [0], [0], [0, 0, 1, 0], [], []>} : vector<8x384xf32>, vector<256x384xf32>, vector<8x256xf32> -> vector<8x256xf32>
    %142 = arith.addf %138, %141 : vector<8x256xf32>
    %c2_94 = arith.constant 2 : index
    %c0_95 = arith.constant 0 : index
    %c0_96 = arith.constant 0 : index
    %143 = vector.load %arg6[%c2_94, %c0_95, %c0_96] : memref<18x16x384xf32, #tpu.memory_space<vmem>>, vector<16x16x384xf32>
    %144 = vector.shape_cast %143 : vector<16x16x384xf32> to vector<256x384xf32>
    %cst_97 = arith.constant dense<0.000000e+00> : vector<8x256xf32>
    %145 = tpu.matmul %14, %144, %cst_97 {dimension_numbers = #tpu.dot_dimension_numbers<[1], [1], [0], [0], [0, 0, 1, 0], [], []>} : vector<8x384xf32>, vector<256x384xf32>, vector<8x256xf32> -> vector<8x256xf32>
    %146 = arith.addf %142, %145 : vector<8x256xf32>
    %147 = vector.shape_cast %146 : vector<8x256xf32> to vector<1x8x256xf32>
    %c0_98 = arith.constant 0 : index
    %c0_99 = arith.constant 0 : index
    %c0_100 = arith.constant 0 : index
    %148 = vector.load %arg5[%c0_98, %c0_99, %c0_100] : memref<2x8x256xf32, #tpu.memory_space<vmem>>, vector<1x8x256xf32>
    tpu.vector_store %arg5[%c0_98, %c0_99, %c0_100], %147 {strides = array<i32>} : memref<2x8x256xf32, #tpu.memory_space<vmem>>, vector<1x8x256xf32>,
    %c0_i32_101 = arith.constant 0 : i32
    %c4_i32_102 = arith.constant 4 : i32
    %149 = arith.muli %c0_i32_101, %c4_i32_102 : i32
    %c1_103 = arith.constant 1 : index
    %150 = arith.index_cast %149 : i32 to index
    %c0_104 = arith.constant 0 : index
    %c0_105 = arith.constant 0 : index
    %151 = vector.load %arg1[%c1_103, %150, %c0_104, %c0_105] : memref<2x16x16x128xf32, #tpu.memory_space<vmem>>, vector<1x4x16x128xf32>
    %152 = vector.shape_cast %151 : vector<1x4x16x128xf32> to vector<4x16x128xf32>
    %153 = vector.broadcast %1 : vector<1x1x128xf32> to vector<4x16x128xf32>
    %154 = arith.mulf %152, %153 : vector<4x16x128xf32>
    %155 = vector.broadcast %3 : vector<1x1x128xf32> to vector<4x16x128xf32>
    %156 = arith.addf %154, %155 : vector<4x16x128xf32>
    %cst_106 = arith.constant 0.000000e+00 : f32
    %157 = vector.broadcast %cst_106 : f32 to vector<4x16x128xf32>
    %158 = arith.maximumf %156, %157 : vector<4x16x128xf32>
    %c1_i32_107 = arith.constant 1 : i32
    %159 = tpu.dynamic_rotate %158 by %c1_i32_107 dim 1 : vector<4x16x128xf32>, i32 -> vector<4x16x128xf32>
    %cst_108 = arith.constant 0.000000e+00 : f32
    %160 = vector.shape_cast %6 : vector<16x128xi1> to vector<1x16x128xi1>
    %161 = vector.broadcast %160 : vector<1x16x128xi1> to vector<4x16x128xi1>
    %162 = vector.broadcast %cst_108 : f32 to vector<4x16x128xf32>
    %163 = arith.select %161, %159, %162 : vector<4x16x128xi1>, vector<4x16x128xf32>
    %c15_i32_109 = arith.constant 15 : i32
    %164 = tpu.dynamic_rotate %158 by %c15_i32_109 dim 1 : vector<4x16x128xf32>, i32 -> vector<4x16x128xf32>
    %cst_110 = arith.constant 0.000000e+00 : f32
    %165 = vector.shape_cast %8 : vector<16x128xi1> to vector<1x16x128xi1>
    %166 = vector.broadcast %165 : vector<1x16x128xi1> to vector<4x16x128xi1>
    %167 = vector.broadcast %cst_110 : f32 to vector<4x16x128xf32>
    %168 = arith.select %166, %164, %167 : vector<4x16x128xi1>, vector<4x16x128xf32>
    %c1_i32_111 = arith.constant 1 : i32
    %169 = arith.addi %149, %c1_i32_111 : i32
    %170 = arith.index_cast %169 : i32 to index
    %c0_112 = arith.constant 0 : index
    %c128_113 = arith.constant 128 : index
    %171 = vector.load %arg6[%170, %c0_112, %c128_113] : memref<18x16x384xf32, #tpu.memory_space<vmem>>, vector<4x16x128xf32>
    tpu.vector_store %arg6[%170, %c0_112, %c128_113], %158 {strides = array<i32>} : memref<18x16x384xf32, #tpu.memory_space<vmem>>, vector<4x16x128xf32>,
    %c1_i32_114 = arith.constant 1 : i32
    %172 = arith.addi %149, %c1_i32_114 : i32
    %173 = arith.index_cast %172 : i32 to index
    %c0_115 = arith.constant 0 : index
    %c0_116 = arith.constant 0 : index
    %174 = vector.load %arg6[%173, %c0_115, %c0_116] : memref<18x16x384xf32, #tpu.memory_space<vmem>>, vector<4x16x128xf32>
    tpu.vector_store %arg6[%173, %c0_115, %c0_116], %163 {strides = array<i32>} : memref<18x16x384xf32, #tpu.memory_space<vmem>>, vector<4x16x128xf32>,
    %c1_i32_117 = arith.constant 1 : i32
    %175 = arith.addi %149, %c1_i32_117 : i32
    %176 = arith.index_cast %175 : i32 to index
    %c0_118 = arith.constant 0 : index
    %c256_119 = arith.constant 256 : index
    %177 = vector.load %arg6[%176, %c0_118, %c256_119] : memref<18x16x384xf32, #tpu.memory_space<vmem>>, vector<4x16x128xf32>
    tpu.vector_store %arg6[%176, %c0_118, %c256_119], %168 {strides = array<i32>} : memref<18x16x384xf32, #tpu.memory_space<vmem>>, vector<4x16x128xf32>,
    %c1_i32_120 = arith.constant 1 : i32
    %c4_i32_121 = arith.constant 4 : i32
    %178 = arith.muli %c1_i32_120, %c4_i32_121 : i32
    %c1_122 = arith.constant 1 : index
    %179 = arith.index_cast %178 : i32 to index
    %c0_123 = arith.constant 0 : index
    %c0_124 = arith.constant 0 : index
    %180 = vector.load %arg1[%c1_122, %179, %c0_123, %c0_124] : memref<2x16x16x128xf32, #tpu.memory_space<vmem>>, vector<1x4x16x128xf32>
    %181 = vector.shape_cast %180 : vector<1x4x16x128xf32> to vector<4x16x128xf32>
    %182 = vector.broadcast %1 : vector<1x1x128xf32> to vector<4x16x128xf32>
    %183 = arith.mulf %181, %182 : vector<4x16x128xf32>
    %184 = vector.broadcast %3 : vector<1x1x128xf32> to vector<4x16x128xf32>
    %185 = arith.addf %183, %184 : vector<4x16x128xf32>
    %cst_125 = arith.constant 0.000000e+00 : f32
    %186 = vector.broadcast %cst_125 : f32 to vector<4x16x128xf32>
    %187 = arith.maximumf %185, %186 : vector<4x16x128xf32>
    %c1_i32_126 = arith.constant 1 : i32
    %188 = tpu.dynamic_rotate %187 by %c1_i32_126 dim 1 : vector<4x16x128xf32>, i32 -> vector<4x16x128xf32>
    %cst_127 = arith.constant 0.000000e+00 : f32
    %189 = vector.shape_cast %6 : vector<16x128xi1> to vector<1x16x128xi1>
    %190 = vector.broadcast %189 : vector<1x16x128xi1> to vector<4x16x128xi1>
    %191 = vector.broadcast %cst_127 : f32 to vector<4x16x128xf32>
    %192 = arith.select %190, %188, %191 : vector<4x16x128xi1>, vector<4x16x128xf32>
    %c15_i32_128 = arith.constant 15 : i32
    %193 = tpu.dynamic_rotate %187 by %c15_i32_128 dim 1 : vector<4x16x128xf32>, i32 -> vector<4x16x128xf32>
    %cst_129 = arith.constant 0.000000e+00 : f32
    %194 = vector.shape_cast %8 : vector<16x128xi1> to vector<1x16x128xi1>
    %195 = vector.broadcast %194 : vector<1x16x128xi1> to vector<4x16x128xi1>
    %196 = vector.broadcast %cst_129 : f32 to vector<4x16x128xf32>
    %197 = arith.select %195, %193, %196 : vector<4x16x128xi1>, vector<4x16x128xf32>
    %c1_i32_130 = arith.constant 1 : i32
    %198 = arith.addi %178, %c1_i32_130 : i32
    %199 = arith.index_cast %198 : i32 to index
    %c0_131 = arith.constant 0 : index
    %c128_132 = arith.constant 128 : index
    %200 = vector.load %arg6[%199, %c0_131, %c128_132] : memref<18x16x384xf32, #tpu.memory_space<vmem>>, vector<4x16x128xf32>
    tpu.vector_store %arg6[%199, %c0_131, %c128_132], %187 {strides = array<i32>} : memref<18x16x384xf32, #tpu.memory_space<vmem>>, vector<4x16x128xf32>,
    %c1_i32_133 = arith.constant 1 : i32
    %201 = arith.addi %178, %c1_i32_133 : i32
    %202 = arith.index_cast %201 : i32 to index
    %c0_134 = arith.constant 0 : index
    %c0_135 = arith.constant 0 : index
    %203 = vector.load %arg6[%202, %c0_134, %c0_135] : memref<18x16x384xf32, #tpu.memory_space<vmem>>, vector<4x16x128xf32>
    tpu.vector_store %arg6[%202, %c0_134, %c0_135], %192 {strides = array<i32>} : memref<18x16x384xf32, #tpu.memory_space<vmem>>, vector<4x16x128xf32>,
    %c1_i32_136 = arith.constant 1 : i32
    %204 = arith.addi %178, %c1_i32_136 : i32
    %205 = arith.index_cast %204 : i32 to index
    %c0_137 = arith.constant 0 : index
    %c256_138 = arith.constant 256 : index
    %206 = vector.load %arg6[%205, %c0_137, %c256_138] : memref<18x16x384xf32, #tpu.memory_space<vmem>>, vector<4x16x128xf32>
    tpu.vector_store %arg6[%205, %c0_137, %c256_138], %197 {strides = array<i32>} : memref<18x16x384xf32, #tpu.memory_space<vmem>>, vector<4x16x128xf32>,
    %c2_i32_139 = arith.constant 2 : i32
    %c4_i32_140 = arith.constant 4 : i32
    %207 = arith.muli %c2_i32_139, %c4_i32_140 : i32
    %c1_141 = arith.constant 1 : index
    %208 = arith.index_cast %207 : i32 to index
    %c0_142 = arith.constant 0 : index
    %c0_143 = arith.constant 0 : index
    %209 = vector.load %arg1[%c1_141, %208, %c0_142, %c0_143] : memref<2x16x16x128xf32, #tpu.memory_space<vmem>>, vector<1x4x16x128xf32>
    %210 = vector.shape_cast %209 : vector<1x4x16x128xf32> to vector<4x16x128xf32>
    %211 = vector.broadcast %1 : vector<1x1x128xf32> to vector<4x16x128xf32>
    %212 = arith.mulf %210, %211 : vector<4x16x128xf32>
    %213 = vector.broadcast %3 : vector<1x1x128xf32> to vector<4x16x128xf32>
    %214 = arith.addf %212, %213 : vector<4x16x128xf32>
    %cst_144 = arith.constant 0.000000e+00 : f32
    %215 = vector.broadcast %cst_144 : f32 to vector<4x16x128xf32>
    %216 = arith.maximumf %214, %215 : vector<4x16x128xf32>
    %c1_i32_145 = arith.constant 1 : i32
    %217 = tpu.dynamic_rotate %216 by %c1_i32_145 dim 1 : vector<4x16x128xf32>, i32 -> vector<4x16x128xf32>
    %cst_146 = arith.constant 0.000000e+00 : f32
    %218 = vector.shape_cast %6 : vector<16x128xi1> to vector<1x16x128xi1>
    %219 = vector.broadcast %218 : vector<1x16x128xi1> to vector<4x16x128xi1>
    %220 = vector.broadcast %cst_146 : f32 to vector<4x16x128xf32>
    %221 = arith.select %219, %217, %220 : vector<4x16x128xi1>, vector<4x16x128xf32>
    %c15_i32_147 = arith.constant 15 : i32
    %222 = tpu.dynamic_rotate %216 by %c15_i32_147 dim 1 : vector<4x16x128xf32>, i32 -> vector<4x16x128xf32>
    %cst_148 = arith.constant 0.000000e+00 : f32
    %223 = vector.shape_cast %8 : vector<16x128xi1> to vector<1x16x128xi1>
    %224 = vector.broadcast %223 : vector<1x16x128xi1> to vector<4x16x128xi1>
    %225 = vector.broadcast %cst_148 : f32 to vector<4x16x128xf32>
    %226 = arith.select %224, %222, %225 : vector<4x16x128xi1>, vector<4x16x128xf32>
    %c1_i32_149 = arith.constant 1 : i32
    %227 = arith.addi %207, %c1_i32_149 : i32
    %228 = arith.index_cast %227 : i32 to index
    %c0_150 = arith.constant 0 : index
    %c128_151 = arith.constant 128 : index
    %229 = vector.load %arg6[%228, %c0_150, %c128_151] : memref<18x16x384xf32, #tpu.memory_space<vmem>>, vector<4x16x128xf32>
    tpu.vector_store %arg6[%228, %c0_150, %c128_151], %216 {strides = array<i32>} : memref<18x16x384xf32, #tpu.memory_space<vmem>>, vector<4x16x128xf32>,
    %c1_i32_152 = arith.constant 1 : i32
    %230 = arith.addi %207, %c1_i32_152 : i32
    %231 = arith.index_cast %230 : i32 to index
    %c0_153 = arith.constant 0 : index
    %c0_154 = arith.constant 0 : index
    %232 = vector.load %arg6[%231, %c0_153, %c0_154] : memref<18x16x384xf32, #tpu.memory_space<vmem>>, vector<4x16x128xf32>
    tpu.vector_store %arg6[%231, %c0_153, %c0_154], %221 {strides = array<i32>} : memref<18x16x384xf32, #tpu.memory_space<vmem>>, vector<4x16x128xf32>,
    %c1_i32_155 = arith.constant 1 : i32
    %233 = arith.addi %207, %c1_i32_155 : i32
    %234 = arith.index_cast %233 : i32 to index
    %c0_156 = arith.constant 0 : index
    %c256_157 = arith.constant 256 : index
    %235 = vector.load %arg6[%234, %c0_156, %c256_157] : memref<18x16x384xf32, #tpu.memory_space<vmem>>, vector<4x16x128xf32>
    tpu.vector_store %arg6[%234, %c0_156, %c256_157], %226 {strides = array<i32>} : memref<18x16x384xf32, #tpu.memory_space<vmem>>, vector<4x16x128xf32>,
    %c3_i32_158 = arith.constant 3 : i32
    %c4_i32_159 = arith.constant 4 : i32
    %236 = arith.muli %c3_i32_158, %c4_i32_159 : i32
    %c1_160 = arith.constant 1 : index
    %237 = arith.index_cast %236 : i32 to index
    %c0_161 = arith.constant 0 : index
    %c0_162 = arith.constant 0 : index
    %238 = vector.load %arg1[%c1_160, %237, %c0_161, %c0_162] : memref<2x16x16x128xf32, #tpu.memory_space<vmem>>, vector<1x4x16x128xf32>
    %239 = vector.shape_cast %238 : vector<1x4x16x128xf32> to vector<4x16x128xf32>
    %240 = vector.broadcast %1 : vector<1x1x128xf32> to vector<4x16x128xf32>
    %241 = arith.mulf %239, %240 : vector<4x16x128xf32>
    %242 = vector.broadcast %3 : vector<1x1x128xf32> to vector<4x16x128xf32>
    %243 = arith.addf %241, %242 : vector<4x16x128xf32>
    %cst_163 = arith.constant 0.000000e+00 : f32
    %244 = vector.broadcast %cst_163 : f32 to vector<4x16x128xf32>
    %245 = arith.maximumf %243, %244 : vector<4x16x128xf32>
    %c1_i32_164 = arith.constant 1 : i32
    %246 = tpu.dynamic_rotate %245 by %c1_i32_164 dim 1 : vector<4x16x128xf32>, i32 -> vector<4x16x128xf32>
    %cst_165 = arith.constant 0.000000e+00 : f32
    %247 = vector.shape_cast %6 : vector<16x128xi1> to vector<1x16x128xi1>
    %248 = vector.broadcast %247 : vector<1x16x128xi1> to vector<4x16x128xi1>
    %249 = vector.broadcast %cst_165 : f32 to vector<4x16x128xf32>
    %250 = arith.select %248, %246, %249 : vector<4x16x128xi1>, vector<4x16x128xf32>
    %c15_i32_166 = arith.constant 15 : i32
    %251 = tpu.dynamic_rotate %245 by %c15_i32_166 dim 1 : vector<4x16x128xf32>, i32 -> vector<4x16x128xf32>
    %cst_167 = arith.constant 0.000000e+00 : f32
    %252 = vector.shape_cast %8 : vector<16x128xi1> to vector<1x16x128xi1>
    %253 = vector.broadcast %252 : vector<1x16x128xi1> to vector<4x16x128xi1>
    %254 = vector.broadcast %cst_167 : f32 to vector<4x16x128xf32>
    %255 = arith.select %253, %251, %254 : vector<4x16x128xi1>, vector<4x16x128xf32>
    %c1_i32_168 = arith.constant 1 : i32
    %256 = arith.addi %236, %c1_i32_168 : i32
    %257 = arith.index_cast %256 : i32 to index
    %c0_169 = arith.constant 0 : index
    %c128_170 = arith.constant 128 : index
    %258 = vector.load %arg6[%257, %c0_169, %c128_170] : memref<18x16x384xf32, #tpu.memory_space<vmem>>, vector<4x16x128xf32>
    tpu.vector_store %arg6[%257, %c0_169, %c128_170], %245 {strides = array<i32>} : memref<18x16x384xf32, #tpu.memory_space<vmem>>, vector<4x16x128xf32>,
    %c1_i32_171 = arith.constant 1 : i32
    %259 = arith.addi %236, %c1_i32_171 : i32
    %260 = arith.index_cast %259 : i32 to index
    %c0_172 = arith.constant 0 : index
    %c0_173 = arith.constant 0 : index
    %261 = vector.load %arg6[%260, %c0_172, %c0_173] : memref<18x16x384xf32, #tpu.memory_space<vmem>>, vector<4x16x128xf32>
    tpu.vector_store %arg6[%260, %c0_172, %c0_173], %250 {strides = array<i32>} : memref<18x16x384xf32, #tpu.memory_space<vmem>>, vector<4x16x128xf32>,
    %c1_i32_174 = arith.constant 1 : i32
    %262 = arith.addi %236, %c1_i32_174 : i32
    %263 = arith.index_cast %262 : i32 to index
    %c0_175 = arith.constant 0 : index
    %c256_176 = arith.constant 256 : index
    %264 = vector.load %arg6[%263, %c0_175, %c256_176] : memref<18x16x384xf32, #tpu.memory_space<vmem>>, vector<4x16x128xf32>
    tpu.vector_store %arg6[%263, %c0_175, %c256_176], %255 {strides = array<i32>} : memref<18x16x384xf32, #tpu.memory_space<vmem>>, vector<4x16x128xf32>,
    %c4_i32_177 = arith.constant 4 : i32
    %cst_178 = arith.constant 0.000000e+00 : f32
    %265 = vector.broadcast %cst_178 : f32 to vector<8x256xf32>
    %c0_179 = arith.constant 0 : index
    %c0_180 = arith.constant 0 : index
    %c0_181 = arith.constant 0 : index
    %266 = vector.load %arg6[%c0_179, %c0_180, %c0_181] : memref<18x16x384xf32, #tpu.memory_space<vmem>>, vector<16x16x384xf32>
    %267 = vector.shape_cast %266 : vector<16x16x384xf32> to vector<256x384xf32>
    %cst_182 = arith.constant dense<0.000000e+00> : vector<8x256xf32>
    %268 = tpu.matmul %10, %267, %cst_182 {dimension_numbers = #tpu.dot_dimension_numbers<[1], [1], [0], [0], [0, 0, 1, 0], [], []>} : vector<8x384xf32>, vector<256x384xf32>, vector<8x256xf32> -> vector<8x256xf32>
    %269 = arith.addf %265, %268 : vector<8x256xf32>
    %c1_183 = arith.constant 1 : index
    %c0_184 = arith.constant 0 : index
    %c0_185 = arith.constant 0 : index
    %270 = vector.load %arg6[%c1_183, %c0_184, %c0_185] : memref<18x16x384xf32, #tpu.memory_space<vmem>>, vector<16x16x384xf32>
    %271 = vector.shape_cast %270 : vector<16x16x384xf32> to vector<256x384xf32>
    %cst_186 = arith.constant dense<0.000000e+00> : vector<8x256xf32>
    %272 = tpu.matmul %12, %271, %cst_186 {dimension_numbers = #tpu.dot_dimension_numbers<[1], [1], [0], [0], [0, 0, 1, 0], [], []>} : vector<8x384xf32>, vector<256x384xf32>, vector<8x256xf32> -> vector<8x256xf32>
    %273 = arith.addf %269, %272 : vector<8x256xf32>
    %c2_187 = arith.constant 2 : index
    %c0_188 = arith.constant 0 : index
    %c0_189 = arith.constant 0 : index
    %274 = vector.load %arg6[%c2_187, %c0_188, %c0_189] : memref<18x16x384xf32, #tpu.memory_space<vmem>>, vector<16x16x384xf32>
    %275 = vector.shape_cast %274 : vector<16x16x384xf32> to vector<256x384xf32>
    %cst_190 = arith.constant dense<0.000000e+00> : vector<8x256xf32>
    %276 = tpu.matmul %14, %275, %cst_190 {dimension_numbers = #tpu.dot_dimension_numbers<[1], [1], [0], [0], [0, 0, 1, 0], [], []>} : vector<8x384xf32>, vector<256x384xf32>, vector<8x256xf32> -> vector<8x256xf32>
    %277 = arith.addf %273, %276 : vector<8x256xf32>
    %278 = vector.shape_cast %277 : vector<8x256xf32> to vector<1x8x256xf32>
    %c1_191 = arith.constant 1 : index
    %c0_192 = arith.constant 0 : index
    %c0_193 = arith.constant 0 : index
    %279 = vector.load %arg5[%c1_191, %c0_192, %c0_193] : memref<2x8x256xf32, #tpu.memory_space<vmem>>, vector<1x8x256xf32>
    tpu.vector_store %arg5[%c1_191, %c0_192, %c0_193], %278 {strides = array<i32>} : memref<2x8x256xf32, #tpu.memory_space<vmem>>, vector<1x8x256xf32>,
    return
  }
  func.func @transform_0(%arg0: i32) -> (i32, i32, i32, i32) {
    %c0_i32 = arith.constant 0 : i32
    %c0_i32_0 = arith.constant 0 : i32
    %c0_i32_1 = arith.constant 0 : i32
    %c0_i32_2 = arith.constant 0 : i32
    return %arg0, %c0_i32, %c0_i32_0, %c0_i32_1 : i32, i32, i32, i32
  }
  func.func @transform_1(%arg0: i32) -> (i32, i32) {
    %c0_i32 = arith.constant 0 : i32
    %c0_i32_0 = arith.constant 0 : i32
    %c0_i32_1 = arith.constant 0 : i32
    return %c0_i32, %c0_i32_0 : i32, i32
  }
  func.func @transform_2(%arg0: i32) -> (i32, i32) {
    %c0_i32 = arith.constant 0 : i32
    %c0_i32_0 = arith.constant 0 : i32
    %c0_i32_1 = arith.constant 0 : i32
    return %c0_i32, %c0_i32_0 : i32, i32
  }
  func.func @transform_3(%arg0: i32) -> (i32, i32, i32) {
    %c0_i32 = arith.constant 0 : i32
    %c0_i32_0 = arith.constant 0 : i32
    %c0_i32_1 = arith.constant 0 : i32
    %c0_i32_2 = arith.constant 0 : i32
    return %c0_i32, %c0_i32_0, %c0_i32_1 : i32, i32, i32
  }
  func.func @transform_4(%arg0: i32) -> (i32, i32, i32) {
    %c0_i32 = arith.constant 0 : i32
    %c0_i32_0 = arith.constant 0 : i32
    %c0_i32_1 = arith.constant 0 : i32
    return %arg0, %c0_i32, %c0_i32_0 : i32, i32, i32
  }
}

</mosaic_0001>

<bundles_post_ra>
// kernel: _lambda_.2
= control target key start
LH: loop header
LB: loop body
LE: loop exit
PB: predicated region body
PF: predicated region fallthrough
CT: control target
= control target key end

     0   :  { %vm483_vm0 = vcmask 1043456   ;;  %vm290_vm1 = vcmask 31744   ;;  %s2797_s3 = inlined_call_operand.vmem [shape: f32[4,128], index: 3, kind: input, shape index: {}]   ;;  %s2798_s0 = inlined_call_operand.vmem [shape: f32[512,4], index: 0, kind: input, shape index: {}]   ;;  %s2799_s1 = inlined_call_operand.vmem [shape: f32[1,4], index: 1, kind: input, shape index: {}]   ;;  %s2800_s2 = inlined_call_operand.vmem [shape: f32[1,4], index: 2, kind: input, shape index: {}]   ;;  %s2801_s4 = inlined_call_operand.vmem [shape: f32[512,128], index: 4, kind: output, shape index: {0}]   ;;  %s2802_s5 = inlined_call_operand.vmem [shape: f32[1,2,128], index: 5, kind: output, shape index: {1}]  }
   0x1   :  { %v289_v0 = vld [vmem:[%s2797_s3] sm:$0xf]  ;;  %v20_v5 = vld [vmem:[%s2798_s0 + $0x8] sm:$0xff]  ;;  %v21_v6 = vld [vmem:[%s2798_s0 + $0x10] sm:$0xff] }
   0x2   :  { %v19_v1 = vld [vmem:[%s2798_s0] sm:$0xff]  ;;  %1345 = vmatprep.subr.msk.mxu0 %vm483_vm0, %v289_v0  ;;  %1443 = vmatprep.subr.msk.mxu1 %vm483_vm0, %v289_v0  ;;  %v22_v9 = vld [vmem:[%s2798_s0 + $0x18] sm:$0xff]  ;;  %v24_v11 = vld [vmem:[%s2798_s0 + $0x28] sm:$0xff] }
   0x3   :  { %v1484_v2 = vld [vmem:[%s2799_s1] ss:$0 sm:$0xff]  ;;  %1346 = vmatpush3.msk.msra.mxu0 %vm483_vm0, %v289_v0  ;;  %1444 = vmatpush3.msk.msra.mxu1 %vm483_vm0, %v289_v0  ;;  %v25_v15 = vld [vmem:[%s2798_s0 + $0x30] sm:$0xff]  ;;  %v26_v19 = vld [vmem:[%s2798_s0 + $0x38] sm:$0xff] }
   0x4   :  { %v90_v3 = vmul.f32 %v1484_v2, %v19_v1  ;;  %v1491_v4 = vld [vmem:[%s2800_s2] ss:$0 sm:$0xff]  ;;  %v91_v7 = vmul.f32 %v1484_v2, %v20_v5  ;;  %v92_v8 = vmul.f32 %v1484_v2, %v21_v6  ;;  %v93_v13 = vmul.f32 %v1484_v2, %v22_v9  ;;  %v28_v33 = vld [vmem:[%s2798_s0 + $0x48] sm:$0xff]  ;;  %v29_v34 = vld [vmem:[%s2798_s0 + $0x50] sm:$0xff] }
   0x5   :  { %v23_v10 = vld [vmem:[%s2798_s0 + $0x20] sm:$0xff]  ;;  %v95_v18 = vmul.f32 %v1484_v2, %v24_v11  ;;  %v96_v23 = vmul.f32 %v1484_v2, %v25_v15  ;;  %v97_v27 = vmul.f32 %v1484_v2, %v26_v19  ;;  %v99_v37 = vmul.f32 %v1484_v2, %v28_v33  ;;  %v30_v41 = vld [vmem:[%s2798_s0 + $0x58] sm:$0xff]  ;;  %v32_v43 = vld [vmem:[%s2798_s0 + $0x68] sm:$0xff] }
   0x6   :  { %v161_v12 = vadd.f32 %v1491_v4, %v90_v3  ;;  %v94_v14 = vmul.f32 %v1484_v2, %v23_v10  ;;  %v162_v16 = vadd.f32 %v1491_v4, %v91_v7  ;;  %v163_v17 = vadd.f32 %v1491_v4, %v92_v8  ;;  %v27_v26 = vld [vmem:[%s2798_s0 + $0x40] sm:$0xff]  ;;  %v33_v44 = vld [vmem:[%s2798_s0 + $0x70] sm:$0xff]  ;;  %v34_v50 = vld [vmem:[%s2798_s0 + $0x78] sm:$0xff] }
   0x7   :  { %v164_v21 = vadd.f32 %v1491_v4, %v93_v13  ;;  %v166_v29 = vadd.f32 %v1491_v4, %v95_v18  ;;  %v167_v31 = vadd.f32 %v1491_v4, %v96_v23  ;;  %v98_v32 = vmul.f32 %v1484_v2, %v27_v26  ;;  %v31_v42 = vld [vmem:[%s2798_s0 + $0x60] sm:$0xff]  ;;  %v36_v63 = vld [vmem:[%s2798_s0 + $0x88] sm:$0xff]  ;;  %v37_v0 = vld [vmem:[%s2798_s0 + $0x90] sm:$0xff] }
   0x8   :  { %v225_v20 = vmax.f32 %v161_v12, 0.0  ;;  %v165_v22 = vadd.f32 %v1491_v4, %v94_v14  ;;  %v226_v24 = vmax.f32 %v162_v16, 0.0  ;;  %v227_v25 = vmax.f32 %v163_v17, 0.0  ;;  %v35_v55 = vld [vmem:[%s2798_s0 + $0x80] sm:$0xff]  ;;  %v38_v3 = vld [vmem:[%s2798_s0 + $0x98] sm:$0xff]  ;;  %v52_v5 = vld [vmem:[%s2798_s0 + $0x108] sm:$0xff] }
   0x9   :  { %v228_v28 = vmax.f32 %v164_v21, 0.0  ;;  %v168_v35 = vadd.f32 %v1491_v4, %v97_v27  ;;  %v230_v36 = vmax.f32 %v166_v29, 0.0  ;;  %v231_v38 = vmax.f32 %v167_v31, 0.0  ;;  %v51_v1 = vld [vmem:[%s2798_s0 + $0x100] sm:$0xff]  ;;  %v53_v6 = vld [vmem:[%s2798_s0 + $0x110] sm:$0xff]  ;;  %v54_v12 = vld [vmem:[%s2798_s0 + $0x118] sm:$0xff] }
   0xa   :  { %1347 = vmatprep.mubr.msk.f32.mxu0 %vm290_vm1, %v225_v20  ;;  %v229_v30 = vmax.f32 %v165_v22, 0.0  ;;  %v169_v39 = vadd.f32 %v1491_v4, %v98_v32  ;;  %v100_v40 = vmul.f32 %v1484_v2, %v29_v34  ;;  %v170_v46 = vadd.f32 %v1491_v4, %v99_v37  ;;  %v39_v11 = vld [vmem:[%s2798_s0 + $0xa0] sm:$0xff]  ;;  %v40_v17 = vld [vmem:[%s2798_s0 + $0xa8] sm:$0xff]  ;;  %v41_v26 = vld [vmem:[%s2798_s0 + $0xb0] sm:$0xff] }
   0xb   :  { %1348 = vmatmul.mubr.msk.f32.vlgmr.msra.gmra.mrb[0].mxu0 %vm290_vm1, %v226_v24  ;;  %v232_v45 = vmax.f32 %v168_v35, 0.0  ;;  %v101_v47 = vmul.f32 %v1484_v2, %v30_v41  ;;  %v102_v48 = vmul.f32 %v1484_v2, %v31_v42  ;;  %v103_v49 = vmul.f32 %v1484_v2, %v32_v43  ;;  %v55_v13 = vld [vmem:[%s2798_s0 + $0x120] sm:$0xff]  ;;  %v56_v19 = vld [vmem:[%s2798_s0 + $0x128] sm:$0xff]  ;;  %v57_v24 = vld [vmem:[%s2798_s0 + $0x130] sm:$0xff] }
   0xc   :  { %1350 = vmatprep.mubr.msk.f32.mxu0 %vm290_vm1, %v227_v25  ;;  %v233_v51 = vmax.f32 %v169_v39, 0.0  ;;  %v171_v52 = vadd.f32 %v1491_v4, %v100_v40  ;;  %v104_v53 = vmul.f32 %v1484_v2, %v33_v44  ;;  %v105_v54 = vmul.f32 %v1484_v2, %v34_v50  ;;  %v42_v27 = vld [vmem:[%s2798_s0 + $0xb8] sm:$0xff]  ;;  %v59_v44 = vld [vmem:[%s2798_s0 + $0x140] sm:$0xff] }
   0xd   :  { %v234_v56 = vmax.f32 %v170_v46, 0.0  ;;  %v172_v57 = vadd.f32 %v1491_v4, %v101_v47  ;;  %v173_v58 = vadd.f32 %v1491_v4, %v102_v48  ;;  %v174_v59 = vadd.f32 %v1491_v4, %v103_v49  ;;  %v58_v39 = vld [vmem:[%s2798_s0 + $0x138] sm:$0xff]  ;;  %v43_v49 = vld [vmem:[%s2798_s0 + $0xc0] sm:$0xff] }
   0xe   :  { %v235_v60 = vmax.f32 %v171_v52, 0.0  ;;  %v1583_v61 = vadd.f32 %v1491_v4, %v104_v53  ;;  %v106_v62 = vmul.f32 %v1484_v2, %v35_v55  ;;  %v1606_v10 = vadd.f32 %v1491_v4, %v105_v54  ;;  %v44_v55 = vld [vmem:[%s2798_s0 + $0xc8] sm:$0xff] }
   0xf   :  { %1351 = vmatmul.mubr.msk.f32.gmra.mrb[2].mxu0 %vm290_vm1, %v228_v28  ;;  %v236_v7 = vmax.f32 %v172_v57, 0.0  ;;  %v237_v8 = vmax.f32 %v173_v58, 0.0  ;;  %v238_v9 = vmax.f32 %v174_v59, 0.0  ;;  %v107_v15 = vmul.f32 %v1484_v2, %v36_v63  ;;  %v60_v59 = vld [vmem:[%s2798_s0 + $0x148] sm:$0xff] }
  0x10   :  { %1353 = vmatprep.mubr.msk.f32.mxu0 %vm290_vm1, %v229_v30  ;;  %v239_v14 = vmax.f32 %v1583_v61, 0.0  ;;  %v108_v16 = vmul.f32 %v1484_v2, %v37_v0  ;;  %v122_v18 = vmul.f32 %v1484_v2, %v51_v1  ;;  %v1629_v20 = vadd.f32 %v1491_v4, %v106_v62  ;;  %v45_v0 = vld [vmem:[%s2798_s0 + $0xd0] sm:$0xff] }
  0x11   :  { %v109_v21 = vmul.f32 %v1484_v2, %v38_v3  ;;  %v123_v22 = vmul.f32 %v1484_v2, %v52_v5  ;;  %v124_v23 = vmul.f32 %v1484_v2, %v53_v6  ;;  %v110_v25 = vmul.f32 %v1484_v2, %v39_v11  ;;  %v61_v1 = vld [vmem:[%s2798_s0 + $0x150] sm:$0xff] }
  0x12   :  { %v193_v28 = vadd.f32 %v1491_v4, %v122_v18  ;;  %v125_v29 = vmul.f32 %v1484_v2, %v54_v12  ;;  %v126_v30 = vmul.f32 %v1484_v2, %v55_v13  ;;  %v111_v31 = vmul.f32 %v1484_v2, %v40_v17 }
  0x13   :  { %1354 = vmatmul.mubr.msk.f32.gmra.mrb[4].mxu0 %vm290_vm1, %v230_v36  ;;  %v194_v32 = vadd.f32 %v1491_v4, %v123_v22  ;;  %v195_v33 = vadd.f32 %v1491_v4, %v124_v23  ;;  %v127_v34 = vmul.f32 %v1484_v2, %v56_v19  ;;  %v112_v40 = vmul.f32 %v1484_v2, %v41_v26 }
  0x14   :  { %1356 = vmatprep.mubr.msk.f32.mxu0 %vm290_vm1, %v231_v38  ;;  %v257_v35 = vmax.f32 %v193_v28, 0.0  ;;  %v196_v36 = vadd.f32 %v1491_v4, %v125_v29  ;;  %v197_v37 = vadd.f32 %v1491_v4, %v126_v30  ;;  %v128_v38 = vmul.f32 %v1484_v2, %v57_v24  ;;  %v64_v30 = vld [vmem:[%s2798_s0 + $0x168] sm:$0xff] }
  0x15   :  { %v113_v41 = vmul.f32 %v1484_v2, %v42_v27  ;;  %v258_v42 = vmax.f32 %v194_v32, 0.0  ;;  %v259_v43 = vmax.f32 %v195_v33, 0.0  ;;  %v1666_v46 = vadd.f32 %v1491_v4, %v108_v16  ;;  %v74_v32 = vld [vmem:[%s2798_s0 + $0x1b8] sm:$0xff] }
  0x16   :  { %v1669_v47 = vadd.f32 %v1491_v4, %v109_v21  ;;  %v1672_v48 = vadd.f32 %v1491_v4, %v110_v25  ;;  %1395 = vmatprep.mubr.msk.f32.mxu1 %vm290_vm1, %v257_v35  ;;  %v240_v50 = vmax.f32 %v1606_v10, 0.0  ;;  %v198_v52 = vadd.f32 %v1491_v4, %v127_v34  ;;  %v47_v10 = vld [vmem:[%s2798_s0 + $0xe0] sm:$0xff]  ;;  %v73_v25 = vld [vmem:[%s2798_s0 + $0x1b0] sm:$0xff] }
  0x17   :  { %1357 = vmatmul.mubr.msk.f32.gmra.mrb[6].mxu0 %vm290_vm1, %v232_v45  ;;  %v178_v45 = vadd.f32 %v1491_v4, %v107_v15  ;;  %1396 = vmatmul.mubr.msk.f32.vlgmr.msra.gmra.mrb[0].mxu1 %vm290_vm1, %v258_v42  ;;  %v129_v53 = vmul.f32 %v1484_v2, %v58_v39  ;;  %v241_v54 = vmax.f32 %v1629_v20, 0.0  ;;  %v199_v57 = vadd.f32 %v1491_v4, %v128_v38  ;;  %v63_v15 = vld [vmem:[%s2798_s0 + $0x160] sm:$0xff]  ;;  %v72_v20 = vld [vmem:[%s2798_s0 + $0x1a8] sm:$0xff] }
  0x18   :  { %1359 = vmatprep.mubr.msk.f32.mxu0 %vm290_vm1, %v233_v51  ;;  %v260_v51 = vmax.f32 %v196_v36, 0.0  ;;  %1398 = vmatprep.mubr.msk.f32.mxu1 %vm290_vm1, %v259_v43  ;;  %v130_v58 = vmul.f32 %v1484_v2, %v59_v44  ;;  %v1698_v61 = vadd.f32 %v1491_v4, %v112_v40  ;;  %v1701_v62 = vadd.f32 %v1491_v4, %v113_v41  ;;  %v76_v42 = vld [vmem:[%s2798_s0 + $0x1c8] sm:$0xff]  ;;  %v77_v43 = vld [vmem:[%s2798_s0 + $0x1d0] sm:$0xff] }
  0x19   :  { %v114_v63 = vmul.f32 %v1484_v2, %v43_v49  ;;  %v242_v3 = vmax.f32 %v178_v45, 0.0  ;;  %v243_v5 = vmax.f32 %v1666_v46, 0.0  ;;  %v244_v6 = vmax.f32 %v1669_v47, 0.0  ;;  %v78_v49 = vld [vmem:[%s2798_s0 + $0x1d8] sm:$0xff] }
  0x1a   :  { %v262_v11 = vmax.f32 %v198_v52, 0.0  ;;  %v200_v12 = vadd.f32 %v1491_v4, %v129_v53  ;;  %v131_v13 = vmul.f32 %v1484_v2, %v60_v59  ;;  %v116_v16 = vmul.f32 %v1484_v2, %v45_v0 }
  0x1b   :  { %1360 = vmatmul.mubr.msk.f32.gmra.mrb[8].mxu0 %vm290_vm1, %v234_v56  ;;  %v261_v56 = vmax.f32 %v197_v37, 0.0  ;;  %1399 = vmatmul.mubr.msk.f32.gmra.mrb[2].mxu1 %vm290_vm1, %v260_v51  ;;  %v263_v17 = vmax.f32 %v199_v57, 0.0  ;;  %v201_v18 = vadd.f32 %v1491_v4, %v130_v58  ;;  %v132_v19 = vmul.f32 %v1484_v2, %v61_v1  ;;  %v75_v37 = vld [vmem:[%s2798_s0 + $0x1c0] sm:$0xff]  ;;  %v66_v57 = vld [vmem:[%s2798_s0 + $0x178] sm:$0xff] }
  0x1c   :  { %1362 = vmatprep.mubr.msk.f32.mxu0 %vm290_vm1, %v235_v60  ;;  %v1695_v60 = vadd.f32 %v1491_v4, %v111_v31  ;;  %v247_v22 = vmax.f32 %v1698_v61, 0.0  ;;  %v248_v23 = vmax.f32 %v1701_v62, 0.0  ;;  %v1742_v24 = vadd.f32 %v1491_v4, %v114_v63  ;;  %v65_v31 = vld [vmem:[%s2798_s0 + $0x170] sm:$0xff] }
  0x1d   :  { %1401 = vmatprep.mubr.msk.f32.mxu1 %vm290_vm1, %v261_v56  ;;  %v1751_v27 = vmul.f32 %v1484_v2, %v47_v10  ;;  %v134_v29 = vmul.f32 %v1484_v2, %v63_v15  ;;  %v264_v34 = vmax.f32 %v200_v12, 0.0  ;;  %v202_v35 = vadd.f32 %v1491_v4, %v131_v13  ;;  %v81_v63 = vld [vmem:[%s2798_s0 + $0x1f0] sm:$0xff]  ;;  %v48_v15 = vld [vmem:[%s2798_s0 + $0xe8] sm:$0xff] }
  0x1e   :  { %v246_v21 = vmax.f32 %v1695_v60, 0.0  ;;  %v143_v36 = vmul.f32 %v1484_v2, %v72_v20  ;;  %v1776_v38 = vadd.f32 %v1491_v4, %v116_v16  ;;  %v265_v39 = vmax.f32 %v201_v18, 0.0  ;;  %v49_v16 = vld [vmem:[%s2798_s0 + $0xf0] sm:$0xff] }
  0x1f   :  { %1363 = vmatmul.mubr.msk.f32.gmra.mrb[10].mxu0 %vm290_vm1, %v236_v7  ;;  %v245_v7 = vmax.f32 %v1672_v48, 0.0  ;;  %1402 = vmatmul.mubr.msk.f32.gmra.mrb[4].mxu1 %vm290_vm1, %v262_v11  ;;  %v203_v40 = vadd.f32 %v1491_v4, %v132_v19  ;;  %v144_v41 = vmul.f32 %v1484_v2, %v73_v25  ;;  %v135_v44 = vmul.f32 %v1484_v2, %v64_v30  ;;  %v67_v48 = vld [vmem:[%s2798_s0 + $0x180] sm:$0xff]  ;;  %v69_v61 = vld [vmem:[%s2798_s0 + $0x190] sm:$0xff] }
  0x20   :  { %1365 = vmatprep.mubr.msk.f32.mxu0 %vm290_vm1, %v237_v8  ;;  %v46_v8 = vld [vmem:[%s2798_s0 + $0xd8] sm:$0xff]  ;;  %1404 = vmatprep.mubr.msk.f32.mxu1 %vm290_vm1, %v263_v17  ;;  %v136_v45 = vmul.f32 %v1484_v2, %v65_v31  ;;  %v1790_v46 = vadd.f32 %v1491_v4, %v143_v36  ;;  %v145_v47 = vmul.f32 %v1484_v2, %v74_v32  ;;  %v266_v56 = vmax.f32 %v202_v35, 0.0 }
  0x21   :  { %v1748_v26 = vmul.f32 %v1484_v2, %v46_v8  ;;  %v205_v52 = vadd.f32 %v1491_v4, %v134_v29  ;;  %v1802_v53 = vadd.f32 %v1491_v4, %v144_v41  ;;  %v147_v59 = vmul.f32 %v1484_v2, %v76_v42  ;;  %v50_v36 = vld [vmem:[%s2798_s0 + $0xf8] sm:$0xff]  ;;  %v71_v41 = vld [vmem:[%s2798_s0 + $0x1a0] sm:$0xff] }
  0x22   :  { %v1814_v58 = vadd.f32 %v1491_v4, %v145_v47  ;;  %v148_v60 = vmul.f32 %v1484_v2, %v77_v43  ;;  %v267_v0 = vmax.f32 %v203_v40, 0.0  ;;  %v249_v8 = vmax.f32 %v1742_v24, 0.0  ;;  %v70_v40 = vld [vmem:[%s2798_s0 + $0x198] sm:$0xff] }
  0x23   :  { %1366 = vmatmul.mubr.msk.f32.gmra.mrb[12].mxu0 %vm290_vm1, %v238_v9  ;;  %v115_v9 = vmul.f32 %v1484_v2, %v44_v55  ;;  %v80_v55 = vld [vmem:[%s2798_s0 + $0x1e8] sm:$0xff]  ;;  %1405 = vmatmul.mubr.msk.f32.gmra.mrb[6].mxu1 %vm290_vm1, %v264_v34  ;;  %v137_v11 = vmul.f32 %v1484_v2, %v66_v57  ;;  %v206_v18 = vadd.f32 %v1491_v4, %v135_v44 }
  0x24   :  { %1368 = vmatprep.mubr.msk.f32.mxu0 %vm290_vm1, %v239_v14  ;;  %v62_v14 = vld [vmem:[%s2798_s0 + $0x158] sm:$0xff]  ;;  %1407 = vmatprep.mubr.msk.f32.mxu1 %vm290_vm1, %v265_v39  ;;  %v151_v10 = vmul.f32 %v1484_v2, %v80_v55  ;;  %v207_v24 = vadd.f32 %v1491_v4, %v136_v45  ;;  %v138_v25 = vmul.f32 %v1484_v2, %v67_v48  ;;  %v251_v39 = vmax.f32 %v1776_v38, 0.0 }
  0x25   :  { %v133_v28 = vmul.f32 %v1484_v2, %v62_v14  ;;  %v1766_v33 = vadd.f32 %v1491_v4, %v115_v9  ;;  %v1841_v9 = vadd.f32 %v1491_v4, %v148_v60  ;;  %v152_v14 = vmul.f32 %v1484_v2, %v81_v63 }
  0x26   :  { %v1862_v19 = vadd.f32 %v1491_v4, %v151_v10  ;;  %v188_v30 = vadd.f32 %v1491_v4, %v1748_v26  ;;  %v189_v31 = vadd.f32 %v1491_v4, %v1751_v27  ;;  %v119_v32 = vmul.f32 %v1484_v2, %v48_v15 }
  0x27   :  { %1369 = vmatmul.mubr.msk.f32.gmra.mrb[14].mxu0 %vm290_vm1, %v240_v50  ;;  %v79_v50 = vld [vmem:[%s2798_s0 + $0x1e0] sm:$0xff]  ;;  %v204_v51 = vadd.f32 %v1491_v4, %v133_v28  ;;  %1408 = vmatmul.mubr.msk.f32.gmra.mrb[8].mxu1 %vm290_vm1, %v266_v56  ;;  %v68_v28 = vld [vmem:[%s2798_s0 + $0x188] sm:$0xff]  ;;  %v1875_v29 = vadd.f32 %v1491_v4, %v152_v14  ;;  %v120_v34 = vmul.f32 %v1484_v2, %v49_v16  ;;  %v250_v35 = vmax.f32 %v1766_v33, 0.0 }
  0x28   :  { %1371 = vmatprep.mubr.msk.f32.mxu0 %vm290_vm1, %v241_v54  ;;  %v146_v54 = vmul.f32 %v1484_v2, %v75_v37  ;;  %1410 = vmatprep.mubr.msk.f32.mxu1 %vm290_vm1, %v267_v0  ;;  %v270_v26 = vmax.f32 %v206_v18, 0.0  ;;  %v208_v37 = vadd.f32 %v1491_v4, %v137_v11  ;;  %v139_v27 = vmul.f32 %v1484_v2, %v68_v28 }
  0x29   :  { %v268_v17 = vmax.f32 %v204_v51, 0.0  ;;  %v271_v62 = vmax.f32 %v207_v24, 0.0  ;;  %v140_v33 = vmul.f32 %v1484_v2, %v69_v61  ;;  %v190_v42 = vadd.f32 %v1491_v4, %v119_v32 }
  0x2a   :  { %v1826_v1 = vadd.f32 %v1491_v4, %v146_v54  ;;  %v191_v43 = vadd.f32 %v1491_v4, %v120_v34  ;;  %v121_v38 = vmul.f32 %v1484_v2, %v50_v36  ;;  %v252_v44 = vmax.f32 %v188_v30, 0.0 }
  0x2b   :  { %1372 = vmatmul.mubr.msk.f32.gmra.mrb[16].mxu0 %vm290_vm1, %v242_v3  ;;  %v149_v3 = vmul.f32 %v1484_v2, %v78_v49  ;;  %1411 = vmatmul.mubr.msk.f32.gmra.mrb[10].mxu1 %vm290_vm1, %v268_v17  ;;  %v272_v45 = vmax.f32 %v208_v37, 0.0  ;;  %v210_v47 = vadd.f32 %v1491_v4, %v139_v27  ;;  %v141_v49 = vmul.f32 %v1484_v2, %v70_v40 }
  0x2c   :  { %1374 = vmatprep.mubr.msk.f32.mxu0 %vm290_vm1, %v243_v5  ;;  %v150_v5 = vmul.f32 %v1484_v2, %v79_v50  ;;  %v253_v50 = vmax.f32 %v189_v31, 0.0  ;;  %v142_v54 = vmul.f32 %v1484_v2, %v71_v41  ;;  %v254_v55 = vmax.f32 %v190_v42, 0.0 }
  0x2d   :  { %v1846_v12 = vadd.f32 %v1491_v4, %v149_v3  ;;  %v192_v56 = vadd.f32 %v1491_v4, %v121_v38  ;;  %v274_v57 = vmax.f32 %v210_v47, 0.0  ;;  %v255_v60 = vmax.f32 %v191_v43, 0.0 }
  0x2e   :  { %v1849_v13 = vadd.f32 %v1491_v4, %v150_v5  ;;  %v213_v0 = vadd.f32 %v1491_v4, %v142_v54  ;;  %v281_v48 = vmax.f32 %v1826_v1, 0.0  ;;  %v286_v1 = vmax.f32 %v1862_v19, 0.0 }
  0x2f   :  { %1375 = vmatmul.mubr.msk.f32.gmra.mrb[18].mxu0 %vm290_vm1, %v244_v6  ;;  %v82_v6 = vld [vmem:[%s2798_s0 + $0x1f8] sm:$0xff] }
  0x30   :  { %1377 = vmatprep.mubr.msk.f32.mxu0 %vm290_vm1, %v245_v7  ;;  %v1838_v7 = vadd.f32 %v1491_v4, %v147_v59  ;;  %v153_v20 = vmul.f32 %v1484_v2, %v82_v6  ;;  %v212_v59 = vadd.f32 %v1491_v4, %v141_v49  ;;  %v256_v2 = vmax.f32 %v192_v56, 0.0 }
  0x31   :  { %v277_v5 = vmax.f32 %v213_v0, 0.0  ;;  %v278_v6 = vmax.f32 %v1790_v46, 0.0  ;;  %v283_v46 = vmax.f32 %v1841_v9, 0.0 }
  0x32   :  { %v276_v3 = vmax.f32 %v212_v59, 0.0  ;;  %v282_v10 = vmax.f32 %v1838_v7, 0.0  ;;  %v287_v7 = vmax.f32 %v1875_v29, 0.0 }
  0x33   :  { %1378 = vmatmul.mubr.msk.f32.gmra.mrb[20].mxu0 %vm290_vm1, %v246_v21  ;;  %v269_v21 = vmax.f32 %v205_v52, 0.0  ;;  %v211_v52 = vadd.f32 %v1491_v4, %v140_v33 }
  0x34   :  { %1380 = vmatprep.mubr.msk.f32.mxu0 %vm290_vm1, %v247_v22  ;;  %v1881_v22 = vadd.f32 %v1491_v4, %v153_v20 }
  0x35   :  { %1413 = vmatprep.mubr.msk.f32.mxu1 %vm290_vm1, %v269_v21  ;;  %v275_v63 = vmax.f32 %v211_v52, 0.0 }
  0x36   :  { %1414 = vmatmul.mubr.msk.f32.gmra.mrb[12].mxu1 %vm290_vm1, %v270_v26  ;;  %v288_v9 = vmax.f32 %v1881_v22, 0.0 }
  0x37   :  { %1381 = vmatmul.mubr.msk.f32.gmra.mrb[22].mxu0 %vm290_vm1, %v248_v23  ;;  %v209_v23 = vadd.f32 %v1491_v4, %v138_v25  ;;  %1416 = vmatprep.mubr.msk.f32.mxu1 %vm290_vm1, %v271_v62  ;;  %v279_v4 = vmax.f32 %v1802_v53, 0.0  ;;  %v284_v53 = vmax.f32 %v1846_v12, 0.0 }
  0x38   :  { %1383 = vmatprep.mubr.msk.f32.mxu0 %vm290_vm1, %v249_v8  ;;  %v280_v8 = vmax.f32 %v1814_v58, 0.0  ;;  %v285_v58 = vmax.f32 %v1849_v13, 0.0 }
  0x39   :  { %v273_v51 = vmax.f32 %v209_v23, 0.0 }
  0x3a   :  { %1417 = vmatmul.mubr.msk.f32.gmra.mrb[14].mxu1 %vm290_vm1, %v272_v45 }
  0x3b   :  { %1384 = vmatmul.mubr.msk.f32.gmra.mrb[24].mxu0 %vm290_vm1, %v250_v35  ;;  %1419 = vmatprep.mubr.msk.f32.mxu1 %vm290_vm1, %v273_v51 }
  0x3c   :  { %1386 = vmatprep.mubr.msk.f32.mxu0 %vm290_vm1, %v251_v39 }
  0x3e   :  { %1420 = vmatmul.mubr.msk.f32.gmra.mrb[16].mxu1 %vm290_vm1, %v274_v57 }
  0x3f   :  { %1387 = vmatmul.mubr.msk.f32.gmra.mrb[26].mxu0 %vm290_vm1, %v252_v44  ;;  %1422 = vmatprep.mubr.msk.f32.mxu1 %vm290_vm1, %v275_v63 }
  0x40   :  { %1389 = vmatprep.mubr.msk.f32.mxu0 %vm290_vm1, %v253_v50 }
  0x42   :  { %1423 = vmatmul.mubr.msk.f32.gmra.mrb[18].mxu1 %vm290_vm1, %v276_v3 }
  0x43   :  { %1390 = vmatmul.mubr.msk.f32.gmra.mrb[28].mxu0 %vm290_vm1, %v254_v55  ;;  %1425 = vmatprep.mubr.msk.f32.mxu1 %vm290_vm1, %v277_v5 }
  0x44   :  { %1392 = vmatprep.mubr.msk.f32.mxu0 %vm290_vm1, %v255_v60 }
  0x46   :  { %1426 = vmatmul.mubr.msk.f32.gmra.mrb[20].mxu1 %vm290_vm1, %v278_v6 }
  0x47   :  { %1393 = vmatmul.mubr.msk.f32.gmra.mrb[30].mxu0 %vm290_vm1, %v256_v2  ;;  %1428 = vmatprep.mubr.msk.f32.mxu1 %vm290_vm1, %v279_v4 }
  0x4a   :  { %1429 = vmatmul.mubr.msk.f32.gmra.mrb[22].mxu1 %vm290_vm1, %v280_v8 }
  0x4b   :  { %1431 = vmatprep.mubr.msk.f32.mxu1 %vm290_vm1, %v281_v48 }
  0x4e   :  { %1432 = vmatmul.mubr.msk.f32.gmra.mrb[24].mxu1 %vm290_vm1, %v282_v10 }
  0x4f   :  { %1434 = vmatprep.mubr.msk.f32.mxu1 %vm290_vm1, %v283_v46 }
  0x52   :  { %1435 = vmatmul.mubr.msk.f32.gmra.mrb[26].mxu1 %vm290_vm1, %v284_v53 }
  0x53   :  { %1437 = vmatprep.mubr.msk.f32.mxu1 %vm290_vm1, %v285_v58 }
  0x56   :  { %1438 = vmatmul.mubr.msk.f32.gmra.mrb[28].mxu1 %vm290_vm1, %v286_v1 }
  0x57   :  { %1440 = vmatprep.mubr.msk.f32.mxu1 %vm290_vm1, %v287_v7 }
  0x5a   :  { %1441 = vmatmul.mubr.msk.f32.gmra.mrb[30].mxu1 %vm290_vm1, %v288_v9 }
  0xde   :  { %v1957_v11 = vpop.f32.mrb[0].mxu0 }
  0xdf   :  { %873 = vst [vmem:[%s2801_s4 + $0x8] sm:$0xff] %v1957_v11  ;;  %v1963_v12 = vpop.f32.mrb[1].mxu0 }
  0xe0   :  { %872 = vst [vmem:[%s2801_s4] sm:$0xff] %v1963_v12  ;;  %v936_v13 = vadd.f32 %v1957_v11, %v1963_v12 }
  0xe2   :  { %v1971_v14 = vpop.f32.mrb[2].mxu0 }
  0xe3   :  { %875 = vst [vmem:[%s2801_s4 + $0x18] sm:$0xff] %v1971_v14  ;;  %v1977_v15 = vpop.f32.mrb[3].mxu0 }
  0xe4   :  { %874 = vst [vmem:[%s2801_s4 + $0x10] sm:$0xff] %v1977_v15  ;;  %v937_v16 = vadd.f32 %v936_v13, %v1977_v15 }
  0xe6   :  { %v1984_v17 = vpop.f32.mrb[4].mxu0  ;;  %v938_v18 = vadd.f32 %v1971_v14, %v937_v16 }
  0xe7   :  { %877 = vst [vmem:[%s2801_s4 + $0x28] sm:$0xff] %v1984_v17  ;;  %v1991_v19 = vpop.f32.mrb[5].mxu0 }
  0xe8   :  { %876 = vst [vmem:[%s2801_s4 + $0x20] sm:$0xff] %v1991_v19  ;;  %v939_v20 = vadd.f32 %v938_v18, %v1991_v19 }
  0xea   :  { %v1998_v21 = vpop.f32.mrb[6].mxu0  ;;  %v940_v24 = vadd.f32 %v1984_v17, %v939_v20  ;;  %v2043_v37 = vpop.f32.mrb[0].mxu1 }
  0xeb   :  { %879 = vst [vmem:[%s2801_s4 + $0x38] sm:$0xff] %v1998_v21  ;;  %v2005_v25 = vpop.f32.mrb[7].mxu0  ;;  %2818 = vst [vmem:[#allocation2_spill] sm:$0xff] %v2043_v37  ;;  %v2055_v39 = vpop.f32.mrb[1].mxu1 }
  0xec   :  { %878 = vst [vmem:[%s2801_s4 + $0x30] sm:$0xff] %v2005_v25  ;;  %v941_v28 = vadd.f32 %v940_v24, %v2005_v25  ;;  %905 = vst [vmem:[%s2801_s4 + $0x108] sm:$0xff] %v2043_v37 }
  0xed   :  { %2819 = vst [vmem:[#allocation3_spill] sm:$0xff] %v2055_v39  ;;  %904 = vst [vmem:[%s2801_s4 + $0x100] sm:$0xff] %v2055_v39 }
  0xee   :  { %v2012_v29 = vpop.f32.mrb[8].mxu0  ;;  %v942_v61 = vadd.f32 %v1998_v21, %v941_v28  ;;  %v2069_v40 = vpop.f32.mrb[2].mxu1 }
  0xef   :  { %881 = vst [vmem:[%s2801_s4 + $0x48] sm:$0xff] %v2012_v29  ;;  %v2019_v22 = vpop.f32.mrb[9].mxu0  ;;  %2820 = vst [vmem:[#allocation4_spill] sm:$0xff] %v2069_v40  ;;  %v2081_v42 = vpop.f32.mrb[3].mxu1 }
  0xf0   :  { %880 = vst [vmem:[%s2801_s4 + $0x40] sm:$0xff] %v2019_v22  ;;  %v943_v30 = vadd.f32 %v942_v61, %v2019_v22  ;;  %907 = vst [vmem:[%s2801_s4 + $0x118] sm:$0xff] %v2069_v40 }
  0xf1   :  { %2821 = vst [vmem:[#allocation5_spill] sm:$0xff] %v2081_v42  ;;  %906 = vst [vmem:[%s2801_s4 + $0x110] sm:$0xff] %v2081_v42 }
  0xf2   :  { %v2026_v31 = vpop.f32.mrb[10].mxu0  ;;  %v944_v32 = vadd.f32 %v2012_v29, %v943_v30  ;;  %v2095_v45 = vpop.f32.mrb[4].mxu1 }
  0xf3   :  { %883 = vst [vmem:[%s2801_s4 + $0x58] sm:$0xff] %v2026_v31  ;;  %v2033_v34 = vpop.f32.mrb[11].mxu0  ;;  %2822 = vst [vmem:[#allocation6_spill] sm:$0xff] %v2095_v45  ;;  %v2107_v49 = vpop.f32.mrb[5].mxu1 }
  0xf4   :  { %882 = vst [vmem:[%s2801_s4 + $0x50] sm:$0xff] %v2033_v34  ;;  %v945_v35 = vadd.f32 %v944_v32, %v2033_v34  ;;  %909 = vst [vmem:[%s2801_s4 + $0x128] sm:$0xff] %v2095_v45 }
  0xf5   :  { %2823 = vst [vmem:[#allocation7_spill] sm:$0xff] %v2107_v49  ;;  %908 = vst [vmem:[%s2801_s4 + $0x120] sm:$0xff] %v2107_v49 }
  0xf6   :  { %v2040_v36 = vpop.f32.mrb[12].mxu0  ;;  %v946_v26 = vadd.f32 %v2026_v31, %v945_v35  ;;  %v2121_v54 = vpop.f32.mrb[6].mxu1 }
  0xf7   :  { %885 = vst [vmem:[%s2801_s4 + $0x68] sm:$0xff] %v2040_v36  ;;  %v2049_v27 = vpop.f32.mrb[13].mxu0  ;;  %2824 = vst [vmem:[#allocation8_spill] sm:$0xff] %v2121_v54  ;;  %v2133_v56 = vpop.f32.mrb[7].mxu1 }
  0xf8   :  { %884 = vst [vmem:[%s2801_s4 + $0x60] sm:$0xff] %v2049_v27  ;;  %v947_v62 = vadd.f32 %v946_v26, %v2049_v27  ;;  %911 = vst [vmem:[%s2801_s4 + $0x138] sm:$0xff] %v2121_v54 }
  0xf9   :  { %2825 = vst [vmem:[#allocation9_spill] sm:$0xff] %v2133_v56  ;;  %910 = vst [vmem:[%s2801_s4 + $0x130] sm:$0xff] %v2133_v56 }
  0xfa   :  { %v2066_v23 = vpop.f32.mrb[14].mxu0  ;;  %v948_v33 = vadd.f32 %v2040_v36, %v947_v62  ;;  %v2147_v63 = vpop.f32.mrb[8].mxu1 }
  0xfb   :  { %887 = vst [vmem:[%s2801_s4 + $0x78] sm:$0xff] %v2066_v23  ;;  %v2075_v41 = vpop.f32.mrb[15].mxu0  ;;  %2826 = vst [vmem:[#allocation10_spill] sm:$0xff] %v2147_v63  ;;  %v2159_v2 = vpop.f32.mrb[9].mxu1 }
  0xfc   :  { %886 = vst [vmem:[%s2801_s4 + $0x70] sm:$0xff] %v2075_v41  ;;  %v949_v43 = vadd.f32 %v948_v33, %v2075_v41  ;;  %913 = vst [vmem:[%s2801_s4 + $0x148] sm:$0xff] %v2147_v63 }
  0xfd   :  { %2827 = vst [vmem:[#allocation11_spill] sm:$0xff] %v2159_v2  ;;  %912 = vst [vmem:[%s2801_s4 + $0x140] sm:$0xff] %v2159_v2 }
  0xfe   :  { %v2092_v38 = vpop.f32.mrb[16].mxu0  ;;  %v950_v44 = vadd.f32 %v2066_v23, %v949_v43  ;;  %v2173_v4 = vpop.f32.mrb[10].mxu1 }
  0xff   :  { %889 = vst [vmem:[%s2801_s4 + $0x88] sm:$0xff] %v2092_v38  ;;  %v2101_v47 = vpop.f32.mrb[17].mxu0  ;;  %915 = vst [vmem:[%s2801_s4 + $0x158] sm:$0xff] %v2173_v4  ;;  %v2185_v48 = vpop.f32.mrb[11].mxu1 }
 0x100   :  { %888 = vst [vmem:[%s2801_s4 + $0x80] sm:$0xff] %v2101_v47  ;;  %v951_v50 = vadd.f32 %v950_v44, %v2101_v47  ;;  %2828 = vst [vmem:[#allocation12_spill] sm:$0xff] %v2185_v48 }
 0x101   :  { %914 = vst [vmem:[%s2801_s4 + $0x150] sm:$0xff] %v2185_v48 }
 0x102   :  { %v2118_v51 = vpop.f32.mrb[18].mxu0  ;;  %v952_v52 = vadd.f32 %v2092_v38, %v951_v50 }
 0x103   :  { %891 = vst [vmem:[%s2801_s4 + $0x98] sm:$0xff] %v2118_v51  ;;  %v2127_v55 = vpop.f32.mrb[19].mxu0 }
 0x104   :  { %890 = vst [vmem:[%s2801_s4 + $0x90] sm:$0xff] %v2127_v55  ;;  %v953_v57 = vadd.f32 %v952_v52, %v2127_v55 }
 0x106   :  { %v2144_v59 = vpop.f32.mrb[20].mxu0  ;;  %v954_v60 = vadd.f32 %v2118_v51, %v953_v57 }
 0x107   :  { %893 = vst [vmem:[%s2801_s4 + $0xa8] sm:$0xff] %v2144_v59  ;;  %v2153_v0 = vpop.f32.mrb[21].mxu0 }
 0x108   :  { %892 = vst [vmem:[%s2801_s4 + $0xa0] sm:$0xff] %v2153_v0  ;;  %v955_v3 = vadd.f32 %v954_v60, %v2153_v0 }
 0x109   :  { %v2199_v58 = vpop.f32.mrb[12].mxu1 }
 0x10a   :  { %v2170_v5 = vpop.f32.mrb[22].mxu0  ;;  %v956_v6 = vadd.f32 %v2144_v59, %v955_v3  ;;  %917 = vst [vmem:[%s2801_s4 + $0x168] sm:$0xff] %v2199_v58  ;;  %v2211_v7 = vpop.f32.mrb[13].mxu1 }
 0x10b   :  { %895 = vst [vmem:[%s2801_s4 + $0xb8] sm:$0xff] %v2170_v5  ;;  %v2179_v8 = vpop.f32.mrb[23].mxu0  ;;  %916 = vst [vmem:[%s2801_s4 + $0x160] sm:$0xff] %v2211_v7 }
 0x10c   :  { %894 = vst [vmem:[%s2801_s4 + $0xb0] sm:$0xff] %v2179_v8  ;;  %v957_v10 = vadd.f32 %v956_v6, %v2179_v8 }
 0x10d   :  { %v2225_v18 = vpop.f32.mrb[14].mxu1 }
 0x10e   :  { %v2196_v46 = vpop.f32.mrb[24].mxu0  ;;  %v958_v53 = vadd.f32 %v2170_v5, %v957_v10  ;;  %919 = vst [vmem:[%s2801_s4 + $0x178] sm:$0xff] %v2225_v18  ;;  %v2237_v24 = vpop.f32.mrb[15].mxu1 }
 0x10f   :  { %897 = vst [vmem:[%s2801_s4 + $0xc8] sm:$0xff] %v2196_v46  ;;  %v2205_v1 = vpop.f32.mrb[25].mxu0  ;;  %918 = vst [vmem:[%s2801_s4 + $0x170] sm:$0xff] %v2237_v24 }
 0x110   :  { %896 = vst [vmem:[%s2801_s4 + $0xc0] sm:$0xff] %v2205_v1  ;;  %v959_v9 = vadd.f32 %v958_v53, %v2205_v1 }
 0x111   :  { %v2251_v32 = vpop.f32.mrb[16].mxu1 }
 0x112   :  { %v2222_v13 = vpop.f32.mrb[26].mxu0  ;;  %v960_v16 = vadd.f32 %v2196_v46, %v959_v9  ;;  %921 = vst [vmem:[%s2801_s4 + $0x188] sm:$0xff] %v2251_v32  ;;  %v2263_v26 = vpop.f32.mrb[17].mxu1 }
 0x113   :  { %899 = vst [vmem:[%s2801_s4 + $0xd8] sm:$0xff] %v2222_v13  ;;  %v2231_v20 = vpop.f32.mrb[27].mxu0  ;;  %920 = vst [vmem:[%s2801_s4 + $0x180] sm:$0xff] %v2263_v26 }
 0x114   :  { %898 = vst [vmem:[%s2801_s4 + $0xd0] sm:$0xff] %v2231_v20  ;;  %v961_v28 = vadd.f32 %v960_v16, %v2231_v20 }
 0x115   :  { %v2277_v44 = vpop.f32.mrb[18].mxu1 }
 0x116   :  { %v2248_v61 = vpop.f32.mrb[28].mxu0  ;;  %v962_v30 = vadd.f32 %v2222_v13, %v961_v28  ;;  %923 = vst [vmem:[%s2801_s4 + $0x198] sm:$0xff] %v2277_v44  ;;  %v2289_v52 = vpop.f32.mrb[19].mxu1 }
 0x117   :  { %901 = vst [vmem:[%s2801_s4 + $0xe8] sm:$0xff] %v2248_v61  ;;  %v2257_v35 = vpop.f32.mrb[29].mxu0  ;;  %922 = vst [vmem:[%s2801_s4 + $0x190] sm:$0xff] %v2289_v52 }
 0x118   :  { %900 = vst [vmem:[%s2801_s4 + $0xe0] sm:$0xff] %v2257_v35  ;;  %v963_v62 = vadd.f32 %v962_v30, %v2257_v35 }
 0x119   :  { %v2301_v3 = vpop.f32.mrb[20].mxu1 }
 0x11a   :  { %v2274_v33 = vpop.f32.mrb[30].mxu0  ;;  %v964_v43 = vadd.f32 %v2248_v61, %v963_v62  ;;  %2829 = vst [vmem:[#allocation13_spill] sm:$0xff] %v2301_v3  ;;  %925 = vst [vmem:[%s2801_s4 + $0x1a8] sm:$0xff] %v2301_v3  ;;  %v2307_v6 = vpop.f32.mrb[21].mxu1 }
 0x11b   :  { %903 = vst [vmem:[%s2801_s4 + $0xf8] sm:$0xff] %v2274_v33  ;;  %v2283_v50 = vpop.f32.mrb[31].mxu0  ;;  %924 = vst [vmem:[%s2801_s4 + $0x1a0] sm:$0xff] %v2307_v6 }
 0x11c   :  { %902 = vst [vmem:[%s2801_s4 + $0xf0] sm:$0xff] %v2283_v50  ;;  %v965_v57 = vadd.f32 %v964_v43, %v2283_v50 }
 0x11d   :  { %v2315_v9 = vpop.f32.mrb[22].mxu1 }
 0x11e   :  { %v966_v60 = vadd.f32 %v2274_v33, %v965_v57  ;;  %2830 = vst [vmem:[#allocation14_spill] sm:$0xff] %v2315_v9  ;;  %927 = vst [vmem:[%s2801_s4 + $0x1b8] sm:$0xff] %v2315_v9  ;;  %v2321_v16 = vpop.f32.mrb[23].mxu1 }
 0x11f   :  { %2831 = vst [vmem:[#allocation15_spill] sm:$0xff] %v2321_v16  ;;  %926 = vst [vmem:[%s2801_s4 + $0x1b0] sm:$0xff] %v2321_v16 }
 0x120   :  { %v967_v10 = vadd.f32 %v966_v60, %v2055_v39 }
 0x121   :  { %v2329_v62 = vpop.f32.mrb[24].mxu1 }
 0x122   :  { %v968_v53 = vadd.f32 %v2043_v37, %v967_v10  ;;  %929 = vst [vmem:[%s2801_s4 + $0x1c8] sm:$0xff] %v2329_v62  ;;  %v2335_v43 = vpop.f32.mrb[25].mxu1 }
 0x123   :  { %2832 = vst [vmem:[#allocation16_spill] sm:$0xff] %v2335_v43  ;;  %928 = vst [vmem:[%s2801_s4 + $0x1c0] sm:$0xff] %v2335_v43 }
 0x124   :  { %v969_v28 = vadd.f32 %v968_v53, %v2081_v42 }
 0x125   :  { %v2343_v10 = vpop.f32.mrb[26].mxu1 }
 0x126   :  { %v970_v30 = vadd.f32 %v2069_v40, %v969_v28  ;;  %931 = vst [vmem:[%s2801_s4 + $0x1d8] sm:$0xff] %v2343_v10  ;;  %v2349_v53 = vpop.f32.mrb[27].mxu1 }
 0x127   :  { %930 = vst [vmem:[%s2801_s4 + $0x1d0] sm:$0xff] %v2349_v53 }
 0x128   :  { %v971_v57 = vadd.f32 %v970_v30, %v2107_v49 }
 0x129   :  { %v2357_v49 = vpop.f32.mrb[28].mxu1 }
 0x12a   :  { %v972_v60 = vadd.f32 %v2095_v45, %v971_v57  ;;  %933 = vst [vmem:[%s2801_s4 + $0x1e8] sm:$0xff] %v2357_v49  ;;  %v2363_v57 = vpop.f32.mrb[29].mxu1 }
 0x12b   :  { %932 = vst [vmem:[%s2801_s4 + $0x1e0] sm:$0xff] %v2363_v57 }
 0x12c   :  { %v973_v28 = vadd.f32 %v972_v60, %v2133_v56 }
 0x12d   :  { %v2371_v56 = vpop.f32.mrb[30].mxu1 }
 0x12e   :  { %v974_v30 = vadd.f32 %v2121_v54, %v973_v28  ;;  %935 = vst [vmem:[%s2801_s4 + $0x1f8] sm:$0xff] %v2371_v56  ;;  %v2377_v28 = vpop.f32.mrb[31].mxu1 }
 0x12f   :  { %934 = vst [vmem:[%s2801_s4 + $0x1f0] sm:$0xff] %v2377_v28 }
 0x130   :  { %v975_v45 = vadd.f32 %v974_v30, %v2159_v2 }
 0x132   :  { %v976_v60 = vadd.f32 %v2147_v63, %v975_v45 }
 0x134   :  { %v977_v54 = vadd.f32 %v976_v60, %v2185_v48 }
 0x136   :  { %v978_v30 = vadd.f32 %v2173_v4, %v977_v54 }
 0x138   :  { %v979_v45 = vadd.f32 %v978_v30, %v2211_v7 }
 0x13a   :  { %v980_v63 = vadd.f32 %v2199_v58, %v979_v45 }
 0x13c   :  { %v981_v2 = vadd.f32 %v980_v63, %v2237_v24 }
 0x13e   :  { %v982_v40 = vadd.f32 %v2225_v18, %v981_v2 }
 0x140   :  { %v983_v42 = vadd.f32 %v982_v40, %v2263_v26 }
 0x142   :  { %v984_v37 = vadd.f32 %v2251_v32, %v983_v42 }
 0x144   :  { %v985_v60 = vadd.f32 %v984_v37, %v2289_v52 }
 0x146   :  { %v986_v48 = vadd.f32 %v2277_v44, %v985_v60 }
 0x148   :  { %v987_v39 = vadd.f32 %v986_v48, %v2307_v6 }
 0x14a   :  { %v988_v54 = vadd.f32 %v2301_v3, %v987_v39 }
 0x14c   :  { %v989_v30 = vadd.f32 %v988_v54, %v2321_v16 }
 0x14e   :  { %v990_v45 = vadd.f32 %v2315_v9, %v989_v30 }
 0x150   :  { %v991_v63 = vadd.f32 %v990_v45, %v2335_v43 }
 0x152   :  { %v992_v2 = vadd.f32 %v2329_v62, %v991_v63 }
 0x154   :  { %v993_v40 = vadd.f32 %v992_v2, %v2349_v53 }
 0x156   :  { %v994_v42 = vadd.f32 %v2343_v10, %v993_v40  ;;  %v2833_v40 = vld [vmem:[#allocation3_spill] sm:$0xff] }
 0x158   :  { %v995_v37 = vadd.f32 %v994_v42, %v2363_v57  ;;  %v2834_v42 = vld [vmem:[#allocation2_spill] sm:$0xff] }
 0x15a   :  { %v996_v60 = vadd.f32 %v2357_v49, %v995_v37  ;;  %v2835_v37 = vld [vmem:[#allocation5_spill] sm:$0xff] }
 0x15c   :  { %v997_v48 = vadd.f32 %v996_v60, %v2377_v28  ;;  %v2836_v60 = vld [vmem:[#allocation4_spill] sm:$0xff] }
 0x15e   :  { %v998_v39 = vadd.f32 %v2371_v56, %v997_v48  ;;  %v2838_v48 = vld [vmem:[#allocation7_spill] sm:$0xff] }
 0x160   :  { %v999_v3 = vrot.slane %v998_v39, 4 }
 0x162   :  { %v1000_v54 = vadd.f32 %v999_v3, %v998_v39  ;;  %v2840_v39 = vld [vmem:[#allocation6_spill] sm:$0xff] }
 0x164   :  { %v1001_v16 = vrot.slane %v1000_v54, 2 }
 0x166   :  { %v1002_v30 = vadd.f32 %v1001_v16, %v1000_v54 }
 0x168   :  { %v1003_v9 = vrot.slane %v1002_v30, 1 }
 0x16a   :  { %v1004_v45 = vadd.f32 %v1003_v9, %v1002_v30  ;;  %v2841_v30 = vld [vmem:[#allocation9_spill] sm:$0xff] }
 0x16c   :  { %v2405_v43 = vmul.f32 0.001953125, %v1004_v45  ;;  %1070 = vst [vmem:[%s2802_s5] sm:$0x1] %v1004_v45 }
 0x16e   :  { %v2412_v63 = vsub.f32 %v1963_v12, %v2405_v43  ;;  %v2416_v2 = vsub.f32 %v1957_v11, %v2405_v43  ;;  %v2420_v3 = vsub.f32 %v1977_v15, %v2405_v43  ;;  %v2424_v9 = vsub.f32 %v1971_v14, %v2405_v43 }
 0x16f   :  { %v2428_v16 = vsub.f32 %v1991_v19, %v2405_v43  ;;  %v2432_v12 = vsub.f32 %v1984_v17, %v2405_v43  ;;  %v2436_v11 = vsub.f32 %v2005_v25, %v2405_v43  ;;  %v2440_v15 = vsub.f32 %v1998_v21, %v2405_v43 }
 0x170   :  { %v2444_v14 = vsub.f32 %v2019_v22, %v2405_v43  ;;  %v2448_v19 = vsub.f32 %v2012_v29, %v2405_v43  ;;  %v2452_v17 = vsub.f32 %v2033_v34, %v2405_v43  ;;  %v2456_v25 = vsub.f32 %v2026_v31, %v2405_v43 }
 0x171   :  { %v2460_v21 = vsub.f32 %v2049_v27, %v2405_v43  ;;  %v2464_v22 = vsub.f32 %v2040_v36, %v2405_v43  ;;  %v2468_v29 = vsub.f32 %v2075_v41, %v2405_v43  ;;  %v2472_v34 = vsub.f32 %v2066_v23, %v2405_v43 }
 0x172   :  { %v2476_v31 = vsub.f32 %v2101_v47, %v2405_v43  ;;  %v2480_v27 = vsub.f32 %v2092_v38, %v2405_v43  ;;  %v2484_v36 = vsub.f32 %v2127_v55, %v2405_v43  ;;  %v2488_v41 = vsub.f32 %v2118_v51, %v2405_v43 }
 0x173   :  { %v2492_v23 = vsub.f32 %v2153_v0, %v2405_v43  ;;  %v2496_v47 = vsub.f32 %v2144_v59, %v2405_v43  ;;  %v2500_v38 = vsub.f32 %v2179_v8, %v2405_v43  ;;  %v2504_v55 = vsub.f32 %v2170_v5, %v2405_v43 }
 0x174   :  { %v2508_v51 = vsub.f32 %v2205_v1, %v2405_v43  ;;  %v2512_v0 = vsub.f32 %v2196_v46, %v2405_v43  ;;  %v2516_v59 = vsub.f32 %v2231_v20, %v2405_v43  ;;  %v2520_v8 = vsub.f32 %v2222_v13, %v2405_v43 }
 0x175   :  { %v2524_v5 = vsub.f32 %v2257_v35, %v2405_v43  ;;  %v2528_v1 = vsub.f32 %v2248_v61, %v2405_v43  ;;  %v2532_v46 = vsub.f32 %v2283_v50, %v2405_v43  ;;  %v2536_v20 = vsub.f32 %v2274_v33, %v2405_v43 }
 0x176   :  { %v2540_v13 = vsub.f32 %v2833_v40, %v2405_v43  ;;  %v2544_v35 = vsub.f32 %v2834_v42, %v2405_v43  ;;  %v2548_v61 = vsub.f32 %v2835_v37, %v2405_v43  ;;  %v2552_v50 = vsub.f32 %v2836_v60, %v2405_v43  ;;  %v2842_v40 = vld [vmem:[#allocation8_spill] sm:$0xff]  ;;  %v2843_v37 = vld [vmem:[#allocation11_spill] sm:$0xff] }
 0x177   :  { %v2556_v33 = vsub.f32 %v2838_v48, %v2405_v43  ;;  %v2560_v54 = vsub.f32 %v2840_v39, %v2405_v43  ;;  %v2564_v45 = vsub.f32 %v2841_v30, %v2405_v43  ;;  %v2568_v42 = vsub.f32 %v2842_v40, %v2405_v43 }
 0x178   :  { %2837 = vst [vmem:[#allocation3_spill] sm:$0xff] %v2552_v50  ;;  %v2572_v60 = vsub.f32 %v2843_v37, %v2405_v43  ;;  %v2844_v50 = vld [vmem:[#allocation10_spill] sm:$0xff]  ;;  %v2584_v30 = vsub.f32 %v2173_v4, %v2405_v43  ;;  %v2588_v40 = vsub.f32 %v2211_v7, %v2405_v43  ;;  %v2592_v37 = vsub.f32 %v2199_v58, %v2405_v43 }
 0x179   :  { %2839 = vst [vmem:[#allocation2_spill] sm:$0xff] %v2556_v33  ;;  %v2576_v48 = vsub.f32 %v2844_v50, %v2405_v43  ;;  %v2845_v33 = vld [vmem:[#allocation12_spill] sm:$0xff]  ;;  %v2596_v50 = vsub.f32 %v2237_v24, %v2405_v43  ;;  %v2604_v4 = vsub.f32 %v2263_v26, %v2405_v43  ;;  %v2608_v7 = vsub.f32 %v2251_v32, %v2405_v43 }
 0x17a   :  { %v2580_v39 = vsub.f32 %v2845_v33, %v2405_v43  ;;  %v2600_v33 = vsub.f32 %v2225_v18, %v2405_v43  ;;  %v2612_v58 = vsub.f32 %v2289_v52, %v2405_v43  ;;  %v2616_v24 = vsub.f32 %v2277_v44, %v2405_v43 }
 0x17b   :  { %2847 = vst [vmem:[#allocation4_spill] sm:$0xff] %v2604_v4  ;;  %2848 = vst [vmem:[#allocation7_spill] sm:$0xff] %v2608_v7  ;;  %v2620_v18 = vsub.f32 %v2307_v6, %v2405_v43  ;;  %v2851_v4 = vld [vmem:[#allocation15_spill] sm:$0xff]  ;;  %v2852_v7 = vld [vmem:[#allocation14_spill] sm:$0xff]  ;;  %v2640_v6 = vsub.f32 %v2329_v62, %v2405_v43  ;;  %v2660_v62 = vsub.f32 %v2377_v28, %v2405_v43 }
 0x17c   :  { %2846 = vst [vmem:[#allocation5_spill] sm:$0xff] %v2600_v33  ;;  %2849 = vst [vmem:[#allocation6_spill] sm:$0xff] %v2612_v58  ;;  %v2850_v33 = vld [vmem:[#allocation13_spill] sm:$0xff]  ;;  %v2628_v32 = vsub.f32 %v2851_v4, %v2405_v43  ;;  %v2632_v52 = vsub.f32 %v2852_v7, %v2405_v43  ;;  %v2853_v58 = vld [vmem:[#allocation16_spill] sm:$0xff]  ;;  %v2648_v4 = vsub.f32 %v2343_v10, %v2405_v43 }
 0x17d   :  { %v2624_v26 = vsub.f32 %v2850_v33, %v2405_v43  ;;  %v2636_v44 = vsub.f32 %v2853_v58, %v2405_v43  ;;  %v2644_v33 = vsub.f32 %v2349_v53, %v2405_v43  ;;  %v2652_v7 = vsub.f32 %v2363_v57, %v2405_v43  ;;  %2857 = vst [vmem:[#allocation10_spill] sm:$0xff] %v2660_v62 }
 0x17e   :  { %2854 = vst [vmem:[#allocation9_spill] sm:$0xff] %v2648_v4  ;;  %v2656_v58 = vsub.f32 %v2357_v49, %v2405_v43  ;;  %v2664_v53 = vsub.f32 %v2371_v56, %v2405_v43  ;;  %v1071_v10 = vmul.f32 %v2412_v63, %v2412_v63  ;;  %v1072_v4 = vmul.f32 %v2416_v2, %v2416_v2 }
 0x17f   :  { %2855 = vst [vmem:[#allocation8_spill] sm:$0xff] %v2652_v7  ;;  %v1073_v57 = vmul.f32 %v2420_v3, %v2420_v3  ;;  %v1074_v49 = vmul.f32 %v2424_v9, %v2424_v9  ;;  %v1075_v28 = vmul.f32 %v2428_v16, %v2428_v16  ;;  %v1076_v56 = vmul.f32 %v2432_v12, %v2432_v12 }
 0x180   :  { %2856 = vst [vmem:[#allocation11_spill] sm:$0xff] %v2656_v58  ;;  %v1135_v7 = vadd.f32 %v1072_v4, %v1071_v10  ;;  %v1077_v63 = vmul.f32 %v2436_v11, %v2436_v11  ;;  %v1078_v3 = vmul.f32 %v2440_v15, %v2440_v15  ;;  %v1079_v9 = vmul.f32 %v2444_v14, %v2444_v14 }
 0x181   :  { %v1080_v16 = vmul.f32 %v2448_v19, %v2448_v19  ;;  %v1081_v12 = vmul.f32 %v2452_v17, %v2452_v17  ;;  %v1082_v11 = vmul.f32 %v2456_v25, %v2456_v25  ;;  %v1083_v15 = vmul.f32 %v2460_v21, %v2460_v21 }
 0x182   :  { %v1136_v58 = vadd.f32 %v1135_v7, %v1073_v57  ;;  %v1084_v14 = vmul.f32 %v2464_v22, %v2464_v22  ;;  %v1085_v19 = vmul.f32 %v2468_v29, %v2468_v29  ;;  %v1086_v17 = vmul.f32 %v2472_v34, %v2472_v34 }
 0x183   :  { %v1087_v25 = vmul.f32 %v2476_v31, %v2476_v31  ;;  %v1088_v21 = vmul.f32 %v2480_v27, %v2480_v27  ;;  %v1089_v22 = vmul.f32 %v2484_v36, %v2484_v36  ;;  %v1090_v29 = vmul.f32 %v2488_v41, %v2488_v41 }
 0x184   :  { %v1137_v62 = vadd.f32 %v1136_v58, %v1074_v49  ;;  %v1091_v34 = vmul.f32 %v2492_v23, %v2492_v23  ;;  %v1092_v31 = vmul.f32 %v2496_v47, %v2496_v47  ;;  %v1093_v27 = vmul.f32 %v2500_v38, %v2500_v38 }
 0x185   :  { %v1094_v36 = vmul.f32 %v2504_v55, %v2504_v55  ;;  %v1095_v41 = vmul.f32 %v2508_v51, %v2508_v51  ;;  %v1096_v23 = vmul.f32 %v2512_v0, %v2512_v0  ;;  %v1097_v47 = vmul.f32 %v2516_v59, %v2516_v59 }
 0x186   :  { %v1138_v43 = vadd.f32 %v1137_v62, %v1075_v28  ;;  %v1098_v38 = vmul.f32 %v2520_v8, %v2520_v8  ;;  %v1099_v55 = vmul.f32 %v2524_v5, %v2524_v5  ;;  %v1100_v51 = vmul.f32 %v2528_v1, %v2528_v1 }
 0x187   :  { %v1101_v0 = vmul.f32 %v2532_v46, %v2532_v46  ;;  %v1102_v59 = vmul.f32 %v2536_v20, %v2536_v20  ;;  %v1103_v8 = vmul.f32 %v2540_v13, %v2540_v13  ;;  %v1104_v5 = vmul.f32 %v2544_v35, %v2544_v35 }
 0x188   :  { %v1139_v2 = vadd.f32 %v1138_v43, %v1076_v56  ;;  %v1105_v1 = vmul.f32 %v2548_v61, %v2548_v61  ;;  %v1108_v13 = vmul.f32 %v2560_v54, %v2560_v54  ;;  %v1109_v35 = vmul.f32 %v2564_v45, %v2564_v45 }
 0x189   :  { %v1110_v61 = vmul.f32 %v2568_v42, %v2568_v42  ;;  %v1113_v54 = vmul.f32 %v2580_v39, %v2580_v39  ;;  %v1114_v45 = vmul.f32 %v2584_v30, %v2584_v30  ;;  %v1115_v42 = vmul.f32 %v2588_v40, %v2588_v40 }
 0x18a   :  { %v1140_v4 = vadd.f32 %v1139_v2, %v1077_v63 }
 0x18c   :  { %v1141_v7 = vadd.f32 %v1140_v4, %v1078_v3 }
 0x18e   :  { %v1142_v58 = vadd.f32 %v1141_v7, %v1079_v9 }
 0x190   :  { %v1143_v62 = vadd.f32 %v1142_v58, %v1080_v16 }
 0x192   :  { %v1144_v10 = vadd.f32 %v1143_v62, %v1081_v12 }
 0x194   :  { %v1145_v57 = vadd.f32 %v1144_v10, %v1082_v11 }
 0x196   :  { %v1146_v49 = vadd.f32 %v1145_v57, %v1083_v15 }
 0x198   :  { %v1147_v28 = vadd.f32 %v1146_v49, %v1084_v14 }
 0x19a   :  { %v1148_v56 = vadd.f32 %v1147_v28, %v1085_v19 }
 0x19c   :  { %v1149_v43 = vadd.f32 %v1148_v56, %v1086_v17  ;;  %v2858_v17 = vld [vmem:[#allocation3_spill] sm:$0xff] }
 0x19d   :  { %v1106_v46 = vmul.f32 %v2858_v17, %v2858_v17  ;;  %v2866_v17 = vld [vmem:[#allocation11_spill] sm:$0xff] }
 0x19e   :  { %v1150_v63 = vadd.f32 %v1149_v43, %v1087_v25  ;;  %v2859_v25 = vld [vmem:[#allocation2_spill] sm:$0xff] }
 0x19f   :  { %v1107_v20 = vmul.f32 %v2859_v25, %v2859_v25 }
 0x1a0   :  { %v1151_v2 = vadd.f32 %v1150_v63, %v1088_v21 }
 0x1a2   :  { %v1152_v3 = vadd.f32 %v1151_v2, %v1089_v22  ;;  %v1111_v2 = vmul.f32 %v2572_v60, %v2572_v60  ;;  %v1116_v60 = vmul.f32 %v2592_v37, %v2592_v37 }
 0x1a4   :  { %v1153_v4 = vadd.f32 %v1152_v3, %v1090_v29  ;;  %v1112_v3 = vmul.f32 %v2576_v48, %v2576_v48  ;;  %v1117_v48 = vmul.f32 %v2596_v50, %v2596_v50  ;;  %v1122_v50 = vmul.f32 %v2616_v24, %v2616_v24 }
 0x1a5   :  { %v1127_v24 = vmul.f32 %v2636_v44, %v2636_v44  ;;  %v1132_v44 = vmul.f32 %v2866_v17, %v2866_v17 }
 0x1a6   :  { %v1154_v9 = vadd.f32 %v1153_v4, %v1091_v34 }
 0x1a8   :  { %v1155_v7 = vadd.f32 %v1154_v9, %v1092_v31 }
 0x1aa   :  { %v1156_v16 = vadd.f32 %v1155_v7, %v1093_v27 }
 0x1ac   :  { %v1157_v58 = vadd.f32 %v1156_v16, %v1094_v36  ;;  %v2860_v36 = vld [vmem:[#allocation5_spill] sm:$0xff] }
 0x1ad   :  { %v1118_v39 = vmul.f32 %v2860_v36, %v2860_v36 }
 0x1ae   :  { %v1158_v12 = vadd.f32 %v1157_v58, %v1095_v41  ;;  %v2861_v41 = vld [vmem:[#allocation4_spill] sm:$0xff] }
 0x1af   :  { %v1119_v30 = vmul.f32 %v2861_v41, %v2861_v41 }
 0x1b0   :  { %v1159_v62 = vadd.f32 %v1158_v12, %v1096_v23  ;;  %v2862_v23 = vld [vmem:[#allocation7_spill] sm:$0xff] }
 0x1b1   :  { %v1120_v40 = vmul.f32 %v2862_v23, %v2862_v23 }
 0x1b2   :  { %v1160_v11 = vadd.f32 %v1159_v62, %v1097_v47  ;;  %v2863_v47 = vld [vmem:[#allocation6_spill] sm:$0xff] }
 0x1b3   :  { %v1121_v37 = vmul.f32 %v2863_v47, %v2863_v47 }
 0x1b4   :  { %v1161_v10 = vadd.f32 %v1160_v11, %v1098_v38  ;;  %v1123_v11 = vmul.f32 %v2620_v18, %v2620_v18  ;;  %v1128_v18 = vmul.f32 %v2640_v6, %v2640_v6 }
 0x1b6   :  { %v1162_v15 = vadd.f32 %v1161_v10, %v1099_v55  ;;  %v1124_v10 = vmul.f32 %v2624_v26, %v2624_v26  ;;  %v1129_v26 = vmul.f32 %v2644_v33, %v2644_v33  ;;  %v1134_v33 = vmul.f32 %v2664_v53, %v2664_v53 }
 0x1b8   :  { %v1163_v57 = vadd.f32 %v1162_v15, %v1100_v51  ;;  %v1125_v15 = vmul.f32 %v2628_v32, %v2628_v32 }
 0x1ba   :  { %v1164_v14 = vadd.f32 %v1163_v57, %v1101_v0  ;;  %v1126_v57 = vmul.f32 %v2632_v52, %v2632_v52 }
 0x1bc   :  { %v1165_v49 = vadd.f32 %v1164_v14, %v1102_v59 }
 0x1be   :  { %v1166_v19 = vadd.f32 %v1165_v49, %v1103_v8 }
 0x1c0   :  { %v1167_v28 = vadd.f32 %v1166_v19, %v1104_v5  ;;  %v2864_v5 = vld [vmem:[#allocation9_spill] sm:$0xff] }
 0x1c1   :  { %v1130_v32 = vmul.f32 %v2864_v5, %v2864_v5 }
 0x1c2   :  { %v1168_v56 = vadd.f32 %v1167_v28, %v1105_v1  ;;  %v2865_v1 = vld [vmem:[#allocation8_spill] sm:$0xff] }
 0x1c3   :  { %v1131_v52 = vmul.f32 %v2865_v1, %v2865_v1 }
 0x1c4   :  { %v1169_v43 = vadd.f32 %v1168_v56, %v1106_v46  ;;  %v2867_v56 = vld [vmem:[#allocation10_spill] sm:$0xff] }
 0x1c5   :  { %v1133_v6 = vmul.f32 %v2867_v56, %v2867_v56 }
 0x1c6   :  { %v1170_v21 = vadd.f32 %v1169_v43, %v1107_v20 }
 0x1c8   :  { %v1171_v63 = vadd.f32 %v1170_v21, %v1108_v13 }
 0x1ca   :  { %v1172_v22 = vadd.f32 %v1171_v63, %v1109_v35 }
 0x1cc   :  { %v1173_v29 = vadd.f32 %v1172_v22, %v1110_v61 }
 0x1ce   :  { %v1174_v34 = vadd.f32 %v1173_v29, %v1111_v2 }
 0x1d0   :  { %v1175_v4 = vadd.f32 %v1174_v34, %v1112_v3 }
 0x1d2   :  { %v1176_v31 = vadd.f32 %v1175_v4, %v1113_v54 }
 0x1d4   :  { %v1177_v9 = vadd.f32 %v1176_v31, %v1114_v45 }
 0x1d6   :  { %v1178_v27 = vadd.f32 %v1177_v9, %v1115_v42 }
 0x1d8   :  { %v1179_v7 = vadd.f32 %v1178_v27, %v1116_v60 }
 0x1da   :  { %v1180_v16 = vadd.f32 %v1179_v7, %v1117_v48 }
 0x1dc   :  { %v1181_v58 = vadd.f32 %v1180_v16, %v1118_v39 }
 0x1de   :  { %v1182_v12 = vadd.f32 %v1181_v58, %v1119_v30 }
 0x1e0   :  { %v1183_v62 = vadd.f32 %v1182_v12, %v1120_v40 }
 0x1e2   :  { %v1184_v38 = vadd.f32 %v1183_v62, %v1121_v37 }
 0x1e4   :  { %v1185_v55 = vadd.f32 %v1184_v38, %v1122_v50 }
 0x1e6   :  { %v1186_v51 = vadd.f32 %v1185_v55, %v1123_v11 }
 0x1e8   :  { %v1187_v0 = vadd.f32 %v1186_v51, %v1124_v10 }
 0x1ea   :  { %v1188_v59 = vadd.f32 %v1187_v0, %v1125_v15 }
 0x1ec   :  { %v1189_v14 = vadd.f32 %v1188_v59, %v1126_v57 }
 0x1ee   :  { %v1190_v8 = vadd.f32 %v1189_v14, %v1127_v24 }
 0x1f0   :  { %v1191_v49 = vadd.f32 %v1190_v8, %v1128_v18 }
 0x1f2   :  { %v1192_v19 = vadd.f32 %v1191_v49, %v1129_v26 }
 0x1f4   :  { %v1193_v28 = vadd.f32 %v1192_v19, %v1130_v32 }
 0x1f6   :  { %v1194_v46 = vadd.f32 %v1193_v28, %v1131_v52 }
 0x1f8   :  { %v1195_v25 = vadd.f32 %v1194_v46, %v1132_v44 }
 0x1fa   :  { %v1196_v20 = vadd.f32 %v1195_v25, %v1133_v6 }
 0x1fc   :  { %v1197_v43 = vadd.f32 %v1196_v20, %v1134_v33 }
 0x1fe   :  { %v1198_v13 = vrot.slane %v1197_v43, 4 }
 0x200   :  { %v1199_v21 = vadd.f32 %v1198_v13, %v1197_v43 }
 0x202   :  { %v1200_v35 = vrot.slane %v1199_v21, 2 }
 0x204   :  { %v1201_v63 = vadd.f32 %v1200_v35, %v1199_v21 }
 0x206   :  { %v1202_v61 = vrot.slane %v1201_v63, 1 }
 0x208   :  { %v1203_v22 = vadd.f32 %v1202_v61, %v1201_v63 }
 0x20a   :  { %1204 = vst [vmem:[%s2802_s5 + $0x1] sm:$0x1] %v1203_v22 }

// kernel: _lambda_.3
= control target key start
LH: loop header
LB: loop body
LE: loop exit
PB: predicated region body
PF: predicated region fallthrough
CT: control target
= control target key end

     0   :  { %v19_v0 = vlaneseq  ;;  %vm3540_vm2 = vmmov 1   ;;  %v5690_v28 = vmov 0  ;;  %v3542_v48 = vmov 0.0   ;;  %s5532_s0 = inlined_call_operand.vmem [shape: f32[2,16,16,128], index: 0, kind: input, shape index: {}]   ;;  %s5533_s1 = inlined_call_operand.vmem [shape: f32[1,128], index: 1, kind: input, shape index: {}]   ;;  %s5534_s2 = inlined_call_operand.vmem [shape: f32[1,128], index: 2, kind: input, shape index: {}]   ;;  %s5535_s3 = inlined_call_operand.vmem [shape: f32[3,8,384], index: 3, kind: input, shape index: {}]   ;;  %s5536_s4 = inlined_call_operand.vmem [shape: f32[2,8,256], index: 4, kind: output, shape index: {}]  }
   0x1   :  { %v3571_v1 = vld [vmem:[%s5533_s1] ss:$0 sm:$0xff]  ;;  %v51_v4 = vld [vmem:[%s5532_s0 + $0x8] sm:$0xff]  ;;  %v52_v12 = vld [vmem:[%s5532_s0 + $0x10] sm:$0xff] }
   0x2   :  { %v3576_v2 = vld [vmem:[%s5534_s2] ss:$0 sm:$0xff]  ;;  %v2390_v7 = vld [vmem:[%s5532_s0 + $0x108] sm:$0xff]  ;;  %v3591_v8 = vshrl.u32 %v19_v0, 7  ;;  %v65_v9 = vmul.f32 %v3571_v1, %v51_v4  ;;  %v53_v13 = vld [vmem:[%s5532_s0 + $0x18] sm:$0xff]  ;;  %v66_v20 = vmul.f32 %v3571_v1, %v52_v12 }
   0x3   :  { %v50_v3 = vld [vmem:[%s5532_s0] sm:$0xff]  ;;  %v1224_v11 = vmul.f32 %v2390_v7, %v3571_v1  ;;  %v2391_v14 = vld [vmem:[%s5532_s0 + $0x110] sm:$0xff]  ;;  %v2392_v21 = vld [vmem:[%s5532_s0 + $0x118] sm:$0xff]  ;;  %v67_v23 = vmul.f32 %v3571_v1, %v53_v13 }
   0x4   :  { %v64_v5 = vmul.f32 %v3571_v1, %v50_v3  ;;  %v2389_v6 = vld [vmem:[%s5532_s0 + $0x100] sm:$0xff]  ;;  %v21_v16 = vadd.s32 8, %v3591_v8  ;;  %vm22_vm0 = vcmp.ge.s32.totalorder %v3591_v8, 1  ;;  %v79_v17 = vadd.f32 %v3576_v2, %v65_v9  ;;  %v55_v51 = vld [vmem:[%s5532_s0 + $0x28] sm:$0xff]  ;;  %v56_v9 = vld [vmem:[%s5532_s0 + $0x30] sm:$0xff] }
   0x5   :  { %v1223_v10 = vmul.f32 %v2389_v6, %v3571_v1  ;;  %v1232_v19 = vadd.f32 %v3576_v2, %v1224_v11  ;;  %v1225_v24 = vmul.f32 %v2391_v14, %v3571_v1  ;;  %v80_v29 = vadd.f32 %v3576_v2, %v66_v20  ;;  %v54_v45 = vld [vmem:[%s5532_s0 + $0x20] sm:$0xff]  ;;  %vm3667_vm5 = vmpackc.low %vm3540_vm2, %vm22_vm0  ;;  %v2394_v0 = vld [vmem:[%s5532_s0 + $0x128] sm:$0xff] }
   0x6   :  { %v78_v15 = vadd.f32 %v3576_v2, %v64_v5  ;;  %vm25_vm1 = vcmp.le.s32.totalorder %v21_v16, 14  ;;  %v3619_v25 = vmax.f32 %v79_v17, 0.0  ;;  %vm102_vm4 = vcmp.lt.s32.totalorder %v3591_v8, 1  ;;  %v2393_v52 = vld [vmem:[%s5532_s0 + $0x120] sm:$0xff] }
   0x7   :  { %v1231_v18 = vadd.f32 %v3576_v2, %v1223_v10  ;;  %v3623_v27 = vmax.f32 %v1232_v19, 0.0  ;;  %vm3626_vm3 = vmpackc.low %vm25_vm1, %vm3540_vm2  ;;  %v81_v31 = vadd.f32 %v3576_v2, %v67_v23  ;;  %v1226_v32 = vmul.f32 %v2392_v21, %v3571_v1 }
   0x8   :  { %v3615_v22 = vmax.f32 %v78_v15, 0.0  ;;  %v5691_v28 = vsel %vm3626_vm3, 4294967295, %v5690_v28  ;;  %v98_v38 = vrot.slane %v3619_v25, 7  ;;  %v3650_v41 = vmax.f32 %v80_v29, 0.0 }
   0x9   :  { %v3621_v26 = vmax.f32 %v1231_v18, 0.0  ;;  %5692 = vst [vmem:[#allocation3_spill] sm:$0xff] %v5691_v28  ;;  %v1251_v40 = vrot.slane %v3623_v27, 7  ;;  %v3652_v42 = vmax.f32 %v81_v31, 0.0  ;;  %v1233_v43 = vadd.f32 %v3576_v2, %v1225_v24  ;;  %v57_v18 = vld [vmem:[%s5532_s0 + $0x38] sm:$0xff] }
   0xa   :  { %v94_v30 = vrot.slane %v3615_v22, 7  ;;  %v3639_v35 = vpack.c.bf16 %v3619_v25, %v3615_v22  ;;  %v1234_v44 = vadd.f32 %v3576_v2, %v1226_v32  ;;  %v95_v60 = vrot.slane %v3650_v41, 7 }
   0xb   :  { %v3644_v37 = vpack.c.bf16 %v3623_v27, %v3621_v26  ;;  %v1247_v39 = vrot.slane %v3621_v26, 7  ;;  %v3689_v57 = vpack.c.bf16 %v3652_v42, %v3650_v41  ;;  %v3691_v58 = vmax.f32 %v1233_v43, 0.0  ;;  %v2395_v43 = vld [vmem:[%s5532_s0 + $0x130] sm:$0xff] }
   0xc   :  { %5693 = vst [vmem:[#allocation4_spill] sm:$0xff] %v3639_v35  ;;  %2744 = vmatprep.subr.bf16.mxu0 %v3639_v35  ;;  %v103_v46 = vsel %vm102_vm4, %v94_v30, %v98_v38  ;;  %v107_v47 = vsel %vm102_vm4, %v98_v38, %v94_v30  ;;  %v3693_v59 = vmax.f32 %v1234_v44, 0.0  ;;  %v99_v61 = vrot.slane %v3652_v42, 7 }
   0xd   :  { %5694 = vst [vmem:[#allocation5_spill] sm:$0xff] %v3644_v37  ;;  %3130 = vmatprep.subr.bf16.mxu1 %v3644_v37  ;;  %v1255_v49 = vsel %vm102_vm4, %v1247_v39, %v1251_v40  ;;  %v1259_v50 = vsel %vm102_vm4, %v1251_v40, %v1247_v39  ;;  %v3682_v54 = vpack.c.bf16 %v103_v46, %v107_v47  ;;  %5699 = vst [vmem:[#allocation8_spill] sm:$0xff] %v3689_v57 }
   0xe   :  { %v3684_v55 = vpack.c.bf16 %v1255_v49, %v1259_v50  ;;  %v68_v62 = vmul.f32 %v3571_v1, %v54_v45  ;;  %v69_v63 = vmul.f32 %v3571_v1, %v55_v51  ;;  %v1227_v3 = vmul.f32 %v2393_v52, %v3571_v1 }
   0xf   :  { %5697 = vst [vmem:[#allocation6_spill] sm:$0xff] %v3682_v54  ;;  %2747 = vmatpush1.bf16.xpose.msk.msra.mxu0 %vm3667_vm5, %v3682_v54  ;;  %v3714_v6 = vpack.c.bf16 %v3693_v59, %v3691_v58  ;;  %v1248_v7 = vrot.slane %v3691_v58, 7  ;;  %v104_v10 = vsel %vm102_vm4, %v95_v60, %v99_v61  ;;  %v108_v11 = vsel %vm102_vm4, %v99_v61, %v95_v60  ;;  %v2396_v60 = vld [vmem:[%s5532_s0 + $0x138] sm:$0xff]  ;;  %v2358_v61 = vld [vmem:[%s5535_s3 + $0x20] sm:$0xff] }
  0x10   :  { %5698 = vst [vmem:[#allocation7_spill] sm:$0xff] %v3684_v55  ;;  %3133 = vmatpush1.bf16.xpose.msk.msra.mxu1 %vm3667_vm5, %v3684_v55  ;;  %2749 = vmatprep.subr.bf16.mxu0 %v3689_v57  ;;  %v1252_v12 = vrot.slane %v3693_v59, 7  ;;  %v82_v13 = vadd.f32 %v3576_v2, %v68_v62  ;;  %v3727_v14 = vpack.c.bf16 %v104_v10, %v108_v11  ;;  %v2378_v57 = vld [vmem:[%s5532_s0 + $0xa8] sm:$0xff]  ;;  %vm131_vm6 = vcmp.lt.s32.totalorder %v3591_v8, 7 }
  0x11   :  { %5700 = vst [vmem:[#allocation9_spill] sm:$0xff] %v3714_v6  ;;  %3135 = vmatprep.subr.bf16.mxu1 %v3714_v6  ;;  %v83_v15 = vadd.f32 %v3576_v2, %v69_v63  ;;  %v1228_v16 = vmul.f32 %v2394_v0, %v3571_v1  ;;  %v1235_v17 = vadd.f32 %v3576_v2, %v1227_v3  ;;  %v5679_v8 = vmov 0.0|0.0  }
  0x12   :  { %5701 = vst [vmem:[#allocation10_spill] sm:$0xff] %v3727_v14  ;;  %v1256_v19 = vsel %vm102_vm4, %v1248_v7, %v1252_v12  ;;  %v1260_v20 = vsel %vm102_vm4, %v1252_v12, %v1248_v7  ;;  %v3739_v21 = vmax.f32 %v82_v13, 0.0  ;;  %v70_v23 = vmul.f32 %v3571_v1, %v56_v9  ;;  %751 = vmatprep.mubr.f32.mxu0 %v2358_v61  ;;  %v2365_v12 = vld [vmem:[%s5532_s0 + $0x40] sm:$0xff] }
  0x13   :  { %v3742_v24 = vpack.c.bf16 %v1256_v19, %v1260_v20  ;;  %v3744_v29 = vmax.f32 %v83_v15, 0.0  ;;  %v1236_v30 = vadd.f32 %v3576_v2, %v1228_v16  ;;  %v3747_v31 = vmax.f32 %v1235_v17, 0.0  ;;  %1890 = vmatprep.mubr.f32.mxu1 %v2358_v61  ;;  %v2397_v19 = vld [vmem:[%s5532_s0 + $0x140] sm:$0xff]  ;;  %v2398_v20 = vld [vmem:[%s5532_s0 + $0x148] sm:$0xff] }
  0x14   :  { %v96_v38 = vrot.slane %v3739_v21, 7  ;;  %v71_v39 = vmul.f32 %v3571_v1, %v57_v18  ;;  %v84_v40 = vadd.f32 %v3576_v2, %v70_v23  ;;  %v1229_v3 = vmul.f32 %v2395_v43, %v3571_v1  ;;  %v2366_v18 = vld [vmem:[%s5532_s0 + $0x48] sm:$0xff] }
  0x15   :  { %5702 = vst [vmem:[#allocation11_spill] sm:$0xff] %v3742_v24  ;;  %v3760_v46 = vpack.c.bf16 %v3744_v29, %v3739_v21  ;;  %v3762_v47 = vmax.f32 %v1236_v30, 0.0  ;;  %v100_v50 = vrot.slane %v3744_v29, 7  ;;  %v1249_v51 = vrot.slane %v3747_v31, 7 }
  0x16   :  { %v85_v52 = vadd.f32 %v3576_v2, %v71_v39  ;;  %v3786_v0 = vmax.f32 %v84_v40, 0.0  ;;  %v1230_v17 = vmul.f32 %v2396_v60, %v3571_v1  ;;  %v1237_v39 = vadd.f32 %v3576_v2, %v1229_v3 }
  0x17   :  { %5703 = vst [vmem:[#allocation12_spill] sm:$0xff] %v3760_v46  ;;  %2752 = vmatpush1.bf16.xpose.msk.msra.mxu0 %vm3667_vm5, %v3727_v14  ;;  %v3783_v62 = vpack.c.bf16 %v3762_v47, %v3747_v31  ;;  %v1253_v63 = vrot.slane %v3762_v47, 7  ;;  %v105_v9 = vsel %vm102_vm4, %v96_v38, %v100_v50  ;;  %v109_v10 = vsel %vm102_vm4, %v100_v50, %v96_v38 }
  0x18   :  { %3138 = vmatpush1.bf16.xpose.msk.msra.mxu1 %vm3667_vm5, %v3742_v24  ;;  %2754 = vmatprep.subr.bf16.mxu0 %v3760_v46  ;;  %v3794_v11 = vmax.f32 %v85_v52, 0.0  ;;  %v3815_v23 = vpack.c.bf16 %v105_v9, %v109_v10  ;;  %v1238_v40 = vadd.f32 %v3576_v2, %v1230_v17  ;;  %v97_v43 = vrot.slane %v3786_v0, 7 }
  0x19   :  { %5704 = vst [vmem:[#allocation13_spill] sm:$0xff] %v3783_v62  ;;  %3140 = vmatprep.subr.bf16.mxu1 %v3783_v62  ;;  %v1257_v13 = vsel %vm102_vm4, %v1249_v51, %v1253_v63  ;;  %v1261_v15 = vsel %vm102_vm4, %v1253_v63, %v1249_v51  ;;  %v186_v51 = vmul.f32 %v2365_v12, %v3571_v1  ;;  %v3828_v52 = vmax.f32 %v1237_v39, 0.0  ;;  %v2367_v12 = vld [vmem:[%s5532_s0 + $0x50] sm:$0xff] }
  0x1a   :  { %5705 = vst [vmem:[#allocation14_spill] sm:$0xff] %v3815_v23  ;;  %v3817_v30 = vpack.c.bf16 %v1257_v13, %v1261_v15  ;;  %v3821_v38 = vpack.c.bf16 %v3794_v11, %v3786_v0  ;;  %v101_v50 = vrot.slane %v3794_v11, 7  ;;  %v187_v60 = vmul.f32 %v2366_v18, %v3571_v1 }
  0x1b   :  { %5708 = vst [vmem:[#allocation17_spill] sm:$0xff] %v3828_v52  ;;  %v1328_v61 = vmul.f32 %v2397_v19, %v3571_v1  ;;  %v1329_v63 = vmul.f32 %v2398_v20, %v3571_v1  ;;  %v3833_v9 = vmax.f32 %v1238_v40, 0.0  ;;  %v194_v13 = vadd.f32 %v3576_v2, %v186_v51 }
  0x1c   :  { %5706 = vst [vmem:[#allocation15_spill] sm:$0xff] %v3817_v30  ;;  %5707 = vst [vmem:[#allocation16_spill] sm:$0xff] %v3821_v38  ;;  %v106_v3 = vsel %vm102_vm4, %v97_v43, %v101_v50  ;;  %v110_v10 = vsel %vm102_vm4, %v101_v50, %v97_v43  ;;  %v1250_v18 = vrot.slane %v3828_v52, 7  ;;  %v195_v19 = vadd.f32 %v3576_v2, %v187_v60  ;;  %v2368_v60 = vld [vmem:[%s5532_s0 + $0x58] sm:$0xff] }
  0x1d   :  { %5709 = vst [vmem:[#allocation18_spill] sm:$0xff] %v3833_v9  ;;  %v3856_v20 = vpack.c.bf16 %v3833_v9, %v3828_v52  ;;  %v3858_v39 = vpack.c.bf16 %v106_v3, %v110_v10  ;;  %v1254_v40 = vrot.slane %v3833_v9, 7  ;;  %v3861_v43 = vmax.f32 %v194_v13, 0.0  ;;  %v2400_v13 = vld [vmem:[%s5532_s0 + $0x158] sm:$0xff] }
  0x1e   :  { %v3863_v50 = vmax.f32 %v195_v19, 0.0  ;;  %v1336_v51 = vadd.f32 %v3576_v2, %v1328_v61  ;;  %v1337_v17 = vadd.f32 %v3576_v2, %v1329_v63  ;;  %v188_v16 = vmul.f32 %v2367_v12, %v3571_v1  ;;  %v2399_v63 = vld [vmem:[%s5532_s0 + $0x150] sm:$0xff] }
  0x1f   :  { %2757 = vmatpush1.bf16.xpose.msk.msra.mxu0 %vm3667_vm5, %v3815_v23  ;;  %5710 = vst [vmem:[#allocation19_spill] sm:$0xff] %v3856_v20  ;;  %5711 = vst [vmem:[#allocation20_spill] sm:$0xff] %v3858_v39  ;;  %v1258_v3 = vsel %vm102_vm4, %v1250_v18, %v1254_v40  ;;  %v1262_v10 = vsel %vm102_vm4, %v1254_v40, %v1250_v18  ;;  %v210_v61 = vrot.slane %v3861_v43, 7 }
  0x20   :  { %3143 = vmatpush1.bf16.xpose.msk.msra.mxu1 %vm3667_vm5, %v3817_v30  ;;  %2759 = vmatprep.subr.bf16.mxu0 %v3821_v38  ;;  %5712 = vst [vmem:[#allocation21_spill] sm:$0xff] %v3861_v43  ;;  %5713 = vst [vmem:[#allocation22_spill] sm:$0xff] %v3863_v50  ;;  %v3884_v12 = vpack.c.bf16 %v1258_v3, %v1262_v10  ;;  %v3889_v15 = vpack.c.bf16 %v3863_v50, %v3861_v43  ;;  %v3891_v49 = vmax.f32 %v1336_v51, 0.0  ;;  %v2369_v51 = vld [vmem:[%s5532_s0 + $0x60] sm:$0xff]  ;;  %v2386_v43 = vld [vmem:[%s5532_s0 + $0xe8] sm:$0xff] }
  0x21   :  { %3145 = vmatprep.subr.bf16.mxu1 %v3856_v20  ;;  %v3893_v18 = vmax.f32 %v1337_v17, 0.0  ;;  %v214_v40 = vrot.slane %v3863_v50, 7  ;;  %v189_v7 = vmul.f32 %v2368_v60, %v3571_v1  ;;  %v196_v44 = vadd.f32 %v3576_v2, %v188_v16  ;;  %v2373_v30 = vld [vmem:[%s5532_s0 + $0x80] sm:$0xff] }
  0x22   :  { %5714 = vst [vmem:[#allocation23_spill] sm:$0xff] %v3884_v12  ;;  %5715 = vst [vmem:[#allocation24_spill] sm:$0xff] %v3889_v15  ;;  %v1352_v3 = vrot.slane %v3891_v49, 7  ;;  %v1330_v10 = vmul.f32 %v2399_v63, %v3571_v1  ;;  %v1331_v19 = vmul.f32 %v2400_v13, %v3571_v1 }
  0x23   :  { %5716 = vst [vmem:[#allocation25_spill] sm:$0xff] %v3891_v49  ;;  %5717 = vst [vmem:[#allocation26_spill] sm:$0xff] %v3893_v18  ;;  %v3908_v5 = vpack.c.bf16 %v3893_v18, %v3891_v49  ;;  %v218_v16 = vsel %vm102_vm4, %v210_v61, %v214_v40  ;;  %v222_v60 = vsel %vm102_vm4, %v214_v40, %v210_v61  ;;  %v1356_v13 = vrot.slane %v3893_v18, 7  ;;  %v2385_v18 = vld [vmem:[%s5532_s0 + $0xe0] sm:$0xff] }
  0x24   :  { %v3920_v63 = vpack.c.bf16 %v218_v16, %v222_v60  ;;  %v197_v17 = vadd.f32 %v3576_v2, %v189_v7  ;;  %v3924_v45 = vmax.f32 %v196_v44, 0.0  ;;  %v1338_v40 = vadd.f32 %v3576_v2, %v1330_v10  ;;  %v2370_v16 = vld [vmem:[%s5532_s0 + $0x68] sm:$0xff] }
  0x25   :  { %5718 = vst [vmem:[#allocation27_spill] sm:$0xff] %v3908_v5  ;;  %v1339_v32 = vadd.f32 %v3576_v2, %v1331_v19  ;;  %v190_v60 = vmul.f32 %v2369_v51, %v3571_v1  ;;  %v1360_v44 = vsel %vm102_vm4, %v1352_v3, %v1356_v13  ;;  %v1364_v7 = vsel %vm102_vm4, %v1356_v13, %v1352_v3  ;;  %v2401_v13 = vld [vmem:[%s5532_s0 + $0x160] sm:$0xff] }
  0x26   :  { %5719 = vst [vmem:[#allocation28_spill] sm:$0xff] %v3920_v63  ;;  %5720 = vst [vmem:[#allocation29_spill] sm:$0xff] %v3924_v45  ;;  %v3939_v56 = vmax.f32 %v197_v17, 0.0  ;;  %v3942_v4 = vpack.c.bf16 %v1360_v44, %v1364_v7  ;;  %v3944_v10 = vmax.f32 %v1338_v40, 0.0  ;;  %v211_v36 = vrot.slane %v3924_v45, 7 }
  0x27   :  { %2762 = vmatpush1.bf16.xpose.msk.msra.mxu0 %vm3667_vm5, %v3858_v39  ;;  %v3946_v19 = vmax.f32 %v1339_v32, 0.0  ;;  %v191_v17 = vmul.f32 %v2370_v16, %v3571_v1  ;;  %v2402_v32 = vld [vmem:[%s5532_s0 + $0x168] sm:$0xff]  ;;  %v2371_v16 = vld [vmem:[%s5532_s0 + $0x70] sm:$0xff]  ;;  %v198_v44 = vadd.f32 %v3576_v2, %v190_v60  ;;  %v2372_v39 = vld [vmem:[%s5532_s0 + $0x78] sm:$0xff] }
  0x28   :  { %3148 = vmatpush1.bf16.xpose.msk.msra.mxu1 %vm3667_vm5, %v3884_v12  ;;  %2764 = vmatprep.subr.bf16.mxu0 %v3889_v15  ;;  %5721 = vst [vmem:[#allocation30_spill] sm:$0xff] %v3939_v56  ;;  %5722 = vst [vmem:[#allocation31_spill] sm:$0xff] %v3942_v4  ;;  %v3952_v53 = vpack.c.bf16 %v3939_v56, %v3924_v45  ;;  %v215_v3 = vrot.slane %v3939_v56, 7  ;;  %v1353_v61 = vrot.slane %v3944_v10, 7 }
  0x29   :  { %3150 = vmatprep.subr.bf16.mxu1 %v3908_v5  ;;  %5723 = vst [vmem:[#allocation32_spill] sm:$0xff] %v3944_v10  ;;  %5724 = vst [vmem:[#allocation33_spill] sm:$0xff] %v3946_v19  ;;  %v3966_v7 = vpack.c.bf16 %v3946_v19, %v3944_v10  ;;  %v1357_v40 = vrot.slane %v3946_v19, 7  ;;  %v199_v5 = vadd.f32 %v3576_v2, %v191_v17  ;;  %v3996_v60 = vmax.f32 %v198_v44, 0.0 }
  0x2a   :  { %5725 = vst [vmem:[#allocation34_spill] sm:$0xff] %v3952_v53  ;;  %v219_v51 = vsel %vm102_vm4, %v211_v36, %v215_v3  ;;  %v223_v33 = vsel %vm102_vm4, %v215_v3, %v211_v36  ;;  %v1332_v15 = vmul.f32 %v2401_v13, %v3571_v1  ;;  %v1333_v12 = vmul.f32 %v2402_v32, %v3571_v1 }
  0x2b   :  { %5726 = vst [vmem:[#allocation35_spill] sm:$0xff] %v3966_v7  ;;  %v3978_v34 = vpack.c.bf16 %v219_v51, %v223_v33  ;;  %v1361_v33 = vsel %vm102_vm4, %v1353_v61, %v1357_v40  ;;  %v1365_v36 = vsel %vm102_vm4, %v1357_v40, %v1353_v61  ;;  %5728 = vst [vmem:[#allocation37_spill] sm:$0xff] %v3996_v60  ;;  %v4003_v17 = vmax.f32 %v199_v5, 0.0  ;;  %v2403_v61 = vld [vmem:[%s5532_s0 + $0x170] sm:$0xff] }
  0x2c   :  { %v192_v51 = vmul.f32 %v2371_v16, %v3571_v1  ;;  %v4001_v3 = vpack.c.bf16 %v1361_v33, %v1365_v36  ;;  %v1340_v13 = vadd.f32 %v3576_v2, %v1332_v15  ;;  %v1341_v32 = vadd.f32 %v3576_v2, %v1333_v12 }
  0x2d   :  { %5727 = vst [vmem:[#allocation36_spill] sm:$0xff] %v3978_v34  ;;  %5730 = vst [vmem:[#allocation39_spill] sm:$0xff] %v4003_v17  ;;  %v212_v44 = vrot.slane %v3996_v60, 7  ;;  %v193_v16 = vmul.f32 %v2372_v39, %v3571_v1  ;;  %v4017_v5 = vpack.c.bf16 %v4003_v17, %v3996_v60  ;;  %v216_v36 = vrot.slane %v4003_v17, 7  ;;  %v2404_v39 = vld [vmem:[%s5532_s0 + $0x178] sm:$0xff]  ;;  %v2381_v60 = vld [vmem:[%s5532_s0 + $0xc0] sm:$0xff] }
  0x2e   :  { %5729 = vst [vmem:[#allocation38_spill] sm:$0xff] %v4001_v3  ;;  %v4019_v15 = vmax.f32 %v1340_v13, 0.0  ;;  %v4021_v12 = vmax.f32 %v1341_v32, 0.0  ;;  %v398_v17 = vmul.f32 %v2381_v60, %v3571_v1 }
  0x2f   :  { %2767 = vmatpush1.bf16.xpose.msk.msra.mxu0 %vm3667_vm5, %v3920_v63  ;;  %5731 = vst [vmem:[#allocation40_spill] sm:$0xff] %v4017_v5  ;;  %v201_v40 = vadd.f32 %v3576_v2, %v193_v16  ;;  %v224_v16 = vsel %vm102_vm4, %v216_v36, %v212_v44 }
  0x30   :  { %3153 = vmatpush1.bf16.xpose.msk.msra.mxu1 %vm3667_vm5, %v3942_v4  ;;  %2769 = vmatprep.subr.bf16.mxu0 %v3952_v53  ;;  %5732 = vst [vmem:[#allocation41_spill] sm:$0xff] %v4019_v15  ;;  %5733 = vst [vmem:[#allocation42_spill] sm:$0xff] %v4021_v12  ;;  %v4035_v13 = vpack.c.bf16 %v4021_v12, %v4019_v15  ;;  %v1354_v32 = vrot.slane %v4019_v15, 7  ;;  %v1358_v63 = vrot.slane %v4021_v12, 7 }
  0x31   :  { %3155 = vmatprep.subr.bf16.mxu1 %v3966_v7  ;;  %v200_v7 = vadd.f32 %v3576_v2, %v192_v51  ;;  %v1334_v51 = vmul.f32 %v2403_v61, %v3571_v1  ;;  %v4043_v20 = vmax.f32 %v201_v40, 0.0  ;;  %v1335_v4 = vmul.f32 %v2404_v39, %v3571_v1  ;;  %v2405_v40 = vld [vmem:[%s5532_s0 + $0x180] sm:$0xff] }
  0x32   :  { %5735 = vst [vmem:[#allocation44_spill] sm:$0xff] %v4035_v13  ;;  %v1366_v39 = vsel %vm102_vm4, %v1358_v63, %v1354_v32  ;;  %v1433_v62 = vmul.f32 %v2405_v40, %v3571_v1  ;;  %v2376_v40 = vld [vmem:[%s5532_s0 + $0x98] sm:$0xff]  ;;  %v406_v19 = vadd.f32 %v3576_v2, %v398_v17 }
  0x33   :  { %v4025_v53 = vmax.f32 %v200_v7, 0.0  ;;  %v220_v7 = vsel %vm102_vm4, %v212_v44, %v216_v36  ;;  %5736 = vst [vmem:[#allocation45_spill] sm:$0xff] %v4043_v20  ;;  %v1342_v38 = vadd.f32 %v3576_v2, %v1334_v51  ;;  %v2374_v44 = vld [vmem:[%s5532_s0 + $0x88] sm:$0xff]  ;;  %v1362_v36 = vsel %vm102_vm4, %v1354_v32, %v1358_v63 }
  0x34   :  { %v4045_v61 = vpack.c.bf16 %v220_v7, %v224_v16  ;;  %v2406_v16 = vld [vmem:[%s5532_s0 + $0x188] sm:$0xff]  ;;  %v4079_v33 = vpack.c.bf16 %v1362_v36, %v1366_v39  ;;  %v217_v32 = vrot.slane %v4043_v20, 7  ;;  %v292_v51 = vmul.f32 %v2373_v30, %v3571_v1 }
  0x35   :  { %5734 = vst [vmem:[#allocation43_spill] sm:$0xff] %v4025_v53  ;;  %v4072_v7 = vpack.c.bf16 %v4043_v20, %v4025_v53  ;;  %v213_v63 = vrot.slane %v4025_v53, 7  ;;  %v293_v23 = vmul.f32 %v2374_v44, %v3571_v1 }
  0x36   :  { %5737 = vst [vmem:[#allocation46_spill] sm:$0xff] %v4045_v61  ;;  %5739 = vst [vmem:[#allocation48_spill] sm:$0xff] %v4079_v33  ;;  %v300_v30 = vadd.f32 %v3576_v2, %v292_v51 }
  0x37   :  { %2772 = vmatpush1.bf16.xpose.msk.msra.mxu0 %vm3667_vm5, %v3978_v34  ;;  %5738 = vst [vmem:[#allocation47_spill] sm:$0xff] %v4072_v7  ;;  %v4082_v34 = vmax.f32 %v1342_v38, 0.0  ;;  %v221_v38 = vsel %vm102_vm4, %v213_v63, %v217_v32  ;;  %v225_v39 = vsel %vm102_vm4, %v217_v32, %v213_v63  ;;  %v301_v44 = vadd.f32 %v3576_v2, %v293_v23 }
  0x38   :  { %3158 = vmatpush1.bf16.xpose.msk.msra.mxu1 %vm3667_vm5, %v4001_v3  ;;  %2774 = vmatprep.subr.bf16.mxu0 %v4017_v5  ;;  %v1343_v3 = vadd.f32 %v3576_v2, %v1335_v4  ;;  %v1434_v4 = vmul.f32 %v2406_v16, %v3571_v1  ;;  %v4111_v5 = vpack.c.bf16 %v221_v38, %v225_v39  ;;  %v4114_v63 = vmax.f32 %v300_v30, 0.0  ;;  %v2407_v39 = vld [vmem:[%s5532_s0 + $0x190] sm:$0xff] }
  0x39   :  { %3160 = vmatprep.subr.bf16.mxu1 %v4035_v13  ;;  %5740 = vst [vmem:[#allocation49_spill] sm:$0xff] %v4082_v34  ;;  %v1355_v36 = vrot.slane %v4082_v34, 7  ;;  %v4116_v23 = vmax.f32 %v301_v44, 0.0  ;;  %v1441_v32 = vadd.f32 %v3576_v2, %v1433_v62  ;;  %v295_v38 = vmul.f32 %v2376_v40, %v3571_v1 }
  0x3a   :  { %v4089_v46 = vmax.f32 %v1343_v3, 0.0  ;;  %v2375_v3 = vld [vmem:[%s5532_s0 + $0x90] sm:$0xff]  ;;  %5743 = vst [vmem:[#allocation52_spill] sm:$0xff] %v4111_v5  ;;  %v1442_v24 = vadd.f32 %v3576_v2, %v1434_v4  ;;  %v316_v44 = vrot.slane %v4114_v63, 7 }
  0x3b   :  { %v294_v6 = vmul.f32 %v2375_v3, %v3571_v1  ;;  %v4141_v4 = vmax.f32 %v1441_v32, 0.0  ;;  %v320_v3 = vrot.slane %v4116_v23, 7 }
  0x3c   :  { %5741 = vst [vmem:[#allocation50_spill] sm:$0xff] %v4089_v46  ;;  %v4109_v13 = vpack.c.bf16 %v4089_v46, %v4082_v34  ;;  %v1359_v51 = vrot.slane %v4089_v46, 7  ;;  %v4143_v30 = vmax.f32 %v1442_v24, 0.0  ;;  %v297_v34 = vmul.f32 %v2378_v57, %v3571_v1 }
  0x3d   :  { %v302_v40 = vadd.f32 %v3576_v2, %v294_v6  ;;  %v328_v6 = vsel %vm102_vm4, %v320_v3, %v316_v44 }
  0x3e   :  { %5742 = vst [vmem:[#allocation51_spill] sm:$0xff] %v4109_v13  ;;  %v1363_v14 = vsel %vm102_vm4, %v1355_v36, %v1359_v51  ;;  %v1367_v16 = vsel %vm102_vm4, %v1359_v51, %v1355_v36  ;;  %v4139_v36 = vpack.c.bf16 %v4116_v23, %v4114_v63  ;;  %v4156_v24 = vpack.c.bf16 %v4143_v30, %v4141_v4 }
  0x3f   :  { %2777 = vmatpush1.bf16.xpose.msk.msra.mxu0 %vm3667_vm5, %v4045_v61  ;;  %v4135_v62 = vpack.c.bf16 %v1363_v14, %v1367_v16  ;;  %v303_v14 = vadd.f32 %v3576_v2, %v295_v38  ;;  %v2408_v16 = vld [vmem:[%s5532_s0 + $0x198] sm:$0xff]  ;;  %v1457_v51 = vrot.slane %v4141_v4, 7  ;;  %v1461_v32 = vrot.slane %v4143_v30, 7  ;;  %v2377_v61 = vld [vmem:[%s5532_s0 + $0xa0] sm:$0xff] }
  0x40   :  { %3163 = vmatpush1.bf16.xpose.msk.msra.mxu1 %vm3667_vm5, %v4079_v33  ;;  %5745 = vst [vmem:[#allocation54_spill] sm:$0xff] %v4139_v36  ;;  %2779 = vmatprep.subr.bf16.mxu0 %v4072_v7  ;;  %5746 = vst [vmem:[#allocation55_spill] sm:$0xff] %v4156_v24  ;;  %v324_v7 = vsel %vm102_vm4, %v316_v44, %v320_v3  ;;  %v4165_v38 = vmax.f32 %v302_v40, 0.0  ;;  %v1436_v3 = vmul.f32 %v2408_v16, %v3571_v1  ;;  %v2409_v40 = vld [vmem:[%s5532_s0 + $0x1a0] sm:$0xff] }
  0x41   :  { %5744 = vst [vmem:[#allocation53_spill] sm:$0xff] %v4135_v62  ;;  %3165 = vmatprep.subr.bf16.mxu1 %v4109_v13  ;;  %v1435_v13 = vmul.f32 %v2407_v39, %v3571_v1  ;;  %v4167_v33 = vmax.f32 %v303_v14, 0.0  ;;  %v4175_v55 = vpack.c.bf16 %v324_v7, %v328_v6  ;;  %v1465_v39 = vsel %vm102_vm4, %v1457_v51, %v1461_v32  ;;  %v2410_v14 = vld [vmem:[%s5532_s0 + $0x1a8] sm:$0xff]  ;;  %v2379_v7 = vld [vmem:[%s5532_s0 + $0xb0] sm:$0xff] }
  0x42   :  { %v1469_v44 = vsel %vm102_vm4, %v1461_v32, %v1457_v51  ;;  %v317_v51 = vrot.slane %v4165_v38, 7  ;;  %v1444_v32 = vadd.f32 %v3576_v2, %v1436_v3  ;;  %v296_v35 = vmul.f32 %v2377_v61, %v3571_v1 }
  0x43   :  { %5747 = vst [vmem:[#allocation56_spill] sm:$0xff] %v4175_v55  ;;  %v4191_v6 = vpack.c.bf16 %v1465_v39, %v1469_v44  ;;  %v4195_v54 = vpack.c.bf16 %v4167_v33, %v4165_v38  ;;  %v1443_v16 = vadd.f32 %v3576_v2, %v1435_v13  ;;  %v321_v37 = vrot.slane %v4167_v33, 7 }
  0x44   :  { %v1437_v39 = vmul.f32 %v2409_v40, %v3571_v1  ;;  %v1438_v44 = vmul.f32 %v2410_v14, %v3571_v1  ;;  %v298_v53 = vmul.f32 %v2379_v7, %v3571_v1  ;;  %v4214_v13 = vmax.f32 %v1444_v32, 0.0  ;;  %v2380_v40 = vld [vmem:[%s5532_s0 + $0xb8] sm:$0xff] }
  0x45   :  { %5748 = vst [vmem:[#allocation57_spill] sm:$0xff] %v4191_v6  ;;  %5749 = vst [vmem:[#allocation58_spill] sm:$0xff] %v4195_v54  ;;  %v4203_v46 = vmax.f32 %v1443_v16, 0.0  ;;  %v325_v57 = vsel %vm102_vm4, %v317_v51, %v321_v37  ;;  %v329_v61 = vsel %vm102_vm4, %v321_v37, %v317_v51  ;;  %v304_v3 = vadd.f32 %v3576_v2, %v296_v35 }
  0x46   :  { %v4226_v14 = vpack.c.bf16 %v325_v57, %v329_v61  ;;  %v305_v16 = vadd.f32 %v3576_v2, %v297_v34  ;;  %v1445_v32 = vadd.f32 %v3576_v2, %v1437_v39  ;;  %v1462_v35 = vrot.slane %v4214_v13, 7 }
  0x47   :  { %2782 = vmatpush1.bf16.xpose.msk.msra.mxu0 %vm3667_vm5, %v4111_v5  ;;  %v1458_v7 = vrot.slane %v4203_v46, 7  ;;  %v4233_v37 = vpack.c.bf16 %v4214_v13, %v4203_v46  ;;  %v4236_v51 = vmax.f32 %v304_v3, 0.0  ;;  %v299_v61 = vmul.f32 %v2380_v40, %v3571_v1  ;;  %v2412_v40 = vld [vmem:[%s5532_s0 + $0x1b8] sm:$0xff] }
  0x48   :  { %3168 = vmatpush1.bf16.xpose.msk.msra.mxu1 %vm3667_vm5, %v4135_v62  ;;  %2784 = vmatprep.subr.bf16.mxu0 %v4139_v36  ;;  %5750 = vst [vmem:[#allocation59_spill] sm:$0xff] %v4226_v14  ;;  %v1446_v36 = vadd.f32 %v3576_v2, %v1438_v44  ;;  %v4239_v62 = vmax.f32 %v305_v16, 0.0  ;;  %v4241_v57 = vmax.f32 %v1445_v32, 0.0  ;;  %v306_v34 = vadd.f32 %v3576_v2, %v298_v53  ;;  %v2411_v44 = vld [vmem:[%s5532_s0 + $0x1b0] sm:$0xff] }
  0x49   :  { %3170 = vmatprep.subr.bf16.mxu1 %v4156_v24  ;;  %5751 = vst [vmem:[#allocation60_spill] sm:$0xff] %v4233_v37  ;;  %v1466_v39 = vsel %vm102_vm4, %v1458_v7, %v1462_v35  ;;  %v1470_v24 = vsel %vm102_vm4, %v1462_v35, %v1458_v7  ;;  %v318_v3 = vrot.slane %v4236_v51, 7  ;;  %v307_v20 = vadd.f32 %v3576_v2, %v299_v61  ;;  %v2382_v61 = vld [vmem:[%s5532_s0 + $0xc8] sm:$0xff] }
  0x4a   :  { %v4249_v5 = vmax.f32 %v1446_v36, 0.0  ;;  %v4258_v16 = vpack.c.bf16 %v1466_v39, %v1470_v24  ;;  %v4262_v53 = vpack.c.bf16 %v4239_v62, %v4236_v51  ;;  %v322_v7 = vrot.slane %v4239_v62, 7 }
  0x4b   :  { %v1459_v36 = vrot.slane %v4241_v57, 7  ;;  %v4272_v28 = vmax.f32 %v306_v34, 0.0  ;;  %v1439_v15 = vmul.f32 %v2411_v44, %v3571_v1  ;;  %v1440_v12 = vmul.f32 %v2412_v40, %v3571_v1 }
  0x4c   :  { %5752 = vst [vmem:[#allocation61_spill] sm:$0xff] %v4258_v16  ;;  %5753 = vst [vmem:[#allocation62_spill] sm:$0xff] %v4262_v53  ;;  %v4268_v32 = vpack.c.bf16 %v4249_v5, %v4241_v57  ;;  %v1463_v35 = vrot.slane %v4249_v5, 7  ;;  %v326_v24 = vsel %vm102_vm4, %v318_v3, %v322_v7  ;;  %v330_v39 = vsel %vm102_vm4, %v322_v7, %v318_v3  ;;  %v2413_v7 = vld [vmem:[%s5532_s0 + $0x1c0] sm:$0xff] }
  0x4d   :  { %v4292_v34 = vpack.c.bf16 %v326_v24, %v330_v39  ;;  %v4298_v40 = vmax.f32 %v307_v20, 0.0  ;;  %v1447_v39 = vadd.f32 %v3576_v2, %v1439_v15  ;;  %v319_v20 = vrot.slane %v4272_v28, 7 }
  0x4e   :  { %5754 = vst [vmem:[#allocation63_spill] sm:$0xff] %v4268_v32  ;;  %v1467_v3 = vsel %vm102_vm4, %v1459_v36, %v1463_v35  ;;  %v1471_v44 = vsel %vm102_vm4, %v1463_v35, %v1459_v36  ;;  %v1448_v36 = vadd.f32 %v3576_v2, %v1440_v12  ;;  %v1538_v15 = vmul.f32 %v2413_v7, %v3571_v1  ;;  %v2384_v7 = vld [vmem:[%s5532_s0 + $0xd8] sm:$0xff] }
  0x4f   :  { %2787 = vmatpush1.bf16.xpose.msk.msra.mxu0 %vm3667_vm5, %v4175_v55  ;;  %5755 = vst [vmem:[#allocation64_spill] sm:$0xff] %v4292_v34  ;;  %v2414_v55 = vld [vmem:[%s5532_s0 + $0x1c8] sm:$0xff]  ;;  %v4308_v24 = vpack.c.bf16 %v1467_v3, %v1471_v44  ;;  %v4315_v35 = vpack.c.bf16 %v4298_v40, %v4272_v28  ;;  %v4320_v10 = vmax.f32 %v1447_v39, 0.0 }
  0x50   :  { %3173 = vmatpush1.bf16.xpose.msk.msra.mxu1 %vm3667_vm5, %v4191_v6  ;;  %2789 = vmatprep.subr.bf16.mxu0 %v4195_v54  ;;  %v323_v6 = vrot.slane %v4298_v40, 7  ;;  %v399_v54 = vmul.f32 %v2382_v61, %v3571_v1  ;;  %v4322_v3 = vmax.f32 %v1448_v36, 0.0  ;;  %v1539_v12 = vmul.f32 %v2414_v55, %v3571_v1  ;;  %v2383_v61 = vld [vmem:[%s5532_s0 + $0xd0] sm:$0xff] }
  0x51   :  { %3175 = vmatprep.subr.bf16.mxu1 %v4233_v37  ;;  %5756 = vst [vmem:[#allocation65_spill] sm:$0xff] %v4308_v24  ;;  %5757 = vst [vmem:[#allocation66_spill] sm:$0xff] %v4315_v35  ;;  %v4346_v36 = vmax.f32 %v406_v19, 0.0  ;;  %v2415_v19 = vld [vmem:[%s5532_s0 + $0x1d0] sm:$0xff] }
  0x52   :  { %v327_v44 = vsel %vm102_vm4, %v319_v20, %v323_v6  ;;  %v331_v37 = vsel %vm102_vm4, %v323_v6, %v319_v20  ;;  %v407_v60 = vadd.f32 %v3576_v2, %v399_v54  ;;  %v4340_v55 = vpack.c.bf16 %v4322_v3, %v4320_v10 }
  0x53   :  { %v4342_v39 = vpack.c.bf16 %v327_v44, %v331_v37  ;;  %v1460_v6 = vrot.slane %v4320_v10, 7  ;;  %v1464_v17 = vrot.slane %v4322_v3, 7  ;;  %5760 = vst [vmem:[#allocation69_spill] sm:$0xff] %v4346_v36  ;;  %v1546_v20 = vadd.f32 %v3576_v2, %v1538_v15 }
  0x54   :  { %5758 = vst [vmem:[#allocation67_spill] sm:$0xff] %v4340_v55  ;;  %v4348_v54 = vmax.f32 %v407_v60, 0.0  ;;  %v1547_v45 = vadd.f32 %v3576_v2, %v1539_v12  ;;  %v400_v37 = vmul.f32 %v2383_v61, %v3571_v1  ;;  %v401_v44 = vmul.f32 %v2384_v7, %v3571_v1 }
  0x55   :  { %5759 = vst [vmem:[#allocation68_spill] sm:$0xff] %v4342_v39  ;;  %v1468_v56 = vsel %vm102_vm4, %v1460_v6, %v1464_v17  ;;  %v1472_v49 = vsel %vm102_vm4, %v1464_v17, %v1460_v6  ;;  %v4373_v60 = vmax.f32 %v1546_v20, 0.0  ;;  %v422_v7 = vrot.slane %v4346_v36, 7 }
  0x56   :  { %5761 = vst [vmem:[#allocation70_spill] sm:$0xff] %v4348_v54  ;;  %v4367_v15 = vpack.c.bf16 %v1468_v56, %v1472_v49  ;;  %v4371_v12 = vpack.c.bf16 %v4348_v54, %v4346_v36  ;;  %v4375_v61 = vmax.f32 %v1547_v45, 0.0  ;;  %v426_v6 = vrot.slane %v4348_v54, 7  ;;  %v2416_v49 = vld [vmem:[%s5532_s0 + $0x1d8] sm:$0xff] }
  0x57   :  { %2792 = vmatpush1.bf16.xpose.msk.msra.mxu0 %vm3667_vm5, %v4226_v14  ;;  %5764 = vst [vmem:[#allocation73_spill] sm:$0xff] %v4373_v60  ;;  %v408_v17 = vadd.f32 %v3576_v2, %v400_v37  ;;  %v409_v56 = vadd.f32 %v3576_v2, %v401_v44  ;;  %v1562_v20 = vrot.slane %v4373_v60, 7  ;;  %v402_v54 = vmul.f32 %v2385_v18, %v3571_v1 }
  0x58   :  { %3178 = vmatpush1.bf16.xpose.msk.msra.mxu1 %vm3667_vm5, %v4258_v16  ;;  %5762 = vst [vmem:[#allocation71_spill] sm:$0xff] %v4367_v15  ;;  %5763 = vst [vmem:[#allocation72_spill] sm:$0xff] %v4371_v12  ;;  %2794 = vmatprep.subr.bf16.mxu0 %v4262_v53  ;;  %v4388_v45 = vpack.c.bf16 %v4375_v61, %v4373_v60  ;;  %v1540_v53 = vmul.f32 %v2415_v19, %v3571_v1 }
  0x59   :  { %5765 = vst [vmem:[#allocation74_spill] sm:$0xff] %v4375_v61  ;;  %3180 = vmatprep.subr.bf16.mxu1 %v4268_v32  ;;  %v1566_v32 = vrot.slane %v4375_v61, 7  ;;  %v430_v16 = vsel %vm102_vm4, %v422_v7, %v426_v6  ;;  %v434_v37 = vsel %vm102_vm4, %v426_v6, %v422_v7  ;;  %v4397_v44 = vmax.f32 %v408_v17, 0.0  ;;  %v2417_v17 = vld [vmem:[%s5532_s0 + $0x1e0] sm:$0xff] }
  0x5a   :  { %5766 = vst [vmem:[#allocation75_spill] sm:$0xff] %v4388_v45  ;;  %v4399_v14 = vmax.f32 %v409_v56, 0.0  ;;  %v4407_v50 = vpack.c.bf16 %v430_v16, %v434_v37  ;;  %v1541_v6 = vmul.f32 %v2416_v49, %v3571_v1  ;;  %v2418_v56 = vld [vmem:[%s5532_s0 + $0x1e8] sm:$0xff]  ;;  %v2387_v16 = vld [vmem:[%s5532_s0 + $0xf0] sm:$0xff]  ;;  %v403_v36 = vmul.f32 %v2386_v43, %v3571_v1 }
  0x5b   :  { %v1570_v19 = vsel %vm102_vm4, %v1562_v20, %v1566_v32  ;;  %v1574_v7 = vsel %vm102_vm4, %v1566_v32, %v1562_v20  ;;  %v1548_v32 = vadd.f32 %v3576_v2, %v1540_v53  ;;  %v423_v49 = vrot.slane %v4397_v44, 7 }
  0x5c   :  { %v4423_v37 = vpack.c.bf16 %v1570_v19, %v1574_v7  ;;  %v4427_v61 = vpack.c.bf16 %v4399_v14, %v4397_v44  ;;  %v1549_v20 = vadd.f32 %v3576_v2, %v1541_v6  ;;  %v427_v60 = vrot.slane %v4399_v14, 7 }
  0x5d   :  { %v4435_v52 = vmax.f32 %v1548_v32, 0.0  ;;  %v1542_v19 = vmul.f32 %v2417_v17, %v3571_v1  ;;  %v1543_v7 = vmul.f32 %v2418_v56, %v3571_v1  ;;  %v404_v9 = vmul.f32 %v2387_v16, %v3571_v1  ;;  %v2388_v17 = vld [vmem:[%s5532_s0 + $0xf8] sm:$0xff] }
  0x5e   :  { %v4446_v53 = vmax.f32 %v1549_v20, 0.0  ;;  %v431_v43 = vsel %vm102_vm4, %v423_v49, %v427_v60  ;;  %v435_v18 = vsel %vm102_vm4, %v427_v60, %v423_v49  ;;  %v410_v6 = vadd.f32 %v3576_v2, %v402_v54 }
  0x5f   :  { %2797 = vmatpush1.bf16.xpose.msk.msra.mxu0 %vm3667_vm5, %v4292_v34  ;;  %v4458_v56 = vpack.c.bf16 %v431_v43, %v435_v18  ;;  %v1563_v16 = vrot.slane %v4435_v52, 7  ;;  %v411_v32 = vadd.f32 %v3576_v2, %v403_v36  ;;  %v1550_v20 = vadd.f32 %v3576_v2, %v1542_v19 }
  0x60   :  { %3183 = vmatpush1.bf16.xpose.msk.msra.mxu1 %vm3667_vm5, %v4308_v24  ;;  %5767 = vst [vmem:[#allocation76_spill] sm:$0xff] %v4446_v53  ;;  %2799 = vmatprep.subr.bf16.mxu0 %v4315_v35  ;;  %v4466_v54 = vpack.c.bf16 %v4446_v53, %v4435_v52  ;;  %v1567_v60 = vrot.slane %v4446_v53, 7  ;;  %v4469_v49 = vmax.f32 %v410_v6, 0.0  ;;  %v405_v36 = vmul.f32 %v2388_v17, %v3571_v1  ;;  %v2420_v1 = vld [vmem:[%s5532_s0 + $0x1f8] sm:$0xff] }
  0x61   :  { %3185 = vmatprep.subr.bf16.mxu1 %v4340_v55  ;;  %v1551_v55 = vadd.f32 %v3576_v2, %v1543_v7  ;;  %v4472_v43 = vmax.f32 %v411_v32, 0.0  ;;  %v4474_v18 = vmax.f32 %v1550_v20, 0.0  ;;  %v412_v19 = vadd.f32 %v3576_v2, %v404_v9  ;;  %v2419_v7 = vld [vmem:[%s5532_s0 + $0x1f0] sm:$0xff]  ;;  %v3538_v20 = vld [vmem:[%s5534_s2] ss:$0 sm:$0xff] }
  0x62   :  { %5768 = vst [vmem:[#allocation77_spill] sm:$0xff] %v4469_v49  ;;  %v1571_v35 = vsel %vm102_vm4, %v1563_v16, %v1567_v60  ;;  %v1575_v24 = vsel %vm102_vm4, %v1567_v60, %v1563_v16  ;;  %v424_v6 = vrot.slane %v4469_v49, 7 }
  0x63   :  { %5769 = vst [vmem:[#allocation78_spill] sm:$0xff] %v4472_v43  ;;  %5770 = vst [vmem:[#allocation79_spill] sm:$0xff] %v4474_v18  ;;  %v4482_v34 = vmax.f32 %v1551_v55, 0.0  ;;  %v4491_v17 = vpack.c.bf16 %v1571_v35, %v1575_v24  ;;  %v4495_v2 = vpack.c.bf16 %v4472_v43, %v4469_v49  ;;  %v428_v9 = vrot.slane %v4472_v43, 7 }
  0x64   :  { %v1564_v55 = vrot.slane %v4474_v18, 7  ;;  %v413_v24 = vadd.f32 %v3538_v20, %v405_v36  ;;  %v4507_v35 = vmax.f32 %v412_v19, 0.0 }
  0x65   :  { %5771 = vst [vmem:[#allocation80_spill] sm:$0xff] %v4495_v2  ;;  %v4501_v16 = vpack.c.bf16 %v4482_v34, %v4474_v18  ;;  %v1568_v32 = vrot.slane %v4482_v34, 7  ;;  %v432_v60 = vsel %vm102_vm4, %v424_v6, %v428_v9  ;;  %v436_v43 = vsel %vm102_vm4, %v428_v9, %v424_v6  ;;  %v3539_v18 = vld [vmem:[%s5533_s1] ss:$0 sm:$0xff] }
  0x66   :  { %v1544_v49 = vmul.f32 %v3539_v18, %v2419_v7  ;;  %v1545_v53 = vmul.f32 %v3539_v18, %v2420_v1  ;;  %v4522_v36 = vpack.c.bf16 %v432_v60, %v436_v43  ;;  %v4528_v9 = vmax.f32 %v413_v24, 0.0 }
  0x67   :  { %5772 = vst [vmem:[#allocation81_spill] sm:$0xff] %v4501_v16  ;;  %2802 = vmatpush1.bf16.xpose.msk.msra.mxu0 %vm3667_vm5, %v4342_v39  ;;  %v1572_v19 = vsel %vm102_vm4, %v1564_v55, %v1568_v32  ;;  %v1576_v6 = vsel %vm102_vm4, %v1568_v32, %v1564_v55  ;;  %v340_v55 = vrot.slane %v4114_v63, 1  ;;  %v344_v32 = vrot.slane %v4116_v23, 1 }
  0x68   :  { %3188 = vmatpush1.bf16.xpose.msk.msra.mxu1 %vm3667_vm5, %v4367_v15  ;;  %5773 = vst [vmem:[#allocation82_spill] sm:$0xff] %v4522_v36  ;;  %2804 = vmatprep.subr.bf16.mxu0 %v4371_v12  ;;  %v4532_v18 = vpack.c.bf16 %v1572_v19, %v1576_v6  ;;  %v1552_v7 = vadd.f32 %v3538_v20, %v1544_v49  ;;  %v425_v15 = vrot.slane %v4507_v35, 7  ;;  %v429_v60 = vrot.slane %v4528_v9, 7 }
  0x69   :  { %3190 = vmatprep.subr.bf16.mxu1 %v4388_v45  ;;  %v1553_v1 = vadd.f32 %v3538_v20, %v1545_v53  ;;  %v4537_v43 = vpack.c.bf16 %v4528_v9, %v4507_v35  ;;  %v1481_v19 = vrot.slane %v4141_v4, 1  ;;  %v1485_v53 = vrot.slane %v4143_v30, 1 }
  0x6a   :  { %v4542_v24 = vmax.f32 %v1552_v7, 0.0  ;;  %v433_v49 = vsel %vm102_vm4, %v425_v15, %v429_v60  ;;  %v437_v20 = vsel %vm102_vm4, %v429_v60, %v425_v15  ;;  %v348_v6 = vsel %vm131_vm6, %v340_v55, %v344_v32 }
  0x6b   :  { %5774 = vst [vmem:[#allocation83_spill] sm:$0xff] %v4537_v43  ;;  %v4544_v12 = vmax.f32 %v1553_v1, 0.0  ;;  %v352_v63 = vsel %vm131_vm6, %v344_v32, %v340_v55  ;;  %v4560_v7 = vpack.c.bf16 %v433_v49, %v437_v20  ;;  %v1489_v15 = vsel %vm131_vm6, %v1481_v19, %v1485_v53 }
  0x6c   :  { %v1565_v4 = vrot.slane %v4542_v24, 7  ;;  %v4564_v1 = vpack.c.bf16 %v352_v63, %v348_v6  ;;  %v1493_v60 = vsel %vm131_vm6, %v1485_v53, %v1481_v19  ;;  %v5777_v55 = vrot.slane %v3619_v25, 1 }
  0x6d   :  { %v4558_v23 = vpack.c.bf16 %v4544_v12, %v4542_v24  ;;  %5776 = vst [vmem:[#allocation85_spill] sm:$0xff] %v4560_v7  ;;  %v1569_v30 = vrot.slane %v4544_v12, 7  ;;  %v5778_v32 = vrot.slane %v3615_v22, 1  ;;  %v4580_v63 = vpack.c.bf16 %v1493_v60, %v1489_v15 }
  0x6e   :  { %v5780_v39 = vmov %v5777_v55  ;;  %v5783_v22 = vrot.slane %v3621_v26, 1 }
  0x6f   :  { %5775 = vst [vmem:[#allocation84_spill] sm:$0xff] %v4558_v23  ;;  %v132_v49 = vsel %vm131_vm6, %v5778_v32, %v5777_v55  ;;  %v1573_v20 = vsel %vm102_vm4, %v1565_v4, %v1569_v30  ;;  %v1577_v6 = vsel %vm102_vm4, %v1569_v30, %v1565_v4  ;;  %v5779_v45 = vmov %v5778_v32 }
  0x70   :  { %v136_v19 = vsel %vm131_vm6, %v5780_v39, %v5779_v45  ;;  %2807 = vmatpush1.bf16.xpose.msk.msra.mxu0 %vm3667_vm5, %v4407_v50  ;;  %3193 = vmatpush1.bf16.xpose.msk.msra.mxu1 %vm3667_vm5, %v4423_v37  ;;  %v4594_v53 = vpack.c.bf16 %v1573_v20, %v1577_v6  ;;  %v5782_v30 = vrot.slane %v3623_v27, 1  ;;  %v341_v39 = vrot.slane %v4165_v38, 1 }
  0x71   :  { %v4596_v4 = vpack.c.bf16 %v136_v19, %v132_v49  ;;  %2809 = vmatprep.subr.bf16.mxu0 %v4427_v61  ;;  %3195 = vmatprep.subr.bf16.mxu1 %v4466_v54  ;;  %v5784_v45 = vmov %v5783_v22  ;;  %v345_v55 = vrot.slane %v4167_v33, 1  ;;  %v1482_v32 = vrot.slane %v4203_v46, 1 }
  0x72   :  { %5781 = vst [vmem:[#allocation86_spill] sm:$0xff] %v4594_v53  ;;  %v1279_v25 = vsel %vm131_vm6, %v5783_v22, %v5782_v30  ;;  %v5785_v15 = vmov %v5782_v30  ;;  %v1486_v49 = vrot.slane %v4214_v13, 1  ;;  %v5786_v38 = vrot.slane %v3652_v42, 1 }
  0x73   :  { %v1283_v60 = vsel %vm131_vm6, %v5785_v15, %v5784_v45  ;;  %v5787_v6 = vrot.slane %v3650_v41, 1  ;;  %v5790_v46 = vrot.slane %v3693_v59, 1  ;;  %v5791_v13 = vrot.slane %v3691_v58, 1 }
  0x74   :  { %v4616_v20 = vpack.c.bf16 %v1283_v60, %v1279_v25  ;;  %v5789_v19 = vmov %v5786_v38  ;;  %v349_v22 = vsel %vm131_vm6, %v341_v39, %v345_v55  ;;  %v353_v25 = vsel %vm131_vm6, %v345_v55, %v341_v39 }
  0x75   :  { %v133_v26 = vsel %vm131_vm6, %v5787_v6, %v5786_v38  ;;  %v5788_v27 = vmov %v5787_v6  ;;  %v1280_v30 = vsel %vm131_vm6, %v5791_v13, %v5790_v46  ;;  %v1490_v41 = vsel %vm131_vm6, %v1482_v32, %v1486_v49 }
  0x76   :  { %v137_v33 = vsel %vm131_vm6, %v5789_v19, %v5788_v27  ;;  %v1494_v42 = vsel %vm131_vm6, %v1486_v49, %v1482_v32  ;;  %v4644_v45 = vpack.c.bf16 %v353_v25, %v349_v22  ;;  %v5792_v38 = vmov %v5791_v13 }
  0x77   :  { %v4646_v15 = vpack.c.bf16 %v1494_v42, %v1490_v41  ;;  %v4648_v60 = vpack.c.bf16 %v137_v33, %v133_v26  ;;  %v5793_v6 = vmov %v5790_v46  ;;  %v342_v55 = vrot.slane %v4236_v51, 1 }
  0x78   :  { %v1284_v27 = vsel %vm131_vm6, %v5793_v6, %v5792_v38  ;;  %v346_v19 = vrot.slane %v4239_v62, 1  ;;  %v1483_v32 = vrot.slane %v4241_v57, 1  ;;  %v1487_v49 = vrot.slane %v4249_v5, 1  ;;  %2812 = vmatpush1.bf16.xpose.msk.msra.mxu0 %vm3667_vm5, %v4458_v56  ;;  %3198 = vmatpush1.bf16.xpose.msk.msra.mxu1 %vm3667_vm5, %v4491_v17 }
  0x79   :  { %v4656_v39 = vpack.c.bf16 %v1284_v27, %v1280_v30  ;;  %v5794_v26 = vrot.slane %v3744_v29, 1  ;;  %v5795_v33 = vrot.slane %v3739_v21, 1  ;;  %v5798_v62 = vrot.slane %v3762_v47, 1  ;;  %2814 = vmatprep.subr.bf16.mxu0 %v4495_v2  ;;  %3200 = vmatprep.subr.bf16.mxu1 %v4501_v16 }
  0x7a   :  { %v5799_v57 = vrot.slane %v3747_v31, 1  ;;  %v350_v13 = vsel %vm131_vm6, %v342_v55, %v346_v19  ;;  %v354_v30 = vsel %vm131_vm6, %v346_v19, %v342_v55  ;;  %v1491_v42 = vsel %vm131_vm6, %v1483_v32, %v1487_v49 }
  0x7b   :  { %v134_v58 = vsel %vm131_vm6, %v5795_v33, %v5794_v26  ;;  %v5796_v59 = vmov %v5795_v33  ;;  %v5797_v46 = vmov %v5794_v26  ;;  %v5801_v29 = vmov %v5798_v62 }
  0x7c   :  { %v138_v51 = vsel %vm131_vm6, %v5797_v46, %v5796_v59  ;;  %v1281_v5 = vsel %vm131_vm6, %v5799_v57, %v5798_v62  ;;  %v5800_v21 = vmov %v5799_v57  ;;  %v4698_v41 = vpack.c.bf16 %v354_v30, %v350_v13  ;;  %v5806_v59 = vld [vmem:[#allocation18_spill] sm:$0xff]  ;;  %v5808_v46 = vld [vmem:[#allocation17_spill] sm:$0xff] }
  0x7d   :  { %v4684_v22 = vpack.c.bf16 %v138_v51, %v134_v58  ;;  %v1285_v25 = vsel %vm131_vm6, %v5801_v29, %v5800_v21  ;;  %v1495_v31 = vsel %vm131_vm6, %v1487_v49, %v1483_v32  ;;  %v343_v47 = vrot.slane %v4272_v28, 1 }
  0x7e   :  { %v4707_v38 = vpack.c.bf16 %v1495_v31, %v1491_v42  ;;  %v4709_v6 = vpack.c.bf16 %v1285_v25, %v1281_v5  ;;  %v347_v27 = vrot.slane %v4298_v40, 1  ;;  %v1484_v55 = vrot.slane %v4320_v10, 1  ;;  %v5812_v42 = vld [vmem:[#allocation69_spill] sm:$0xff] }
  0x7f   :  { %v1488_v19 = vrot.slane %v4322_v3, 1  ;;  %v5802_v26 = vrot.slane %v3794_v11, 1  ;;  %v5803_v32 = vrot.slane %v3786_v0, 1  ;;  %v5807_v40 = vrot.slane %v5806_v59, 1  ;;  %v5818_v59 = vld [vmem:[#allocation21_spill] sm:$0xff] }
  0x80   :  { %v5809_v10 = vrot.slane %v5808_v46, 1  ;;  %v351_v51 = vsel %vm131_vm6, %v343_v47, %v347_v27  ;;  %v355_v62 = vsel %vm131_vm6, %v347_v27, %v343_v47  ;;  %v446_v31 = vrot.slane %v5812_v42, 1  ;;  %v5813_v47 = vld [vmem:[#allocation70_spill] sm:$0xff]  ;;  %2817 = vmatpush1.bf16.xpose.msk.msra.mxu0 %vm3667_vm5, %v4522_v36  ;;  %3203 = vmatpush1.bf16.xpose.msk.msra.mxu1 %vm3667_vm5, %v4532_v18 }
  0x81   :  { %v135_v28 = vsel %vm131_vm6, %v5803_v32, %v5802_v26  ;;  %v5804_v49 = vmov %v5803_v32  ;;  %v5805_v33 = vmov %v5802_v26  ;;  %v5811_v11 = vmov %v5807_v40  ;;  %v5814_v26 = vld [vmem:[#allocation73_spill] sm:$0xff]  ;;  %2819 = vmatprep.subr.bf16.mxu0 %v4537_v43  ;;  %3205 = vmatprep.subr.bf16.mxu1 %v4558_v23  ;;  %v5895_v23 = vld [vmem:[#allocation40_spill] sm:$0xff] }
  0x82   :  { %v139_v58 = vsel %vm131_vm6, %v5805_v33, %v5804_v49  ;;  %v1282_v3 = vsel %vm131_vm6, %v5809_v10, %v5807_v40  ;;  %v5810_v0 = vmov %v5809_v10  ;;  %v4744_v13 = vpack.c.bf16 %v355_v62, %v351_v51  ;;  %v5816_v33 = vld [vmem:[#allocation22_spill] sm:$0xff]  ;;  %v5824_v62 = vld [vmem:[#allocation25_spill] sm:$0xff]  ;;  %v5896_v43 = vld [vmem:[#allocation44_spill] sm:$0xff] }
  0x83   :  { %v4736_v57 = vpack.c.bf16 %v139_v58, %v135_v28  ;;  %v1286_v5 = vsel %vm131_vm6, %v5811_v11, %v5810_v0  ;;  %v1492_v30 = vsel %vm131_vm6, %v1484_v55, %v1488_v19  ;;  %v1496_v21 = vsel %vm131_vm6, %v1488_v19, %v1484_v55  ;;  %v5815_v28 = vld [vmem:[#allocation74_spill] sm:$0xff] }
  0x84   :  { %v4750_v29 = vpack.c.bf16 %v1286_v5, %v1282_v3  ;;  %v4752_v25 = vpack.c.bf16 %v1496_v21, %v1492_v30  ;;  %v450_v27 = vrot.slane %v5813_v47, 1  ;;  %v1586_v32 = vrot.slane %v5814_v26, 1  ;;  %v5822_v3 = vld [vmem:[#allocation26_spill] sm:$0xff] }
  0x85   :  { %v1590_v49 = vrot.slane %v5815_v28, 1  ;;  %v5817_v58 = vrot.slane %v5816_v33, 1  ;;  %v5819_v40 = vrot.slane %v5818_v59, 1  ;;  %v5823_v51 = vrot.slane %v5822_v3, 1 }
  0x86   :  { %v5825_v0 = vrot.slane %v5824_v62, 1  ;;  %v454_v5 = vsel %vm131_vm6, %v446_v31, %v450_v27  ;;  %v458_v30 = vsel %vm131_vm6, %v450_v27, %v446_v31  ;;  %v447_v33 = vrot.slane %v4397_v44, 1 }
  0x87   :  { %v242_v46 = vsel %vm131_vm6, %v5819_v40, %v5817_v58  ;;  %v5820_v55 = vmov %v5819_v40  ;;  %v5821_v19 = vmov %v5817_v58  ;;  %v5827_v47 = vmov %v5823_v51 }
  0x88   :  { %v246_v10 = vsel %vm131_vm6, %v5821_v19, %v5820_v55  ;;  %v1384_v11 = vsel %vm131_vm6, %v5825_v0, %v5823_v51  ;;  %v5826_v42 = vmov %v5825_v0  ;;  %v4794_v28 = vpack.c.bf16 %v458_v30, %v454_v5  ;;  %v5828_v55 = vld [vmem:[#allocation76_spill] sm:$0xff]  ;;  %v5831_v51 = vld [vmem:[#allocation29_spill] sm:$0xff]  ;;  %2822 = vmatpush1.bf16.xpose.msk.msra.mxu0 %vm3667_vm5, %v4560_v7  ;;  %3208 = vmatpush1.bf16.xpose.msk.msra.mxu1 %vm3667_vm5, %v4594_v53  ;;  %v5894_v7 = vld [vmem:[#allocation38_spill] sm:$0xff] }
  0x89   :  { %v4780_v21 = vpack.c.bf16 %v246_v10, %v242_v46  ;;  %v1388_v26 = vsel %vm131_vm6, %v5827_v47, %v5826_v42  ;;  %v1594_v31 = vsel %vm131_vm6, %v1586_v32, %v1590_v49  ;;  %v1598_v27 = vsel %vm131_vm6, %v1590_v49, %v1586_v32  ;;  %v5829_v10 = vld [vmem:[#allocation30_spill] sm:$0xff]  ;;  %v5837_v5 = vld [vmem:[#allocation32_spill] sm:$0xff]  ;;  %2825 = vmatprep.subr.msk.bf16.mxu0 %vm3626_vm3, %v4564_v1 }
  0x8a   :  { %v4803_v58 = vpack.c.bf16 %v1598_v27, %v1594_v31  ;;  %v4805_v59 = vpack.c.bf16 %v1388_v26, %v1384_v11  ;;  %v451_v40 = vrot.slane %v4399_v14, 1  ;;  %v1587_v46 = vrot.slane %v4435_v52, 1  ;;  %v5835_v11 = vld [vmem:[#allocation33_spill] sm:$0xff]  ;;  %3211 = vmatprep.subr.msk.bf16.mxu1 %vm3626_vm3, %v4580_v63  ;;  %v5893_v53 = vld [vmem:[#allocation36_spill] sm:$0xff] }
  0x8b   :  { %v1591_v19 = vrot.slane %v5828_v55, 1  ;;  %v5830_v3 = vrot.slane %v5829_v10, 1  ;;  %v5832_v32 = vrot.slane %v5831_v51, 1  ;;  %v5836_v14 = vrot.slane %v5835_v11, 1 }
  0x8c   :  { %v5838_v52 = vrot.slane %v5837_v5, 1  ;;  %v455_v42 = vsel %vm131_vm6, %v447_v33, %v451_v40  ;;  %v459_v47 = vsel %vm131_vm6, %v451_v40, %v447_v33  ;;  %v5841_v40 = vld [vmem:[#allocation77_spill] sm:$0xff]  ;;  %v5844_v5 = vld [vmem:[#allocation39_spill] sm:$0xff] }
  0x8d   :  { %v243_v44 = vsel %vm131_vm6, %v5832_v32, %v5830_v3  ;;  %v5833_v49 = vmov %v5832_v32  ;;  %v5834_v62 = vmov %v5830_v3  ;;  %v5840_v27 = vmov %v5836_v14 }
  0x8e   :  { %v247_v0 = vsel %vm131_vm6, %v5834_v62, %v5833_v49  ;;  %v1385_v30 = vsel %vm131_vm6, %v5838_v52, %v5836_v14  ;;  %v5839_v31 = vmov %v5838_v52  ;;  %v4840_v10 = vpack.c.bf16 %v459_v47, %v455_v42  ;;  %v5842_v49 = vld [vmem:[#allocation78_spill] sm:$0xff]  ;;  %v5846_v42 = vld [vmem:[#allocation37_spill] sm:$0xff] }
  0x8f   :  { %v4832_v26 = vpack.c.bf16 %v247_v0, %v243_v44  ;;  %v1389_v55 = vsel %vm131_vm6, %v5840_v27, %v5839_v31  ;;  %v1595_v3 = vsel %vm131_vm6, %v1587_v46, %v1591_v19  ;;  %v1599_v51 = vsel %vm131_vm6, %v1591_v19, %v1587_v46  ;;  %v5843_v0 = vld [vmem:[#allocation79_spill] sm:$0xff]  ;;  %v5850_v27 = vld [vmem:[#allocation42_spill] sm:$0xff] }
  0x90   :  { %v4846_v32 = vpack.c.bf16 %v1389_v55, %v1385_v30  ;;  %v4848_v33 = vpack.c.bf16 %v1599_v51, %v1595_v3  ;;  %v448_v44 = vrot.slane %v5841_v40, 1  ;;  %v452_v62 = vrot.slane %v5842_v49, 1  ;;  %v5852_v3 = vld [vmem:[#allocation41_spill] sm:$0xff] }
  0x91   :  { %v1588_v11 = vrot.slane %v5843_v0, 1  ;;  %v1592_v14 = vrot.slane %v4482_v34, 1  ;;  %v5845_v52 = vrot.slane %v5844_v5, 1  ;;  %v5847_v47 = vrot.slane %v5846_v42, 1 }
  0x92   :  { %v5851_v55 = vrot.slane %v5850_v27, 1  ;;  %v5853_v51 = vrot.slane %v5852_v3, 1  ;;  %v456_v40 = vsel %vm131_vm6, %v448_v44, %v452_v62  ;;  %v460_v49 = vsel %vm131_vm6, %v452_v62, %v448_v44  ;;  %v5859_v3 = vld [vmem:[#allocation43_spill] sm:$0xff] }
  0x93   :  { %v244_v31 = vsel %vm131_vm6, %v5847_v47, %v5845_v52  ;;  %v5848_v46 = vmov %v5847_v47  ;;  %v5849_v19 = vmov %v5845_v52  ;;  %v4890_v47 = vpack.c.bf16 %v460_v49, %v456_v40 }
  0x94   :  { %v248_v30 = vsel %vm131_vm6, %v5849_v19, %v5848_v46  ;;  %v1386_v34 = vsel %vm131_vm6, %v5853_v51, %v5851_v55  ;;  %v5854_v5 = vmov %v5853_v51  ;;  %v5855_v52 = vmov %v5851_v55 }
  0x95   :  { %v4876_v0 = vpack.c.bf16 %v248_v30, %v244_v31  ;;  %v1390_v42 = vsel %vm131_vm6, %v5855_v52, %v5854_v5  ;;  %v1596_v44 = vsel %vm131_vm6, %v1588_v11, %v1592_v14  ;;  %v1600_v62 = vsel %vm131_vm6, %v1592_v14, %v1588_v11  ;;  %v5857_v14 = vld [vmem:[#allocation45_spill] sm:$0xff]  ;;  %v5863_v52 = vld [vmem:[#allocation50_spill] sm:$0xff] }
  0x96   :  { %v449_v31 = vrot.slane %v4507_v35, 1  ;;  %v4903_v19 = vpack.c.bf16 %v1600_v62, %v1596_v44  ;;  %v4905_v30 = vpack.c.bf16 %v1390_v42, %v1386_v34  ;;  %v453_v27 = vrot.slane %v4528_v9, 1  ;;  %v5865_v42 = vld [vmem:[#allocation49_spill] sm:$0xff] }
  0x97   :  { %v1589_v55 = vrot.slane %v4542_v24, 1  ;;  %v1593_v11 = vrot.slane %v4544_v12, 1  ;;  %v5858_v35 = vrot.slane %v5857_v14, 1  ;;  %v5860_v51 = vrot.slane %v5859_v3, 1 }
  0x98   :  { %v5864_v9 = vrot.slane %v5863_v52, 1  ;;  %v5866_v24 = vrot.slane %v5865_v42, 1  ;;  %v457_v44 = vsel %vm131_vm6, %v449_v31, %v453_v27  ;;  %v461_v62 = vsel %vm131_vm6, %v453_v27, %v449_v31  ;;  %v5872_v52 = vld [vmem:[#allocation5_spill] sm:$0xff]  ;;  %v5873_v42 = vld [vmem:[#allocation6_spill] sm:$0xff] }
  0x99   :  { %v245_v40 = vsel %vm131_vm6, %v5860_v51, %v5858_v35  ;;  %v5861_v49 = vmov %v5860_v51  ;;  %v5862_v5 = vmov %v5858_v35  ;;  %v1601_v31 = vsel %vm131_vm6, %v1593_v11, %v1589_v55 }
  0x9a   :  { %v249_v34 = vsel %vm131_vm6, %v5862_v5, %v5861_v49  ;;  %v1387_v12 = vsel %vm131_vm6, %v5866_v24, %v5864_v9  ;;  %v5867_v14 = vmov %v5866_v24  ;;  %v5868_v3 = vmov %v5864_v9  ;;  %v2357_v49 = vld [vmem:[%s5535_s3 + $0x18] sm:$0xff]  ;;  %v5874_v24 = vld [vmem:[#allocation7_spill] sm:$0xff] }
  0x9b   :  { %v4932_v35 = vpack.c.bf16 %v249_v34, %v245_v40  ;;  %v1391_v51 = vsel %vm131_vm6, %v5868_v3, %v5867_v14  ;;  %v4943_v5 = vpack.c.bf16 %v461_v62, %v457_v44  ;;  %v1597_v9 = vsel %vm131_vm6, %v1589_v55, %v1593_v11  ;;  %752 = vmatmul.mubr.f32.vlgmr.msra.gmra.mrb[0].mxu0 %v2357_v49  ;;  %v2359_v34 = vld [vmem:[%s5535_s3 + $0x28] sm:$0xff]  ;;  %v5876_v44 = vld [vmem:[#allocation9_spill] sm:$0xff]  ;;  %v5877_v62 = vld [vmem:[#allocation10_spill] sm:$0xff] }
  0x9c   :  { %v4949_v27 = vpack.c.bf16 %v1391_v51, %v1387_v12  ;;  %v4951_v40 = vpack.c.bf16 %v1601_v31, %v1597_v9  ;;  %1891 = vmatmul.mubr.f32.vlgmr.msra.gmra.mrb[0].mxu1 %v2357_v49  ;;  %2828 = vmatpush3.bf16.xpose.msk.msra.mxu0 %vm3626_vm3, %v4596_v4  ;;  %v27_v55 = vld [vmem:[%s5535_s3 + $0x8] sm:$0xff]  ;;  %v5878_v14 = vld [vmem:[#allocation11_spill] sm:$0xff]  ;;  %v5880_v51 = vld [vmem:[#allocation13_spill] sm:$0xff] }
  0x9d   :  { %5869 = vst [vmem:[#allocation18_spill] sm:$0xff] %v4943_v5  ;;  %3214 = vmatpush3.bf16.xpose.msk.msra.mxu1 %vm3626_vm3, %v4616_v20  ;;  %2831 = vmatprep.subr.msk.bf16.mxu0 %vm3626_vm3, %v4644_v45  ;;  %v5871_v11 = vld [vmem:[#allocation4_spill] sm:$0xff]  ;;  %v5881_v49 = vld [vmem:[#allocation14_spill] sm:$0xff]  ;;  %v5882_v9 = vld [vmem:[#allocation15_spill] sm:$0xff] }
  0x9e   :  { %5870 = vst [vmem:[#allocation17_spill] sm:$0xff] %v4951_v40  ;;  %3217 = vmatprep.subr.msk.bf16.mxu1 %vm3626_vm3, %v4646_v15  ;;  %2639 = vmatprep.mubr.f32.mxu0 %v2359_v34  ;;  %v5875_v12 = vld [vmem:[#allocation8_spill] sm:$0xff] }
  0x9f   :  { %2707 = vmatprep.mubr.f32.mxu1 %v2359_v34  ;;  %v5879_v3 = vld [vmem:[#allocation12_spill] sm:$0xff] }
  0xa0   :  { %v5883_v31 = vld [vmem:[#allocation16_spill] sm:$0xff] }
  0xa4   :  { %2834 = vmatpush3.bf16.xpose.msk.msra.mxu0 %vm3626_vm3, %v4648_v60 }
  0xa5   :  { %3220 = vmatpush3.bf16.xpose.msk.msra.mxu1 %vm3626_vm3, %v4656_v39  ;;  %2837 = vmatprep.subr.msk.bf16.mxu0 %vm3626_vm3, %v4698_v41 }
  0xa6   :  { %3223 = vmatprep.subr.msk.bf16.mxu1 %vm3626_vm3, %v4707_v38 }
  0xac   :  { %2840 = vmatpush3.bf16.xpose.msk.msra.mxu0 %vm3626_vm3, %v4684_v22 }
  0xad   :  { %3226 = vmatpush3.bf16.xpose.msk.msra.mxu1 %vm3626_vm3, %v4709_v6  ;;  %2843 = vmatprep.subr.msk.bf16.mxu0 %vm3626_vm3, %v4744_v13 }
  0xae   :  { %3229 = vmatprep.subr.msk.bf16.mxu1 %vm3626_vm3, %v4752_v25 }
  0xb4   :  { %2846 = vmatpush3.bf16.xpose.msk.msra.mxu0 %vm3626_vm3, %v4736_v57 }
  0xb5   :  { %3232 = vmatpush3.bf16.xpose.msk.msra.mxu1 %vm3626_vm3, %v4750_v29  ;;  %2849 = vmatprep.subr.msk.bf16.mxu0 %vm3626_vm3, %v4794_v28 }
  0xb6   :  { %3235 = vmatprep.subr.msk.bf16.mxu1 %vm3626_vm3, %v4803_v58 }
  0xbc   :  { %2852 = vmatpush3.bf16.xpose.msk.msra.mxu0 %vm3626_vm3, %v4780_v21 }
  0xbd   :  { %3238 = vmatpush3.bf16.xpose.msk.msra.mxu1 %vm3626_vm3, %v4805_v59  ;;  %2855 = vmatprep.subr.msk.bf16.mxu0 %vm3626_vm3, %v4840_v10 }
  0xbe   :  { %3241 = vmatprep.subr.msk.bf16.mxu1 %vm3626_vm3, %v4848_v33 }
  0xc4   :  { %2858 = vmatpush3.bf16.xpose.msk.msra.mxu0 %vm3626_vm3, %v4832_v26 }
  0xc5   :  { %3244 = vmatpush3.bf16.xpose.msk.msra.mxu1 %vm3626_vm3, %v4846_v32  ;;  %2861 = vmatprep.subr.msk.bf16.mxu0 %vm3626_vm3, %v4890_v47 }
  0xc6   :  { %3247 = vmatprep.subr.msk.bf16.mxu1 %vm3626_vm3, %v4903_v19 }
  0xcc   :  { %2864 = vmatpush3.bf16.xpose.msk.msra.mxu0 %vm3626_vm3, %v4876_v0 }
  0xcd   :  { %3250 = vmatpush3.bf16.xpose.msk.msra.mxu1 %vm3626_vm3, %v4905_v30  ;;  %2867 = vmatprep.subr.msk.bf16.mxu0 %vm3626_vm3, %v4943_v5  ;;  %v5892_v5 = vld [vmem:[#allocation35_spill] sm:$0xff] }
  0xce   :  { %3253 = vmatprep.subr.msk.bf16.mxu1 %vm3626_vm3, %v4951_v40  ;;  %v5891_v40 = vld [vmem:[#allocation34_spill] sm:$0xff] }
  0xd4   :  { %2870 = vmatpush3.bf16.xpose.msk.msra.mxu0 %vm3626_vm3, %v4932_v35 }
  0xd5   :  { %3256 = vmatpush3.bf16.xpose.msk.msra.mxu1 %vm3626_vm3, %v4949_v27  ;;  %2871 = vmatprep.subr.bf16.mxu0 %v5679_v8 }
  0xd6   :  { %3257 = vmatprep.subr.bf16.mxu1 %v5679_v8 }
  0xdb   :  { %2640 = vmatmul.mubr.f32.vlgmr.msra.gmra.mrb[0].mxu0 %v2359_v34 }
  0xdc   :  { %2708 = vmatmul.mubr.f32.vlgmr.msra.gmra.mrb[0].mxu1 %v2359_v34  ;;  %2872 = vmatpush1.bf16.xpose.msra.mxu0 %v5679_v8  ;;  %v5884_v34 = vld [vmem:[#allocation19_spill] sm:$0xff] }
  0xdd   :  { %3258 = vmatpush1.bf16.xpose.msra.mxu1 %v5679_v8  ;;  %2874 = vmatprep.subr.bf16.mxu0 %v5871_v11  ;;  %v5886_v11 = vld [vmem:[#allocation23_spill] sm:$0xff] }
  0xde   :  { %3260 = vmatprep.subr.bf16.mxu1 %v5872_v52  ;;  %893 = vmatprep.mubr.f32.mxu0 %v27_v55  ;;  %v5887_v52 = vld [vmem:[#allocation24_spill] sm:$0xff]  ;;  %v5890_v8 = vld [vmem:[#allocation31_spill] sm:$0xff] }
  0xdf   :  { %2032 = vmatprep.mubr.f32.mxu1 %v27_v55  ;;  %v5885_v55 = vld [vmem:[#allocation20_spill] sm:$0xff] }
  0xe4   :  { %2877 = vmatpush1.bf16.xpose.msk.msra.mxu0 %vm3667_vm5, %v5873_v42  ;;  %v5888_v42 = vld [vmem:[#allocation27_spill] sm:$0xff] }
  0xe5   :  { %3263 = vmatpush1.bf16.xpose.msk.msra.mxu1 %vm3667_vm5, %v5874_v24  ;;  %2879 = vmatprep.subr.bf16.mxu0 %v5875_v12  ;;  %v5889_v24 = vld [vmem:[#allocation28_spill] sm:$0xff] }
  0xe6   :  { %3265 = vmatprep.subr.bf16.mxu1 %v5876_v44 }
  0xec   :  { %2882 = vmatpush1.bf16.xpose.msk.msra.mxu0 %vm3667_vm5, %v5877_v62 }
  0xed   :  { %3268 = vmatpush1.bf16.xpose.msk.msra.mxu1 %vm3667_vm5, %v5878_v14  ;;  %2884 = vmatprep.subr.bf16.mxu0 %v5879_v3 }
  0xee   :  { %3270 = vmatprep.subr.bf16.mxu1 %v5880_v51 }
  0xf4   :  { %2887 = vmatpush1.bf16.xpose.msk.msra.mxu0 %vm3667_vm5, %v5881_v49 }
  0xf5   :  { %3273 = vmatpush1.bf16.xpose.msk.msra.mxu1 %vm3667_vm5, %v5882_v9  ;;  %2889 = vmatprep.subr.bf16.mxu0 %v5883_v31 }
  0xf6   :  { %3275 = vmatprep.subr.bf16.mxu1 %v5884_v34 }
  0xfc   :  { %2892 = vmatpush1.bf16.xpose.msk.msra.mxu0 %vm3667_vm5, %v5885_v55 }
  0xfd   :  { %3278 = vmatpush1.bf16.xpose.msk.msra.mxu1 %vm3667_vm5, %v5886_v11  ;;  %2894 = vmatprep.subr.bf16.mxu0 %v5887_v52 }
  0xfe   :  { %3280 = vmatprep.subr.bf16.mxu1 %v5888_v42 }
 0x104   :  { %2897 = vmatpush1.bf16.xpose.msk.msra.mxu0 %vm3667_vm5, %v5889_v24  ;;  %v5897_v24 = vld [vmem:[#allocation46_spill] sm:$0xff] }
 0x105   :  { %3283 = vmatpush1.bf16.xpose.msk.msra.mxu1 %vm3667_vm5, %v5890_v8  ;;  %2899 = vmatprep.subr.bf16.mxu0 %v5891_v40  ;;  %v5898_v8 = vld [vmem:[#allocation48_spill] sm:$0xff]  ;;  %v5900_v40 = vld [vmem:[#allocation51_spill] sm:$0xff] }
 0x106   :  { %3285 = vmatprep.subr.bf16.mxu1 %v5892_v5  ;;  %v5899_v5 = vld [vmem:[#allocation47_spill] sm:$0xff] }
 0x10c   :  { %2902 = vmatpush1.bf16.xpose.msk.msra.mxu0 %vm3667_vm5, %v5893_v53  ;;  %v5901_v53 = vld [vmem:[#allocation52_spill] sm:$0xff] }
 0x10d   :  { %3288 = vmatpush1.bf16.xpose.msk.msra.mxu1 %vm3667_vm5, %v5894_v7  ;;  %2904 = vmatprep.subr.bf16.mxu0 %v5895_v23  ;;  %v5902_v7 = vld [vmem:[#allocation53_spill] sm:$0xff]  ;;  %v5904_v23 = vld [vmem:[#allocation55_spill] sm:$0xff] }
 0x10e   :  { %3290 = vmatprep.subr.bf16.mxu1 %v5896_v43  ;;  %v5903_v43 = vld [vmem:[#allocation54_spill] sm:$0xff] }
 0x114   :  { %2907 = vmatpush1.bf16.xpose.msk.msra.mxu0 %vm3667_vm5, %v5897_v24  ;;  %v5905_v24 = vld [vmem:[#allocation56_spill] sm:$0xff] }
 0x115   :  { %3293 = vmatpush1.bf16.xpose.msk.msra.mxu1 %vm3667_vm5, %v5898_v8  ;;  %2909 = vmatprep.subr.bf16.mxu0 %v5899_v5  ;;  %v5906_v8 = vld [vmem:[#allocation57_spill] sm:$0xff]  ;;  %v5908_v5 = vld [vmem:[#allocation60_spill] sm:$0xff] }
 0x116   :  { %3295 = vmatprep.subr.bf16.mxu1 %v5900_v40  ;;  %v5907_v40 = vld [vmem:[#allocation58_spill] sm:$0xff] }
 0x11c   :  { %2912 = vmatpush1.bf16.xpose.msk.msra.mxu0 %vm3667_vm5, %v5901_v53  ;;  %v5909_v53 = vld [vmem:[#allocation59_spill] sm:$0xff] }
 0x11d   :  { %3298 = vmatpush1.bf16.xpose.msk.msra.mxu1 %vm3667_vm5, %v5902_v7  ;;  %2914 = vmatprep.subr.bf16.mxu0 %v5903_v43  ;;  %v5910_v7 = vld [vmem:[#allocation61_spill] sm:$0xff]  ;;  %v5912_v43 = vld [vmem:[#allocation63_spill] sm:$0xff] }
 0x11e   :  { %3300 = vmatprep.subr.bf16.mxu1 %v5904_v23  ;;  %v5911_v23 = vld [vmem:[#allocation62_spill] sm:$0xff] }
 0x124   :  { %2917 = vmatpush1.bf16.xpose.msk.msra.mxu0 %vm3667_vm5, %v5905_v24  ;;  %v5913_v24 = vld [vmem:[#allocation64_spill] sm:$0xff] }
 0x125   :  { %3303 = vmatpush1.bf16.xpose.msk.msra.mxu1 %vm3667_vm5, %v5906_v8  ;;  %2919 = vmatprep.subr.bf16.mxu0 %v5907_v40  ;;  %v5914_v8 = vld [vmem:[#allocation65_spill] sm:$0xff]  ;;  %v5916_v40 = vld [vmem:[#allocation67_spill] sm:$0xff] }
 0x126   :  { %3305 = vmatprep.subr.bf16.mxu1 %v5908_v5  ;;  %v5915_v5 = vld [vmem:[#allocation66_spill] sm:$0xff] }
 0x12c   :  { %2922 = vmatpush1.bf16.xpose.msk.msra.mxu0 %vm3667_vm5, %v5909_v53  ;;  %v5917_v53 = vld [vmem:[#allocation68_spill] sm:$0xff] }
 0x12d   :  { %3308 = vmatpush1.bf16.xpose.msk.msra.mxu1 %vm3667_vm5, %v5910_v7  ;;  %2924 = vmatprep.subr.bf16.mxu0 %v5911_v23  ;;  %v5918_v7 = vld [vmem:[#allocation71_spill] sm:$0xff] }
 0x12e   :  { %3310 = vmatprep.subr.bf16.mxu1 %v5912_v43  ;;  %v5919_v43 = vld [vmem:[#allocation72_spill] sm:$0xff]  ;;  %v5920_v23 = vld [vmem:[#allocation75_spill] sm:$0xff] }
 0x134   :  { %2927 = vmatpush1.bf16.xpose.msk.msra.mxu0 %vm3667_vm5, %v5913_v24 }
 0x135   :  { %3313 = vmatpush1.bf16.xpose.msk.msra.mxu1 %vm3667_vm5, %v5914_v8  ;;  %2929 = vmatprep.subr.bf16.mxu0 %v5915_v5 }
 0x136   :  { %3315 = vmatprep.subr.bf16.mxu1 %v5916_v40 }
 0x13c   :  { %2932 = vmatpush1.bf16.xpose.msk.msra.mxu0 %vm3667_vm5, %v5917_v53 }
 0x13d   :  { %3318 = vmatpush1.bf16.xpose.msk.msra.mxu1 %vm3667_vm5, %v5918_v7  ;;  %2934 = vmatprep.subr.bf16.mxu0 %v5919_v43 }
 0x13e   :  { %3320 = vmatprep.subr.bf16.mxu1 %v5920_v23 }
 0x144   :  { %2937 = vmatpush1.bf16.xpose.msk.msra.mxu0 %vm3667_vm5, %v4407_v50 }
 0x145   :  { %3323 = vmatpush1.bf16.xpose.msk.msra.mxu1 %vm3667_vm5, %v4423_v37  ;;  %2939 = vmatprep.subr.bf16.mxu0 %v4427_v61 }
 0x146   :  { %3325 = vmatprep.subr.bf16.mxu1 %v4466_v54 }
 0x14c   :  { %2942 = vmatpush1.bf16.xpose.msk.msra.mxu0 %vm3667_vm5, %v4458_v56 }
 0x14d   :  { %3328 = vmatpush1.bf16.xpose.msk.msra.mxu1 %vm3667_vm5, %v4491_v17  ;;  %2944 = vmatprep.subr.bf16.mxu0 %v4495_v2  ;;  %v5921_v2 = vmov 0.0|0.0  }
 0x14e   :  { %3330 = vmatprep.subr.bf16.mxu1 %v4501_v16  ;;  %v26_v16 = vld [vmem:[%s5535_s3] sm:$0xff] }
 0x154   :  { %2947 = vmatpush1.bf16.xpose.msk.msra.mxu0 %vm3667_vm5, %v4522_v36  ;;  %v28_v36 = vld [vmem:[%s5535_s3 + $0x10] sm:$0xff] }
 0x155   :  { %3333 = vmatpush1.bf16.xpose.msk.msra.mxu1 %vm3667_vm5, %v4532_v18  ;;  %2950 = vmatprep.subr.msk.bf16.mxu0 %vm3626_vm3, %v4932_v35 }
 0x156   :  { %3336 = vmatprep.subr.msk.bf16.mxu1 %vm3626_vm3, %v4949_v27 }
 0x15b   :  { %894 = vmatmul.mubr.f32.vlgmr.msra.gmra.mrb[0].mxu0 %v26_v16 }
 0x15c   :  { %2033 = vmatmul.mubr.f32.vlgmr.msra.gmra.mrb[0].mxu1 %v26_v16  ;;  %2951 = vmatpush3.bf16.xpose.msra.mxu0 %v5921_v2  ;;  %v2361_v16 = vld [vmem:[%s5535_s3 + $0x38] sm:$0xff] }
 0x15d   :  { %3337 = vmatpush3.bf16.xpose.msra.mxu1 %v5921_v2  ;;  %2954 = vmatprep.subr.msk.bf16.mxu0 %vm3626_vm3, %v4564_v1 }
 0x15e   :  { %3340 = vmatprep.subr.msk.bf16.mxu1 %vm3626_vm3, %v4580_v63  ;;  %2673 = vmatprep.mubr.f32.mxu0 %v28_v36 }
 0x15f   :  { %2741 = vmatprep.mubr.f32.mxu1 %v28_v36 }
 0x164   :  { %2957 = vmatpush3.bf16.xpose.msk.msra.mxu0 %vm3626_vm3, %v4596_v4  ;;  %v5923_v4 = vld [vmem:[#allocation31_spill] sm:$0xff] }
 0x165   :  { %3343 = vmatpush3.bf16.xpose.msk.msra.mxu1 %vm3626_vm3, %v4616_v20  ;;  %2960 = vmatprep.subr.msk.bf16.mxu0 %vm3626_vm3, %v4644_v45  ;;  %v5924_v20 = vld [vmem:[#allocation34_spill] sm:$0xff] }
 0x166   :  { %3346 = vmatprep.subr.msk.bf16.mxu1 %vm3626_vm3, %v4646_v15 }
 0x16c   :  { %2963 = vmatpush3.bf16.xpose.msk.msra.mxu0 %vm3626_vm3, %v4648_v60 }
 0x16d   :  { %3349 = vmatpush3.bf16.xpose.msk.msra.mxu1 %vm3626_vm3, %v4656_v39  ;;  %2966 = vmatprep.subr.msk.bf16.mxu0 %vm3626_vm3, %v4698_v41 }
 0x16e   :  { %3352 = vmatprep.subr.msk.bf16.mxu1 %vm3626_vm3, %v4707_v38 }
 0x174   :  { %2969 = vmatpush3.bf16.xpose.msk.msra.mxu0 %vm3626_vm3, %v4684_v22 }
 0x175   :  { %3355 = vmatpush3.bf16.xpose.msk.msra.mxu1 %vm3626_vm3, %v4709_v6  ;;  %2972 = vmatprep.subr.msk.bf16.mxu0 %vm3626_vm3, %v4744_v13 }
 0x176   :  { %3358 = vmatprep.subr.msk.bf16.mxu1 %vm3626_vm3, %v4752_v25 }
 0x17c   :  { %2975 = vmatpush3.bf16.xpose.msk.msra.mxu0 %vm3626_vm3, %v4736_v57 }
 0x17d   :  { %3361 = vmatpush3.bf16.xpose.msk.msra.mxu1 %vm3626_vm3, %v4750_v29  ;;  %2978 = vmatprep.subr.msk.bf16.mxu0 %vm3626_vm3, %v4794_v28 }
 0x17e   :  { %3364 = vmatprep.subr.msk.bf16.mxu1 %vm3626_vm3, %v4803_v58 }
 0x184   :  { %2981 = vmatpush3.bf16.xpose.msk.msra.mxu0 %vm3626_vm3, %v4780_v21 }
 0x185   :  { %3367 = vmatpush3.bf16.xpose.msk.msra.mxu1 %vm3626_vm3, %v4805_v59  ;;  %2984 = vmatprep.subr.msk.bf16.mxu0 %vm3626_vm3, %v4840_v10 }
 0x186   :  { %3370 = vmatprep.subr.msk.bf16.mxu1 %vm3626_vm3, %v4848_v33 }
 0x18c   :  { %2987 = vmatpush3.bf16.xpose.msk.msra.mxu0 %vm3626_vm3, %v4832_v26 }
 0x18d   :  { %3373 = vmatpush3.bf16.xpose.msk.msra.mxu1 %vm3626_vm3, %v4846_v32  ;;  %2990 = vmatprep.subr.msk.bf16.mxu0 %vm3626_vm3, %v4890_v47 }
 0x18e   :  { %3376 = vmatprep.subr.msk.bf16.mxu1 %vm3626_vm3, %v4903_v19 }
 0x194   :  { %2993 = vmatpush3.bf16.xpose.msk.msra.mxu0 %vm3626_vm3, %v4876_v0 }
 0x195   :  { %3379 = vmatpush3.bf16.xpose.msk.msra.mxu1 %vm3626_vm3, %v4905_v30  ;;  %2995 = vmatprep.subr.bf16.mxu0 %v5875_v12  ;;  %v5925_v12 = vld [vmem:[#allocation35_spill] sm:$0xff] }
 0x196   :  { %3381 = vmatprep.subr.bf16.mxu1 %v5876_v44  ;;  %v5926_v44 = vld [vmem:[#allocation36_spill] sm:$0xff] }
 0x19b   :  { %2674 = vmatmul.mubr.f32.vlgmr.msra.gmra.mrb[0].mxu0 %v28_v36 }
 0x19c   :  { %2742 = vmatmul.mubr.f32.vlgmr.msra.gmra.mrb[0].mxu1 %v28_v36  ;;  %2998 = vmatpush1.bf16.xpose.msk.msra.mxu0 %vm3667_vm5, %v5877_v62  ;;  %v5922_v36 = vld [vmem:[#allocation28_spill] sm:$0xff]  ;;  %v5927_v62 = vld [vmem:[#allocation38_spill] sm:$0xff] }
 0x19d   :  { %3384 = vmatpush1.bf16.xpose.msk.msra.mxu1 %vm3667_vm5, %v5878_v14  ;;  %3000 = vmatprep.subr.bf16.mxu0 %v5879_v3  ;;  %v5928_v14 = vld [vmem:[#allocation40_spill] sm:$0xff] }
 0x19e   :  { %3386 = vmatprep.subr.bf16.mxu1 %v5880_v51  ;;  %1132 = vmatprep.mubr.f32.mxu0 %v2361_v16  ;;  %v5929_v3 = vld [vmem:[#allocation44_spill] sm:$0xff]  ;;  %v5930_v51 = vld [vmem:[#allocation46_spill] sm:$0xff] }
 0x19f   :  { %2270 = vmatprep.mubr.f32.mxu1 %v2361_v16  ;;  %v5939_v16 = vld [vmem:[#allocation57_spill] sm:$0xff] }
 0x1a4   :  { %3003 = vmatpush1.bf16.xpose.msk.msra.mxu0 %vm3667_vm5, %v5881_v49  ;;  %v5931_v49 = vld [vmem:[#allocation48_spill] sm:$0xff] }
 0x1a5   :  { %3389 = vmatpush1.bf16.xpose.msk.msra.mxu1 %vm3667_vm5, %v5882_v9  ;;  %3005 = vmatprep.subr.bf16.mxu0 %v5883_v31  ;;  %v5932_v9 = vld [vmem:[#allocation47_spill] sm:$0xff] }
 0x1a6   :  { %3391 = vmatprep.subr.bf16.mxu1 %v5884_v34  ;;  %v5933_v31 = vld [vmem:[#allocation51_spill] sm:$0xff]  ;;  %v5934_v34 = vld [vmem:[#allocation52_spill] sm:$0xff] }
 0x1ac   :  { %3008 = vmatpush1.bf16.xpose.msk.msra.mxu0 %vm3667_vm5, %v5885_v55  ;;  %v5935_v55 = vld [vmem:[#allocation53_spill] sm:$0xff] }
 0x1ad   :  { %3394 = vmatpush1.bf16.xpose.msk.msra.mxu1 %vm3667_vm5, %v5886_v11  ;;  %3010 = vmatprep.subr.bf16.mxu0 %v5887_v52  ;;  %v5936_v11 = vld [vmem:[#allocation54_spill] sm:$0xff]  ;;  %v5937_v52 = vld [vmem:[#allocation55_spill] sm:$0xff] }
 0x1ae   :  { %3396 = vmatprep.subr.bf16.mxu1 %v5888_v42  ;;  %v5938_v42 = vld [vmem:[#allocation56_spill] sm:$0xff] }
 0x1b4   :  { %3013 = vmatpush1.bf16.xpose.msk.msra.mxu0 %vm3667_vm5, %v5922_v36  ;;  %v5940_v36 = vld [vmem:[#allocation58_spill] sm:$0xff] }
 0x1b5   :  { %3399 = vmatpush1.bf16.xpose.msk.msra.mxu1 %vm3667_vm5, %v5923_v4  ;;  %3015 = vmatprep.subr.bf16.mxu0 %v5924_v20  ;;  %v5941_v4 = vld [vmem:[#allocation60_spill] sm:$0xff]  ;;  %v5942_v20 = vld [vmem:[#allocation59_spill] sm:$0xff] }
 0x1b6   :  { %3401 = vmatprep.subr.bf16.mxu1 %v5925_v12  ;;  %v5943_v12 = vld [vmem:[#allocation61_spill] sm:$0xff] }
 0x1bc   :  { %3018 = vmatpush1.bf16.xpose.msk.msra.mxu0 %vm3667_vm5, %v5926_v44  ;;  %v5944_v44 = vld [vmem:[#allocation62_spill] sm:$0xff] }
 0x1bd   :  { %3404 = vmatpush1.bf16.xpose.msk.msra.mxu1 %vm3667_vm5, %v5927_v62  ;;  %3020 = vmatprep.subr.bf16.mxu0 %v5928_v14  ;;  %v5945_v62 = vld [vmem:[#allocation63_spill] sm:$0xff] }
 0x1be   :  { %3406 = vmatprep.subr.bf16.mxu1 %v5929_v3 }
 0x1c4   :  { %3023 = vmatpush1.bf16.xpose.msk.msra.mxu0 %vm3667_vm5, %v5930_v51 }
 0x1c5   :  { %3409 = vmatpush1.bf16.xpose.msk.msra.mxu1 %vm3667_vm5, %v5931_v49  ;;  %3025 = vmatprep.subr.bf16.mxu0 %v5932_v9 }
 0x1c6   :  { %3411 = vmatprep.subr.bf16.mxu1 %v5933_v31 }
 0x1cc   :  { %3028 = vmatpush1.bf16.xpose.msk.msra.mxu0 %vm3667_vm5, %v5934_v34 }
 0x1cd   :  { %3414 = vmatpush1.bf16.xpose.msk.msra.mxu1 %vm3667_vm5, %v5935_v55  ;;  %3030 = vmatprep.subr.bf16.mxu0 %v5936_v11 }
 0x1ce   :  { %3416 = vmatprep.subr.bf16.mxu1 %v5937_v52 }
 0x1d4   :  { %3033 = vmatpush1.bf16.xpose.msk.msra.mxu0 %vm3667_vm5, %v5938_v42 }
 0x1d5   :  { %3419 = vmatpush1.bf16.xpose.msk.msra.mxu1 %vm3667_vm5, %v5939_v16  ;;  %3035 = vmatprep.subr.bf16.mxu0 %v5940_v36 }
 0x1d6   :  { %3421 = vmatprep.subr.bf16.mxu1 %v5941_v4 }
 0x1dc   :  { %3038 = vmatpush1.bf16.xpose.msk.msra.mxu0 %vm3667_vm5, %v5942_v20 }
 0x1dd   :  { %3424 = vmatpush1.bf16.xpose.msk.msra.mxu1 %vm3667_vm5, %v5943_v12  ;;  %3040 = vmatprep.subr.bf16.mxu0 %v5944_v44 }
 0x1de   :  { %3426 = vmatprep.subr.bf16.mxu1 %v5945_v62 }
 0x1e4   :  { %3043 = vmatpush1.bf16.xpose.msk.msra.mxu0 %vm3667_vm5, %v5913_v24 }
 0x1e5   :  { %3429 = vmatpush1.bf16.xpose.msk.msra.mxu1 %vm3667_vm5, %v5914_v8  ;;  %3045 = vmatprep.subr.bf16.mxu0 %v5915_v5 }
 0x1e6   :  { %3431 = vmatprep.subr.bf16.mxu1 %v5916_v40 }
 0x1ec   :  { %3048 = vmatpush1.bf16.xpose.msk.msra.mxu0 %vm3667_vm5, %v5917_v53 }
 0x1ed   :  { %3434 = vmatpush1.bf16.xpose.msk.msra.mxu1 %vm3667_vm5, %v5918_v7  ;;  %3050 = vmatprep.subr.bf16.mxu0 %v5919_v43  ;;  %v5946_v43 = vld [vmem:[#allocation80_spill] sm:$0xff]  ;;  %v5954_v7 = vld [vmem:[#allocation17_spill] sm:$0xff] }
 0x1ee   :  { %3436 = vmatprep.subr.bf16.mxu1 %v5920_v23  ;;  %v5947_v23 = vld [vmem:[#allocation81_spill] sm:$0xff] }
 0x1f4   :  { %3053 = vmatpush1.bf16.xpose.msk.msra.mxu0 %vm3667_vm5, %v4407_v50  ;;  %v5948_v50 = vld [vmem:[#allocation82_spill] sm:$0xff] }
 0x1f5   :  { %3439 = vmatpush1.bf16.xpose.msk.msra.mxu1 %vm3667_vm5, %v4423_v37  ;;  %3055 = vmatprep.subr.bf16.mxu0 %v4427_v61  ;;  %v5949_v61 = vld [vmem:[#allocation83_spill] sm:$0xff]  ;;  %v5950_v37 = vld [vmem:[#allocation84_spill] sm:$0xff] }
 0x1f6   :  { %3441 = vmatprep.subr.bf16.mxu1 %v4466_v54  ;;  %v5952_v54 = vld [vmem:[#allocation86_spill] sm:$0xff] }
 0x1fc   :  { %3058 = vmatpush1.bf16.xpose.msk.msra.mxu0 %vm3667_vm5, %v4458_v56  ;;  %v5951_v56 = vld [vmem:[#allocation85_spill] sm:$0xff] }
 0x1fd   :  { %3444 = vmatpush1.bf16.xpose.msk.msra.mxu1 %vm3667_vm5, %v4491_v17  ;;  %3060 = vmatprep.subr.bf16.mxu0 %v5946_v43  ;;  %v2360_v17 = vld [vmem:[%s5535_s3 + $0x30] sm:$0xff] }
 0x1fe   :  { %3446 = vmatprep.subr.bf16.mxu1 %v5947_v23 }
 0x204   :  { %3063 = vmatpush1.bf16.xpose.msk.msra.mxu0 %vm3667_vm5, %v5948_v50 }
 0x205   :  { %3449 = vmatpush1.bf16.xpose.msk.msra.mxu1 %vm3667_vm5, %v4532_v18  ;;  %3065 = vmatprep.subr.bf16.mxu0 %v5949_v61  ;;  %v5953_v18 = vld [vmem:[#allocation18_spill] sm:$0xff] }
 0x206   :  { %3451 = vmatprep.subr.bf16.mxu1 %v5950_v37 }
 0x20c   :  { %3068 = vmatpush1.bf16.xpose.msk.msra.mxu0 %vm3667_vm5, %v5951_v56 }
 0x20d   :  { %3454 = vmatpush1.bf16.xpose.msk.msra.mxu1 %vm3667_vm5, %v5952_v54  ;;  %3069 = vmatprep.subr.bf16.mxu0 %v5921_v2 }
 0x20e   :  { %3455 = vmatprep.subr.bf16.mxu1 %v5921_v2 }
 0x213   :  { %1133 = vmatmul.mubr.f32.vlgmr.msra.gmra.mrb[0].mxu0 %v2360_v17 }
 0x214   :  { %2271 = vmatmul.mubr.f32.vlgmr.msra.gmra.mrb[0].mxu1 %v2360_v17  ;;  %3072 = vmatpush1.bf16.xpose.msk.msra.mxu0 %vm3626_vm3, %v4648_v60 }
 0x215   :  { %3458 = vmatpush1.bf16.xpose.msk.msra.mxu1 %vm3626_vm3, %v4656_v39  ;;  %3073 = vmatprep.subr.bf16.mxu0 %v5921_v2 }
 0x216   :  { %3459 = vmatprep.subr.bf16.mxu1 %v5921_v2  ;;  %1203 = vmatprep.mubr.f32.mxu0 %v3542_v48 }
 0x217   :  { %2341 = vmatprep.mubr.f32.mxu1 %v3542_v48 }
 0x21c   :  { %3076 = vmatpush1.bf16.xpose.msk.msra.mxu0 %vm3626_vm3, %v4684_v22 }
 0x21d   :  { %3462 = vmatpush1.bf16.xpose.msk.msra.mxu1 %vm3626_vm3, %v4709_v6  ;;  %3077 = vmatprep.subr.bf16.mxu0 %v5921_v2 }
 0x21e   :  { %3463 = vmatprep.subr.bf16.mxu1 %v5921_v2 }
 0x224   :  { %3080 = vmatpush1.bf16.xpose.msk.msra.mxu0 %vm3626_vm3, %v4736_v57 }
 0x225   :  { %3466 = vmatpush1.bf16.xpose.msk.msra.mxu1 %vm3626_vm3, %v4750_v29  ;;  %3081 = vmatprep.subr.bf16.mxu0 %v5921_v2 }
 0x226   :  { %3467 = vmatprep.subr.bf16.mxu1 %v5921_v2 }
 0x22c   :  { %3084 = vmatpush1.bf16.xpose.msk.msra.mxu0 %vm3626_vm3, %v4780_v21 }
 0x22d   :  { %3470 = vmatpush1.bf16.xpose.msk.msra.mxu1 %vm3626_vm3, %v4805_v59  ;;  %3085 = vmatprep.subr.bf16.mxu0 %v5921_v2 }
 0x22e   :  { %3471 = vmatprep.subr.bf16.mxu1 %v5921_v2 }
 0x234   :  { %3088 = vmatpush1.bf16.xpose.msk.msra.mxu0 %vm3626_vm3, %v4832_v26 }
 0x235   :  { %3474 = vmatpush1.bf16.xpose.msk.msra.mxu1 %vm3626_vm3, %v4846_v32  ;;  %3089 = vmatprep.subr.bf16.mxu0 %v5921_v2 }
 0x236   :  { %3475 = vmatprep.subr.bf16.mxu1 %v5921_v2 }
 0x23c   :  { %3092 = vmatpush1.bf16.xpose.msk.msra.mxu0 %vm3626_vm3, %v4876_v0 }
 0x23d   :  { %3478 = vmatpush1.bf16.xpose.msk.msra.mxu1 %vm3626_vm3, %v4905_v30  ;;  %3093 = vmatprep.subr.bf16.mxu0 %v5921_v2 }
 0x23e   :  { %3479 = vmatprep.subr.bf16.mxu1 %v5921_v2 }
 0x244   :  { %3096 = vmatpush1.bf16.xpose.msk.msra.mxu0 %vm3626_vm3, %v4932_v35 }
 0x245   :  { %3482 = vmatpush1.bf16.xpose.msk.msra.mxu1 %vm3626_vm3, %v4949_v27  ;;  %3097 = vmatprep.subr.bf16.mxu0 %v5921_v2 }
 0x246   :  { %3483 = vmatprep.subr.bf16.mxu1 %v5921_v2 }
 0x24c   :  { %3100 = vmatpush1.bf16.xpose.msk.msra.mxu0 %vm3626_vm3, %v4564_v1  ;;  %v2362_v1 = vld [vmem:[%s5535_s3 + $0x40] sm:$0xff] }
 0x24d   :  { %3486 = vmatpush1.bf16.xpose.msk.msra.mxu1 %vm3626_vm3, %v4580_v63  ;;  %3101 = vmatprep.subr.bf16.mxu0 %v5921_v2 }
 0x24e   :  { %3487 = vmatprep.subr.bf16.mxu1 %v5921_v2 }
 0x254   :  { %3104 = vmatpush1.bf16.xpose.msk.msra.mxu0 %vm3626_vm3, %v4644_v45 }
 0x255   :  { %3490 = vmatpush1.bf16.xpose.msk.msra.mxu1 %vm3626_vm3, %v4646_v15  ;;  %3105 = vmatprep.subr.bf16.mxu0 %v5921_v2 }
 0x256   :  { %3491 = vmatprep.subr.bf16.mxu1 %v5921_v2 }
 0x25c   :  { %3108 = vmatpush1.bf16.xpose.msk.msra.mxu0 %vm3626_vm3, %v4698_v41 }
 0x25d   :  { %3494 = vmatpush1.bf16.xpose.msk.msra.mxu1 %vm3626_vm3, %v4707_v38  ;;  %3109 = vmatprep.subr.bf16.mxu0 %v5921_v2 }
 0x25e   :  { %3495 = vmatprep.subr.bf16.mxu1 %v5921_v2 }
 0x264   :  { %3112 = vmatpush1.bf16.xpose.msk.msra.mxu0 %vm3626_vm3, %v4744_v13 }
 0x265   :  { %3498 = vmatpush1.bf16.xpose.msk.msra.mxu1 %vm3626_vm3, %v4752_v25  ;;  %3113 = vmatprep.subr.bf16.mxu0 %v5921_v2 }
 0x266   :  { %3499 = vmatprep.subr.bf16.mxu1 %v5921_v2 }
 0x26c   :  { %3116 = vmatpush1.bf16.xpose.msk.msra.mxu0 %vm3626_vm3, %v4794_v28 }
 0x26d   :  { %3502 = vmatpush1.bf16.xpose.msk.msra.mxu1 %vm3626_vm3, %v4803_v58  ;;  %3117 = vmatprep.subr.bf16.mxu0 %v5921_v2 }
 0x26e   :  { %3503 = vmatprep.subr.bf16.mxu1 %v5921_v2 }
 0x274   :  { %3120 = vmatpush1.bf16.xpose.msk.msra.mxu0 %vm3626_vm3, %v4840_v10 }
 0x275   :  { %3506 = vmatpush1.bf16.xpose.msk.msra.mxu1 %vm3626_vm3, %v4848_v33  ;;  %3121 = vmatprep.subr.bf16.mxu0 %v5921_v2 }
 0x276   :  { %3507 = vmatprep.subr.bf16.mxu1 %v5921_v2 }
 0x27c   :  { %3124 = vmatpush1.bf16.xpose.msk.msra.mxu0 %vm3626_vm3, %v4890_v47 }
 0x27d   :  { %3510 = vmatpush1.bf16.xpose.msk.msra.mxu1 %vm3626_vm3, %v4903_v19  ;;  %3125 = vmatprep.subr.bf16.mxu0 %v5921_v2 }
 0x27e   :  { %3511 = vmatprep.subr.bf16.mxu1 %v5921_v2 }
 0x284   :  { %3128 = vmatpush1.bf16.xpose.msk.msra.mxu0 %vm3626_vm3, %v5953_v18 }
 0x285   :  { %3514 = vmatpush1.bf16.xpose.msk.msra.mxu1 %vm3626_vm3, %v5954_v7 }
 0x28b   :  { %1204 = vmatmul.mubr.f32.vlgmr.msra.gmra.mrb[0].mxu0 %v2362_v1 }
 0x28c   :  { %2342 = vmatmul.mubr.f32.vlgmr.msra.gmra.mrb[0].mxu1 %v2362_v1 }
 0x35e   :  { %v1205_v63 = vpop.f32.mrb[0].mxu0 }
 0x35f   :  { %v2343_v53 = vpop.f32.mrb[0].mxu1  ;;  %1212 = vst [vmem:[%s5536_s4] sm:$0xff] %v1205_v63  ;;  %v1207_v2 = vpop.f32.mrb[1].mxu0 }
 0x360   :  { %2421 = vst [vmem:[%s5536_s4 + $0x10] sm:$0xff] %v2343_v53  ;;  %v2345_v45 = vpop.f32.mrb[1].mxu1  ;;  %1213 = vst [vmem:[%s5536_s4 + $0x8] sm:$0xff] %v1207_v2 }
 0x361   :  { %2422 = vst [vmem:[%s5536_s4 + $0x18] sm:$0xff] %v2345_v45 }

</bundles_post_ra>
